<compile_context>
chip_gen: v6e
topology: v6e:2x2x1
jax: 0.10.0
libtpu: 0.0.40
codegen_flags: <defaults>
</compile_context>

<pallas_src>
import functools

import numpy as np
import jax
import jax.numpy as jnp
from jax import lax
from jax.experimental import pallas as pl
from jax.experimental.pallas import tpu as pltpu


def _pair(v):
    return (v, v) if isinstance(v, int) else tuple(v)


def _round_up(v, m):
    return ((v + m - 1) // m) * m


# --------------------------------------------------------------------------
# Pallas kernel: per output phase, one lane-concatenated patch -> one MXU dot.
# --------------------------------------------------------------------------
def _phase_conv_kernel(x_ref, w_ref, b_ref, o_ref, *, TY, OWp, roff, coff, sh, sw):
    """x_ref: (1, 1, BH, Wp, IC)  padded input row band (halo'd)
       w_ref: (sh, sw, Kp, OCp)   per-phase packed weights (Kp = T_h*T_w*IC)
       b_ref: (1, OCp)            packed bias
       o_ref: (1, TY, sh, sw, OWp, OCp)  lane-dense phase-separated output."""
    bias = b_ref[...]                                      # (1, OCp), f32
    for py in range(sh):                                   # static unroll
        for px in range(sw):
            # Fold every tap of this phase into one contraction of depth Kp.
            slices = [x_ref[0, 0, ra:ra + TY, cb:cb + OWp, :]
                      for ra in roff[py] for cb in coff[px]]
            patch = (jnp.concatenate(slices, axis=-1)
                     if len(slices) > 1 else slices[0])    # (TY, OWp, Kp)
            acc = jnp.dot(patch.reshape(TY * OWp, -1), w_ref[py, px],
                          preferred_element_type=jnp.float32)
            acc = acc + bias                               # fused into store pass
            o_ref[0, :, py, px, :, :] = (
                acc.reshape(TY, OWp, -1).astype(o_ref.dtype))


# --------------------------------------------------------------------------
# One-time parameter packing (per-phase tap tables + weights), done at init.
# --------------------------------------------------------------------------
def pack_conv_transpose_params(w_pt, bias, *, stride, padding, dilation,
                               compute_dtype=jnp.float32):
    """PyTorch ConvTranspose2d weight (IC, OC, KH, KW) + bias (OC,) ->
       (w_packed (sh, sw, Kp, OCp), b_packed (1, OCp), meta dict of Python
       statics).  conv_transpose:  y[oy,ox,oc] += x[ih,iw,ic]*w[ic,oc,kh,kw]
       with ih = (oy + ph - kh*dh)/sh, iw = (ox + pw - kw*dw)/sw (integral)."""
    IC, OC, KH, KW = map(int, w_pt.shape)
    sh, sw = _pair(stride)
    ph, pw = _pair(padding)
    dh, dw = _pair(dilation)

    def tap_table(nk, d, p, s):
        taps, offs = [], []
        for phase in range(s):
            ks = [k for k in range(nk) if (phase + p - k * d) % s == 0]
            es = [(phase + p - k * d) // s for k in ks]
            taps.append(ks)
            offs.append(es)
        t_max = max(1, max(len(k) for k in taps))
        return taps, offs, t_max

    kh_taps, eh, T_h = tap_table(KH, dh, ph, sh)
    kw_taps, ew, T_w = tap_table(KW, dw, pw, sw)

    OCp = _round_up(OC, 128)
    Kp = T_h * T_w * IC

    w = jnp.asarray(w_pt, jnp.float32)
    w_packed = jnp.zeros((sh, sw, Kp, OCp), jnp.float32)
    for py in range(sh):
        for px in range(sw):
            for a, kh in enumerate(kh_taps[py]):
                for b, kw in enumerate(kw_taps[px]):
                    r0 = (a * T_w + b) * IC
                    w_packed = w_packed.at[py, px, r0:r0 + IC, :OC].set(
                        w[:, :, kh, kw])
    w_packed = w_packed.astype(compute_dtype)

    if bias is None:
        b_packed = jnp.zeros((1, OCp), jnp.float32)
    else:
        b_packed = jnp.zeros((1, OCp), jnp.float32).at[0, :OC].set(
            jnp.asarray(bias, jnp.float32))

    # Shift per-tap offsets to be >= 0 (dummy/padded taps use offset 0, weight 0).
    all_eh = [e for es in eh for e in es] or [0]
    all_ew = [e for es in ew for e in es] or [0]
    pad_top, pad_left = max(0, -min(all_eh)), max(0, -min(all_ew))
    roff = tuple(tuple((es + [-pad_top] * T_h)[a] + pad_top for a in range(T_h))
                 for es in eh)
    coff = tuple(tuple((es + [-pad_left] * T_w)[b] + pad_left for b in range(T_w))
                 for es in ew)

    meta = dict(IC=IC, OC=OC, KH=KH, KW=KW, sh=sh, sw=sw, ph=ph, pw=pw,
                dh=dh, dw=dw, T_h=T_h, T_w=T_w, Kp=Kp, OCp=OCp,
                pad_top=pad_top, pad_left=pad_left, roff=roff, coff=coff,
                compute_dtype=compute_dtype)
    return w_packed, b_packed, meta


# --------------------------------------------------------------------------
# Forward wrapper (matches MetaConvTranspose2d.forward, output_size=None).
# --------------------------------------------------------------------------
def meta_conv_transpose2d_forward(x_nchw, w_packed, b_packed, *, meta,
                                  output_padding=0, groups=1):
    # TODO(synk): groups > 1 grouped transposed conv not implemented (module
    # default groups=1); output_size-driven output_padding must be passed in.
    assert groups == 1, "groups > 1 not supported"

    IC, OC, KH, KW = meta["IC"], meta["OC"], meta["KH"], meta["KW"]
    sh, sw, ph, pw = meta["sh"], meta["sw"], meta["ph"], meta["pw"]
    dh, dw = meta["dh"], meta["dw"]
    Kp, OCp = meta["Kp"], meta["OCp"]
    roff, coff = meta["roff"], meta["coff"]
    pad_top, pad_left = meta["pad_top"], meta["pad_left"]
    cdt = meta["compute_dtype"]

    N, C, H, W = map(int, x_nchw.shape)
    assert C == IC
    oph, opw = _pair(output_padding)

    OH = (H - 1) * sh - 2 * ph + dh * (KH - 1) + oph + 1
    OW = (W - 1) * sw - 2 * pw + dw * (KW - 1) + opw + 1

    OHs = -(-OH // sh)                       # per-phase output rows
    OWs = -(-OW // sw)                       # per-phase output cols
    OWs_pad = _round_up(OWs, 8)              # aligned reshapes / unmasked stores

    # Row tile: target MXU M = TY*OWs_pad ~ 1024, TY a multiple of 8, never 1.
    TY = max(8, (1024 // max(OWs_pad, 1)) // 8 * 8)
    TY = min(TY, _round_up(OHs, 8))
    OHs_pad = _round_up(OHs, TY)
    n_tiles = OHs_pad // TY

    max_roff = max(max(r) for r in roff)
    max_coff = max(max(c) for c in coff)
    BH = TY + max_roff                                       # band height (halo)
    Hp = max(OHs_pad + max_roff, pad_top + H)
    Wp = max(OWs_pad + max_coff, pad_left + W)

    # NCHW -> NHWC, zero-pad borders, slice into overlapping row bands so each
    # grid step only keeps a small slab in VMEM (v7x-safe).
    x = jnp.transpose(x_nchw, (0, 2, 3, 1)).astype(cdt)
    x_pad = jnp.pad(x, ((0, 0), (pad_top, Hp - pad_top - H),
                        (pad_left, Wp - pad_left - W), (0, 0)))
    x_bands = jnp.stack([x_pad[:, t * TY:t * TY + BH] for t in range(n_tiles)],
                        axis=1)                              # (N, nt, BH, Wp, IC)

    kernel = functools.partial(_phase_conv_kernel, TY=TY, OWp=OWs_pad,
                               roff=roff, coff=coff, sh=sh, sw=sw)

    itemsize = np.dtype(cdt).itemsize
    band_bytes = BH * Wp * IC * itemsize
    wgt_bytes = sh * sw * Kp * OCp * itemsize
    out_blk_bytes = TY * sh * sw * OWs_pad * OCp * 4
    patch_bytes = TY * OWs_pad * (Kp * itemsize + OCp * 4)
    vmem_limit = int(min(max(2 * (band_bytes + wgt_bytes + out_blk_bytes)
                             + 4 * patch_bytes + (8 << 20), 32 << 20), 112 << 20))

    out6 = pl.pallas_call(
        kernel,
        out_shape=jax.ShapeDtypeStruct(
            (N, OHs_pad, sh, sw, OWs_pad, OCp), jnp.float32),
        grid=(N, n_tiles),
        in_specs=[
            pl.BlockSpec((1, 1, BH, Wp, IC), lambda n, t: (n, t, 0, 0, 0)),
            # Constant block index -> weights/bias DMA'd once per call.
            pl.BlockSpec((sh, sw, Kp, OCp), lambda n, t: (0, 0, 0, 0)),
            pl.BlockSpec((1, OCp), lambda n, t: (0, 0)),
        ],
        out_specs=pl.BlockSpec((1, TY, sh, sw, OWs_pad, OCp),
                               lambda n, t: (n, t, 0, 0, 0, 0)),
        compiler_params=pltpu.CompilerParams(
            dimension_semantics=("parallel", "parallel"),
            vmem_limit_bytes=vmem_limit),
    )(x_bands, w_packed, b_packed)

    # ONE transpose pass interleaves the phases and produces NCHW; the channel /
    # spatial crop fuses into it.
    out = jnp.transpose(out6, (0, 5, 1, 2, 4, 3))       # (N, OCp, OHs, sh, OWs, sw)
    out = out.reshape(N, OCp, OHs_pad * sh, OWs_pad * sw)
    return out[:, :OC, :OH, :OW]


# --------------------------------------------------------------------------
# Deterministic init (PyTorch-style uniform)
# --------------------------------------------------------------------------
def init_params(key, in_ch, out_ch, k):
    kw_, kb_ = jax.random.split(key)
    bound = 1.0 / float(in_ch * k * k) ** 0.5
    w_pt = jax.random.uniform(kw_, (in_ch, out_ch, k, k), jnp.float32, -bound, bound)
    b = jax.random.uniform(kb_, (out_ch,), jnp.float32, -bound, bound)
    return w_pt, b


if __name__ == "__main__":
    key = jax.random.PRNGKey(0)
    k_param, k_x = jax.random.split(key)

    # Small upsampling layer: 2 x 16 x 16x16 -> 2 x 32 x 32x32
    N, IC, H, W = 2, 16, 16, 16
    OC, K = 32, 4
    stride, padding, output_padding, dilation = 2, 1, 0, 1

    w_pt, b = init_params(k_param, IC, OC, K)          # PyTorch (IC, OC, KH, KW)
    x = jax.random.normal(k_x, (N, IC, H, W), dtype=jnp.float32)

    # Pure-JAX reference: conv_transpose2d == lhs-dilated conv with the
    # flipped / channel-transposed kernel.
    w_conv = jnp.transpose(jnp.flip(w_pt, axis=(2, 3)), (1, 0, 2, 3))  # (OC,IC,KH,KW)

    def ref_fn(x_, w_conv_, b_):
        pad_lo = dilation * (K - 1) - padding
        return lax.conv_general_dilated(
            x_, w_conv_, window_strides=(1, 1),
            padding=[(pad_lo, pad_lo + output_padding)] * 2,
            lhs_dilation=(stride, stride), rhs_dilation=(dilation, dilation),
            dimension_numbers=("NCHW", "OIHW", "NCHW"),
            precision=lax.Precision.HIGHEST) + b_.reshape(1, OC, 1, 1)

    # --- exact f32 path (parity with the PyTorch module) -------------------
    w_f32, b_f32, meta_f32 = pack_conv_transpose_params(
        w_pt, b, stride=stride, padding=padding, dilation=dilation,
        compute_dtype=jnp.float32)
    fwd_f32 = jax.jit(functools.partial(
        meta_conv_transpose2d_forward, meta=meta_f32,
        output_padding=output_padding))
    y = jax.block_until_ready(fwd_f32(x, w_f32, b_f32))

    ref = ref_fn(x, w_conv, b)
    assert y.shape == (N, OC, 2 * H, 2 * W), y.shape
    assert jnp.allclose(y, ref, rtol=1e-3, atol=1e-3), \
        float(jnp.max(jnp.abs(y - ref)))

    # --- bf16-operand / f32-accumulation path (perf config, v5e/v6e/v7x) ---
    w_bf, b_bf, meta_bf = pack_conv_transpose_params(
        w_pt, b, stride=stride, padding=padding, dilation=dilation,
        compute_dtype=jnp.bfloat16)
    fwd_bf = jax.jit(functools.partial(
        meta_conv_transpose2d_forward, meta=meta_bf,
        output_padding=output_padding))
    y_bf = jax.block_until_ready(fwd_bf(x, w_bf, b_bf))

    # Fair reference: same bf16 input rounding, f32 accumulation.
    ref_bf = ref_fn(x.astype(jnp.bfloat16).astype(jnp.float32),
                    w_conv.astype(jnp.bfloat16).astype(jnp.float32), b)
    assert y_bf.shape == (N, OC, 2 * H, 2 * W), y_bf.shape
    assert jnp.allclose(y_bf, ref_bf, rtol=2e-2, atol=2e-2), \
        float(jnp.max(jnp.abs(y_bf - ref_bf)))

    print("KERNEL_OK")
</pallas_src>

<mosaic_0001>
module attributes {stable_mosaic.version = 11 : i64} {
  func.func @_phase_conv_kernel(%arg0: i32, %arg1: i32, %arg2: memref<1x1x18x18x16xf32, #tpu.memory_space<vmem>>, %arg3: memref<2x2x64x128xf32, #tpu.memory_space<vmem>>, %arg4: memref<1x128xf32, #tpu.memory_space<vmem>>, %arg5: memref<1x16x2x2x16x128xf32, #tpu.memory_space<vmem>>) attributes {dimension_semantics = [#tpu.dimension_semantics<parallel>, #tpu.dimension_semantics<parallel>], iteration_bounds = array<i64: 2, 1>, scalar_prefetch = 0 : i64, scratch_operands = 0 : i64, tpu.core_type = #tpu.core_type<tc>, window_params = [{transform_indices = @transform_0, window_bounds = array<i64: 1, 1, 18, 18, 16>}, {pipeline_mode = #tpu.pipeline_mode<synchronous>, transform_indices = @transform_1, window_bounds = array<i64: 2, 2, 64, 128>}, {pipeline_mode = #tpu.pipeline_mode<synchronous>, transform_indices = @transform_2, window_bounds = array<i64: 1, 128>}, {transform_indices = @transform_3, window_bounds = array<i64: 1, 16, 2, 2, 16, 128>}]} {
    %c0 = arith.constant 0 : index
    %c0_0 = arith.constant 0 : index
    %0 = vector.load %arg4[%c0, %c0_0] : memref<1x128xf32, #tpu.memory_space<vmem>>, vector<1x128xf32>
    %c0_1 = arith.constant 0 : index
    %c0_2 = arith.constant 0 : index
    %c1 = arith.constant 1 : index
    %c1_3 = arith.constant 1 : index
    %c0_4 = arith.constant 0 : index
    %1 = vector.load %arg2[%c0_1, %c0_2, %c1, %c1_3, %c0_4] : memref<1x1x18x18x16xf32, #tpu.memory_space<vmem>>, vector<1x1x16x16x16xf32>
    %2 = vector.shape_cast %1 : vector<1x1x16x16x16xf32> to vector<16x16x16xf32>
    %c0_5 = arith.constant 0 : index
    %c0_6 = arith.constant 0 : index
    %c1_7 = arith.constant 1 : index
    %c0_8 = arith.constant 0 : index
    %c0_9 = arith.constant 0 : index
    %3 = vector.load %arg2[%c0_5, %c0_6, %c1_7, %c0_8, %c0_9] : memref<1x1x18x18x16xf32, #tpu.memory_space<vmem>>, vector<1x1x16x16x16xf32>
    %4 = vector.shape_cast %3 : vector<1x1x16x16x16xf32> to vector<16x16x16xf32>
    %c0_10 = arith.constant 0 : index
    %c0_11 = arith.constant 0 : index
    %c0_12 = arith.constant 0 : index
    %c1_13 = arith.constant 1 : index
    %c0_14 = arith.constant 0 : index
    %5 = vector.load %arg2[%c0_10, %c0_11, %c0_12, %c1_13, %c0_14] : memref<1x1x18x18x16xf32, #tpu.memory_space<vmem>>, vector<1x1x16x16x16xf32>
    %6 = vector.shape_cast %5 : vector<1x1x16x16x16xf32> to vector<16x16x16xf32>
    %c0_15 = arith.constant 0 : index
    %c0_16 = arith.constant 0 : index
    %c0_17 = arith.constant 0 : index
    %c0_18 = arith.constant 0 : index
    %c0_19 = arith.constant 0 : index
    %7 = vector.load %arg2[%c0_15, %c0_16, %c0_17, %c0_18, %c0_19] : memref<1x1x18x18x16xf32, #tpu.memory_space<vmem>>, vector<1x1x16x16x16xf32>
    %8 = vector.shape_cast %7 : vector<1x1x16x16x16xf32> to vector<16x16x16xf32>
    %9 = tpu.concatenate %2, %4, %6, %8 in 2 : vector<16x16x16xf32>, vector<16x16x16xf32>, vector<16x16x16xf32>, vector<16x16x16xf32> -> vector<16x16x64xf32>
    %10 = vector.shape_cast %9 : vector<16x16x64xf32> to vector<256x64xf32>
    %c0_20 = arith.constant 0 : index
    %c0_21 = arith.constant 0 : index
    %c0_22 = arith.constant 0 : index
    %c0_23 = arith.constant 0 : index
    %11 = vector.load %arg3[%c0_20, %c0_21, %c0_22, %c0_23] : memref<2x2x64x128xf32, #tpu.memory_space<vmem>>, vector<1x1x64x128xf32>
    %12 = vector.shape_cast %11 : vector<1x1x64x128xf32> to vector<64x128xf32>
    %cst = arith.constant dense<0.000000e+00> : vector<256x128xf32>
    %13 = tpu.matmul %10, %12, %cst {dimension_numbers = #tpu.dot_dimension_numbers<[1], [0], [0], [1], [0, 0, 1, 1], [], []>} : vector<256x64xf32>, vector<64x128xf32>, vector<256x128xf32> -> vector<256x128xf32>
    %14 = vector.broadcast %0 : vector<1x128xf32> to vector<256x128xf32>
    %15 = arith.addf %13, %14 : vector<256x128xf32>
    %16 = vector.shape_cast %15 : vector<256x128xf32> to vector<16x16x128xf32>
    %c0_24 = arith.constant 0 : index
    %c0_25 = arith.constant 0 : index
    %c0_26 = arith.constant 0 : index
    %c0_27 = arith.constant 0 : index
    %c0_28 = arith.constant 0 : index
    %c0_29 = arith.constant 0 : index
    %17 = vector.load %arg5[%c0_24, %c0_25, %c0_26, %c0_27, %c0_28, %c0_29] : memref<1x16x2x2x16x128xf32, #tpu.memory_space<vmem>>, vector<1x16x1x1x16x128xf32>
    %18 = vector.shape_cast %17 : vector<1x16x1x1x16x128xf32> to vector<16x16x128xf32>
    %19 = vector.shape_cast %16 : vector<16x16x128xf32> to vector<1x16x1x1x16x128xf32>
    tpu.vector_store %arg5[%c0_24, %c0_25, %c0_26, %c0_27, %c0_28, %c0_29], %19 {strides = array<i32>} : memref<1x16x2x2x16x128xf32, #tpu.memory_space<vmem>>, vector<1x16x1x1x16x128xf32>,
    %c0_30 = arith.constant 0 : index
    %c0_31 = arith.constant 0 : index
    %c1_32 = arith.constant 1 : index
    %c2 = arith.constant 2 : index
    %c0_33 = arith.constant 0 : index
    %20 = vector.load %arg2[%c0_30, %c0_31, %c1_32, %c2, %c0_33] : memref<1x1x18x18x16xf32, #tpu.memory_space<vmem>>, vector<1x1x16x16x16xf32>
    %21 = vector.shape_cast %20 : vector<1x1x16x16x16xf32> to vector<16x16x16xf32>
    %c0_34 = arith.constant 0 : index
    %c0_35 = arith.constant 0 : index
    %c1_36 = arith.constant 1 : index
    %c1_37 = arith.constant 1 : index
    %c0_38 = arith.constant 0 : index
    %22 = vector.load %arg2[%c0_34, %c0_35, %c1_36, %c1_37, %c0_38] : memref<1x1x18x18x16xf32, #tpu.memory_space<vmem>>, vector<1x1x16x16x16xf32>
    %23 = vector.shape_cast %22 : vector<1x1x16x16x16xf32> to vector<16x16x16xf32>
    %c0_39 = arith.constant 0 : index
    %c0_40 = arith.constant 0 : index
    %c0_41 = arith.constant 0 : index
    %c2_42 = arith.constant 2 : index
    %c0_43 = arith.constant 0 : index
    %24 = vector.load %arg2[%c0_39, %c0_40, %c0_41, %c2_42, %c0_43] : memref<1x1x18x18x16xf32, #tpu.memory_space<vmem>>, vector<1x1x16x16x16xf32>
    %25 = vector.shape_cast %24 : vector<1x1x16x16x16xf32> to vector<16x16x16xf32>
    %c0_44 = arith.constant 0 : index
    %c0_45 = arith.constant 0 : index
    %c0_46 = arith.constant 0 : index
    %c1_47 = arith.constant 1 : index
    %c0_48 = arith.constant 0 : index
    %26 = vector.load %arg2[%c0_44, %c0_45, %c0_46, %c1_47, %c0_48] : memref<1x1x18x18x16xf32, #tpu.memory_space<vmem>>, vector<1x1x16x16x16xf32>
    %27 = vector.shape_cast %26 : vector<1x1x16x16x16xf32> to vector<16x16x16xf32>
    %28 = tpu.concatenate %21, %23, %25, %27 in 2 : vector<16x16x16xf32>, vector<16x16x16xf32>, vector<16x16x16xf32>, vector<16x16x16xf32> -> vector<16x16x64xf32>
    %29 = vector.shape_cast %28 : vector<16x16x64xf32> to vector<256x64xf32>
    %c0_49 = arith.constant 0 : index
    %c1_50 = arith.constant 1 : index
    %c0_51 = arith.constant 0 : index
    %c0_52 = arith.constant 0 : index
    %30 = vector.load %arg3[%c0_49, %c1_50, %c0_51, %c0_52] : memref<2x2x64x128xf32, #tpu.memory_space<vmem>>, vector<1x1x64x128xf32>
    %31 = vector.shape_cast %30 : vector<1x1x64x128xf32> to vector<64x128xf32>
    %cst_53 = arith.constant dense<0.000000e+00> : vector<256x128xf32>
    %32 = tpu.matmul %29, %31, %cst_53 {dimension_numbers = #tpu.dot_dimension_numbers<[1], [0], [0], [1], [0, 0, 1, 1], [], []>} : vector<256x64xf32>, vector<64x128xf32>, vector<256x128xf32> -> vector<256x128xf32>
    %33 = vector.broadcast %0 : vector<1x128xf32> to vector<256x128xf32>
    %34 = arith.addf %32, %33 : vector<256x128xf32>
    %35 = vector.shape_cast %34 : vector<256x128xf32> to vector<16x16x128xf32>
    %c0_54 = arith.constant 0 : index
    %c0_55 = arith.constant 0 : index
    %c0_56 = arith.constant 0 : index
    %c1_57 = arith.constant 1 : index
    %c0_58 = arith.constant 0 : index
    %c0_59 = arith.constant 0 : index
    %36 = vector.load %arg5[%c0_54, %c0_55, %c0_56, %c1_57, %c0_58, %c0_59] : memref<1x16x2x2x16x128xf32, #tpu.memory_space<vmem>>, vector<1x16x1x1x16x128xf32>
    %37 = vector.shape_cast %36 : vector<1x16x1x1x16x128xf32> to vector<16x16x128xf32>
    %38 = vector.shape_cast %35 : vector<16x16x128xf32> to vector<1x16x1x1x16x128xf32>
    tpu.vector_store %arg5[%c0_54, %c0_55, %c0_56, %c1_57, %c0_58, %c0_59], %38 {strides = array<i32>} : memref<1x16x2x2x16x128xf32, #tpu.memory_space<vmem>>, vector<1x16x1x1x16x128xf32>,
    %c0_60 = arith.constant 0 : index
    %c0_61 = arith.constant 0 : index
    %c2_62 = arith.constant 2 : index
    %c1_63 = arith.constant 1 : index
    %c0_64 = arith.constant 0 : index
    %39 = vector.load %arg2[%c0_60, %c0_61, %c2_62, %c1_63, %c0_64] : memref<1x1x18x18x16xf32, #tpu.memory_space<vmem>>, vector<1x1x16x16x16xf32>
    %40 = vector.shape_cast %39 : vector<1x1x16x16x16xf32> to vector<16x16x16xf32>
    %c0_65 = arith.constant 0 : index
    %c0_66 = arith.constant 0 : index
    %c2_67 = arith.constant 2 : index
    %c0_68 = arith.constant 0 : index
    %c0_69 = arith.constant 0 : index
    %41 = vector.load %arg2[%c0_65, %c0_66, %c2_67, %c0_68, %c0_69] : memref<1x1x18x18x16xf32, #tpu.memory_space<vmem>>, vector<1x1x16x16x16xf32>
    %42 = vector.shape_cast %41 : vector<1x1x16x16x16xf32> to vector<16x16x16xf32>
    %c0_70 = arith.constant 0 : index
    %c0_71 = arith.constant 0 : index
    %c1_72 = arith.constant 1 : index
    %c1_73 = arith.constant 1 : index
    %c0_74 = arith.constant 0 : index
    %43 = vector.load %arg2[%c0_70, %c0_71, %c1_72, %c1_73, %c0_74] : memref<1x1x18x18x16xf32, #tpu.memory_space<vmem>>, vector<1x1x16x16x16xf32>
    %44 = vector.shape_cast %43 : vector<1x1x16x16x16xf32> to vector<16x16x16xf32>
    %c0_75 = arith.constant 0 : index
    %c0_76 = arith.constant 0 : index
    %c1_77 = arith.constant 1 : index
    %c0_78 = arith.constant 0 : index
    %c0_79 = arith.constant 0 : index
    %45 = vector.load %arg2[%c0_75, %c0_76, %c1_77, %c0_78, %c0_79] : memref<1x1x18x18x16xf32, #tpu.memory_space<vmem>>, vector<1x1x16x16x16xf32>
    %46 = vector.shape_cast %45 : vector<1x1x16x16x16xf32> to vector<16x16x16xf32>
    %47 = tpu.concatenate %40, %42, %44, %46 in 2 : vector<16x16x16xf32>, vector<16x16x16xf32>, vector<16x16x16xf32>, vector<16x16x16xf32> -> vector<16x16x64xf32>
    %48 = vector.shape_cast %47 : vector<16x16x64xf32> to vector<256x64xf32>
    %c1_80 = arith.constant 1 : index
    %c0_81 = arith.constant 0 : index
    %c0_82 = arith.constant 0 : index
    %c0_83 = arith.constant 0 : index
    %49 = vector.load %arg3[%c1_80, %c0_81, %c0_82, %c0_83] : memref<2x2x64x128xf32, #tpu.memory_space<vmem>>, vector<1x1x64x128xf32>
    %50 = vector.shape_cast %49 : vector<1x1x64x128xf32> to vector<64x128xf32>
    %cst_84 = arith.constant dense<0.000000e+00> : vector<256x128xf32>
    %51 = tpu.matmul %48, %50, %cst_84 {dimension_numbers = #tpu.dot_dimension_numbers<[1], [0], [0], [1], [0, 0, 1, 1], [], []>} : vector<256x64xf32>, vector<64x128xf32>, vector<256x128xf32> -> vector<256x128xf32>
    %52 = vector.broadcast %0 : vector<1x128xf32> to vector<256x128xf32>
    %53 = arith.addf %51, %52 : vector<256x128xf32>
    %54 = vector.shape_cast %53 : vector<256x128xf32> to vector<16x16x128xf32>
    %c0_85 = arith.constant 0 : index
    %c0_86 = arith.constant 0 : index
    %c1_87 = arith.constant 1 : index
    %c0_88 = arith.constant 0 : index
    %c0_89 = arith.constant 0 : index
    %c0_90 = arith.constant 0 : index
    %55 = vector.load %arg5[%c0_85, %c0_86, %c1_87, %c0_88, %c0_89, %c0_90] : memref<1x16x2x2x16x128xf32, #tpu.memory_space<vmem>>, vector<1x16x1x1x16x128xf32>
    %56 = vector.shape_cast %55 : vector<1x16x1x1x16x128xf32> to vector<16x16x128xf32>
    %57 = vector.shape_cast %54 : vector<16x16x128xf32> to vector<1x16x1x1x16x128xf32>
    tpu.vector_store %arg5[%c0_85, %c0_86, %c1_87, %c0_88, %c0_89, %c0_90], %57 {strides = array<i32>} : memref<1x16x2x2x16x128xf32, #tpu.memory_space<vmem>>, vector<1x16x1x1x16x128xf32>,
    %c0_91 = arith.constant 0 : index
    %c0_92 = arith.constant 0 : index
    %c2_93 = arith.constant 2 : index
    %c2_94 = arith.constant 2 : index
    %c0_95 = arith.constant 0 : index
    %58 = vector.load %arg2[%c0_91, %c0_92, %c2_93, %c2_94, %c0_95] : memref<1x1x18x18x16xf32, #tpu.memory_space<vmem>>, vector<1x1x16x16x16xf32>
    %59 = vector.shape_cast %58 : vector<1x1x16x16x16xf32> to vector<16x16x16xf32>
    %c0_96 = arith.constant 0 : index
    %c0_97 = arith.constant 0 : index
    %c2_98 = arith.constant 2 : index
    %c1_99 = arith.constant 1 : index
    %c0_100 = arith.constant 0 : index
    %60 = vector.load %arg2[%c0_96, %c0_97, %c2_98, %c1_99, %c0_100] : memref<1x1x18x18x16xf32, #tpu.memory_space<vmem>>, vector<1x1x16x16x16xf32>
    %61 = vector.shape_cast %60 : vector<1x1x16x16x16xf32> to vector<16x16x16xf32>
    %c0_101 = arith.constant 0 : index
    %c0_102 = arith.constant 0 : index
    %c1_103 = arith.constant 1 : index
    %c2_104 = arith.constant 2 : index
    %c0_105 = arith.constant 0 : index
    %62 = vector.load %arg2[%c0_101, %c0_102, %c1_103, %c2_104, %c0_105] : memref<1x1x18x18x16xf32, #tpu.memory_space<vmem>>, vector<1x1x16x16x16xf32>
    %63 = vector.shape_cast %62 : vector<1x1x16x16x16xf32> to vector<16x16x16xf32>
    %c0_106 = arith.constant 0 : index
    %c0_107 = arith.constant 0 : index
    %c1_108 = arith.constant 1 : index
    %c1_109 = arith.constant 1 : index
    %c0_110 = arith.constant 0 : index
    %64 = vector.load %arg2[%c0_106, %c0_107, %c1_108, %c1_109, %c0_110] : memref<1x1x18x18x16xf32, #tpu.memory_space<vmem>>, vector<1x1x16x16x16xf32>
    %65 = vector.shape_cast %64 : vector<1x1x16x16x16xf32> to vector<16x16x16xf32>
    %66 = tpu.concatenate %59, %61, %63, %65 in 2 : vector<16x16x16xf32>, vector<16x16x16xf32>, vector<16x16x16xf32>, vector<16x16x16xf32> -> vector<16x16x64xf32>
    %67 = vector.shape_cast %66 : vector<16x16x64xf32> to vector<256x64xf32>
    %c1_111 = arith.constant 1 : index
    %c1_112 = arith.constant 1 : index
    %c0_113 = arith.constant 0 : index
    %c0_114 = arith.constant 0 : index
    %68 = vector.load %arg3[%c1_111, %c1_112, %c0_113, %c0_114] : memref<2x2x64x128xf32, #tpu.memory_space<vmem>>, vector<1x1x64x128xf32>
    %69 = vector.shape_cast %68 : vector<1x1x64x128xf32> to vector<64x128xf32>
    %cst_115 = arith.constant dense<0.000000e+00> : vector<256x128xf32>
    %70 = tpu.matmul %67, %69, %cst_115 {dimension_numbers = #tpu.dot_dimension_numbers<[1], [0], [0], [1], [0, 0, 1, 1], [], []>} : vector<256x64xf32>, vector<64x128xf32>, vector<256x128xf32> -> vector<256x128xf32>
    %71 = vector.broadcast %0 : vector<1x128xf32> to vector<256x128xf32>
    %72 = arith.addf %70, %71 : vector<256x128xf32>
    %73 = vector.shape_cast %72 : vector<256x128xf32> to vector<16x16x128xf32>
    %c0_116 = arith.constant 0 : index
    %c0_117 = arith.constant 0 : index
    %c1_118 = arith.constant 1 : index
    %c1_119 = arith.constant 1 : index
    %c0_120 = arith.constant 0 : index
    %c0_121 = arith.constant 0 : index
    %74 = vector.load %arg5[%c0_116, %c0_117, %c1_118, %c1_119, %c0_120, %c0_121] : memref<1x16x2x2x16x128xf32, #tpu.memory_space<vmem>>, vector<1x16x1x1x16x128xf32>
    %75 = vector.shape_cast %74 : vector<1x16x1x1x16x128xf32> to vector<16x16x128xf32>
    %76 = vector.shape_cast %73 : vector<16x16x128xf32> to vector<1x16x1x1x16x128xf32>
    tpu.vector_store %arg5[%c0_116, %c0_117, %c1_118, %c1_119, %c0_120, %c0_121], %76 {strides = array<i32>} : memref<1x16x2x2x16x128xf32, #tpu.memory_space<vmem>>, vector<1x16x1x1x16x128xf32>,
    return
  }
  func.func @transform_0(%arg0: i32, %arg1: i32) -> (i32, i32, i32, i32, i32) {
    %c0_i32 = arith.constant 0 : i32
    %c0_i32_0 = arith.constant 0 : i32
    %c0_i32_1 = arith.constant 0 : i32
    %c0_i32_2 = arith.constant 0 : i32
    return %arg0, %arg1, %c0_i32, %c0_i32_0, %c0_i32_1 : i32, i32, i32, i32, i32
  }
  func.func @transform_1(%arg0: i32, %arg1: i32) -> (i32, i32, i32, i32) {
    %c0_i32 = arith.constant 0 : i32
    %c0_i32_0 = arith.constant 0 : i32
    %c0_i32_1 = arith.constant 0 : i32
    %c0_i32_2 = arith.constant 0 : i32
    %c0_i32_3 = arith.constant 0 : i32
    return %c0_i32, %c0_i32_0, %c0_i32_1, %c0_i32_2 : i32, i32, i32, i32
  }
  func.func @transform_2(%arg0: i32, %arg1: i32) -> (i32, i32) {
    %c0_i32 = arith.constant 0 : i32
    %c0_i32_0 = arith.constant 0 : i32
    %c0_i32_1 = arith.constant 0 : i32
    return %c0_i32, %c0_i32_0 : i32, i32
  }
  func.func @transform_3(%arg0: i32, %arg1: i32) -> (i32, i32, i32, i32, i32, i32) {
    %c0_i32 = arith.constant 0 : i32
    %c0_i32_0 = arith.constant 0 : i32
    %c0_i32_1 = arith.constant 0 : i32
    %c0_i32_2 = arith.constant 0 : i32
    %c0_i32_3 = arith.constant 0 : i32
    return %arg0, %arg1, %c0_i32, %c0_i32_0, %c0_i32_1, %c0_i32_2 : i32, i32, i32, i32, i32, i32
  }
}

</mosaic_0001>

<bundles_post_ra>
// kernel: meta_conv_transpose2d_forward.1
= control target key start
LH: loop header
LB: loop body
LE: loop exit
PB: predicated region body
PF: predicated region fallthrough
CT: control target
= control target key end

     0   :  { %s5339_s12 = smov 0   ;;  %s5341_s13 = smov 0   ;;  %s8133_s0 = inlined_call_operand.vmem [shape: f32[2,1,18,18,16], index: 0, kind: input, shape index: {}]   ;;  %s8134_s1 = inlined_call_operand.vmem [shape: f32[2,2,64,128], index: 1, kind: input, shape index: {}]   ;;  %s8135_s2 = inlined_call_operand.vmem [shape: f32[1,128], index: 2, kind: input, shape index: {}]   ;;  %s8136_s3 = inlined_call_operand.vmem [shape: f32[2,16,2,2,16,128], index: 3, kind: output, shape index: {}]  }
   0x1   :  { %s5343_s14 = smov 0  }
   0x2 LB: > { %s25_s15 = sadd.s32 1, %s5310_s13  ;;  %p4205_p0 = scmp.ge.s32.totalorder %s5314_s14, 1  ;;  %s5314_s14 = sphi %s5343_s14, %s13_s14   ;;  %s5310_s13 = sphi %s5341_s13, %s8377_s13   ;;  %s5306_s12 = sphi %s5339_s12, %s8376_s12  }
   0x3   : > { %p27_p1 = scmp.ge.s32.totalorder %s25_s15, 2  ;;  %p157_p2 = scmp.lt.s32.totalorder %s5314_s14, 3 }
   0x5   : > { %s8379_s15 = smov (%p27_p1, %s25_s15), 0  ;;  %p158_p3 = pnand %p4205_p0, %p157_p2 }
   0x7   : > { %161 = sbr.rel (%p158_p3) target bundleno = 1098 (0x44a), region = 32 }
   0xc   : > { %p190_p4 = scmp.lt.s32.totalorder %s5306_s12, 1  ;;  %s5316_s20 = smov 16   ;;  %v830_v52 = vld [vmem:[%s8134_s1 + $0x38] sm:$0xff]  ;;  %v829_v55 = vld [vmem:[%s8134_s1 + $0x30] sm:$0xff]  ;;  %v828_v56 = vld [vmem:[%s8134_s1 + $0x28] sm:$0xff]  ;;  %vm724_vm0 = vcmask 130048  }
   0xd   : > { %s5317_s21 = smov 32   ;;  %5005 = vmatprep.subr.mxu0 %v830_v52  ;;  %v827_v59 = vld [vmem:[%s8134_s1 + $0x20] sm:$0xff]  ;;  %v826_v60 = vld [vmem:[%s8134_s1 + $0x18] sm:$0xff]  ;;  %v825_v63 = vld [vmem:[%s8134_s1 + $0x10] sm:$0xff]  ;;  %s5318_s11 = smov 48   ;;  %vm757_vm1 = vcmask 261120  }
   0xe   : > { %s8381_s12 = smov (!%p190_p4, %s5306_s12), 1  ;;  %5006 = vmatpush3.msra.mxu0 %v830_v52  ;;  %v824_v52 = vld [vmem:[%s8134_s1 + $0x8] sm:$0xff]  ;;  %vm790_vm2 = vcmask 392192   ;;  %vm837_vm3 = vcmask 523264  }
   0xf   : > { %s5261_s16 = smul.u32 432, %s8381_s12  ;;  %5007 = vmatprep.subr.mxu0 %v829_v55  ;;  %s4844_s8 = sshll.u32 %s8381_s12, 10 }
  0x10   : > { %5008 = vmatpush3.msra.mxu0 %v829_v55  ;;  %v823_v55 = vld [vmem:[%s8134_s1] sm:$0xff]  ;;  %s6701_s24 = scalar_lea.vmem %s8136_s3, %s4844_s8 }
  0x11   : > { %s5363_s19 = scalar_lea.vmem %s8133_s0, %s5261_s16  ;;  %5009 = vmatprep.subr.mxu0 %v828_v56 }
  0x12   : > { %v5366_v0 = vld [vmem:[%s5363_s19 + $0x30] sm:$0xff]  ;;  %v5369_v1 = vld [vmem:[%s5363_s19 + $0x18] sm:$0xff]  ;;  %v5379_v3 = vld [vmem:[%s5363_s19 + $0x20] sm:$0xff]  ;;  %5010 = vmatpush3.msra.mxu0 %v828_v56 }
  0x13   : > { %376 = vrot.lane.b32.xlu1 %v5366_v0, %s5316_s20  ;;  %372 = vrot.lane.b32.xlu0 %v5369_v1, %s5316_s20  ;;  %v5376_v2 = vld [vmem:[%s5363_s19 + $0x38] sm:$0xff]  ;;  %v5386_v4 = vld [vmem:[%s5363_s19 + $0x50] sm:$0xff] }
  0x14   : > { %v5389_v5 = vld [vmem:[%s5363_s19 + $0x48] sm:$0xff]  ;;  %v5399_v7 = vld [vmem:[%s5363_s19 + $0x60] sm:$0xff]  ;;  %v5409_v9 = vld [vmem:[%s5363_s19 + $0x78] sm:$0xff]  ;;  %5011 = vmatprep.subr.mxu0 %v827_v59 }
  0x15   : > { %v5396_v6 = vld [vmem:[%s5363_s19 + $0x68] sm:$0xff]  ;;  %v5406_v8 = vld [vmem:[%s5363_s19 + $0x80] sm:$0xff]  ;;  %v5416_v10 = vld [vmem:[%s5363_s19 + $0x98] sm:$0xff]  ;;  %5012 = vmatpush3.msra.mxu0 %v827_v59 }
  0x16   : > { %v5419_v11 = vld [vmem:[%s5363_s19 + $0x90] sm:$0xff]  ;;  %v5429_v13 = vld [vmem:[%s5363_s19 + $0xa8] sm:$0xff]  ;;  %v5439_v15 = vld [vmem:[%s5363_s19 + $0xc0] sm:$0xff]  ;;  %5013 = vmatprep.subr.mxu0 %v826_v60 }
  0x17   : > { %378 = vrot.lane.b32.xlu1 %v5376_v2, %s5316_s20  ;;  %374 = vrot.lane.b32.xlu0 %v5379_v3, %s5316_s20  ;;  %v5426_v12 = vld [vmem:[%s5363_s19 + $0xb0] sm:$0xff]  ;;  %v5436_v14 = vld [vmem:[%s5363_s19 + $0xc8] sm:$0xff] }
  0x18   : > { %v5446_v16 = vld [vmem:[%s5363_s19 + $0xe0] sm:$0xff]  ;;  %v5449_v17 = vld [vmem:[%s5363_s19 + $0xd8] sm:$0xff]  ;;  %v5459_v19 = vld [vmem:[%s5363_s19 + $0xf0] sm:$0xff]  ;;  %5014 = vmatpush3.msra.mxu0 %v826_v60 }
  0x19   : > { %v5456_v18 = vld [vmem:[%s5363_s19 + $0xf8] sm:$0xff]  ;;  %v5466_v20 = vld [vmem:[%s5363_s19 + $0x110] sm:$0xff]  ;;  %v5469_v21 = vld [vmem:[%s5363_s19 + $0x108] sm:$0xff]  ;;  %5015 = vmatprep.subr.mxu0 %v825_v63 }
  0x1a   : > { %v5476_v22 = vld [vmem:[%s5363_s19 + $0x128] sm:$0xff]  ;;  %v5479_v23 = vld [vmem:[%s5363_s19 + $0x120] sm:$0xff]  ;;  %v5489_v25 = vld [vmem:[%s5363_s19 + $0x138] sm:$0xff]  ;;  %5016 = vmatpush3.msra.mxu0 %v825_v63 }
  0x1b   : > { %382 = vrot.lane.b32.xlu1 %v5386_v4, %s5316_s20  ;;  %380 = vrot.lane.b32.xlu0 %v5389_v5, %s5316_s20  ;;  %v5486_v24 = vld [vmem:[%s5363_s19 + $0x140] sm:$0xff]  ;;  %v5496_v26 = vld [vmem:[%s5363_s19 + $0x158] sm:$0xff] }
  0x1c   : > { %v5499_v27 = vld [vmem:[%s5363_s19 + $0x150] sm:$0xff]  ;;  %v5509_v29 = vld [vmem:[%s5363_s19 + $0x168] sm:$0xff]  ;;  %v4271_v31 = vld [vmem:[%s5363_s19 + $0x180] sm:$0xff]  ;;  %5017 = vmatprep.subr.mxu0 %v824_v52 }
  0x1d   : > { %v5506_v28 = vld [vmem:[%s5363_s19 + $0x170] sm:$0xff]  ;;  %v4272_v30 = vld [vmem:[%s5363_s19 + $0x188] sm:$0xff]  ;;  %v5527_v35 = vld [vmem:[%s5363_s19 + $0x19] sm:$0xff]  ;;  %5018 = vmatpush3.msra.mxu0 %v824_v52 }
  0x1e   : > { %v277_v32 = vld [vmem:[%s5363_s19 + $0x9] sm:$0xff]  ;;  %v276_v33 = vld [vmem:[%s5363_s19 + $0x1] sm:$0xff]  ;;  %v5534_v36 = vld [vmem:[%s5363_s19 + $0x39] sm:$0xff]  ;;  %5019 = vmatprep.subr.mxu0 %v823_v55 }
  0x1f   : > { %386 = vrot.lane.b32.xlu1 %v5396_v6, %s5316_s20  ;;  %384 = vrot.lane.b32.xlu0 %v5399_v7, %s5316_s20  ;;  %v5524_v34 = vld [vmem:[%s5363_s19 + $0x21] sm:$0xff]  ;;  %v5537_v37 = vld [vmem:[%s5363_s19 + $0x31] sm:$0xff] }
  0x20   : > { %v5544_v38 = vld [vmem:[%s5363_s19 + $0x51] sm:$0xff]  ;;  %v5547_v39 = vld [vmem:[%s5363_s19 + $0x49] sm:$0xff]  ;;  %v5557_v41 = vld [vmem:[%s5363_s19 + $0x61] sm:$0xff]  ;;  %5020 = vmatpush3.msra.mxu0 %v823_v55 }
  0x21   : > { %v5554_v40 = vld [vmem:[%s5363_s19 + $0x69] sm:$0xff]  ;;  %v5564_v42 = vld [vmem:[%s5363_s19 + $0x81] sm:$0xff]  ;;  %v5567_v43 = vld [vmem:[%s5363_s19 + $0x79] sm:$0xff] }
  0x22   : > { %v5574_v44 = vld [vmem:[%s5363_s19 + $0x99] sm:$0xff]  ;;  %v5577_v45 = vld [vmem:[%s5363_s19 + $0x91] sm:$0xff]  ;;  %v5587_v47 = vld [vmem:[%s5363_s19 + $0xa9] sm:$0xff] }
  0x23   : > { %390 = vrot.lane.b32.xlu1 %v5406_v8, %s5316_s20  ;;  %388 = vrot.lane.b32.xlu0 %v5409_v9, %s5316_s20  ;;  %v5584_v46 = vld [vmem:[%s5363_s19 + $0xb1] sm:$0xff]  ;;  %v5594_v48 = vld [vmem:[%s5363_s19 + $0xc9] sm:$0xff] }
  0x24   : > { %v5597_v49 = vld [vmem:[%s5363_s19 + $0xc1] sm:$0xff]  ;;  %v5607_v51 = vld [vmem:[%s5363_s19 + $0xd9] sm:$0xff]  ;;  %v5620_v54 = vld [vmem:[%s5363_s19 + $0xf1] sm:$0xff] }
  0x25   : > { %v5604_v50 = vld [vmem:[%s5363_s19 + $0xe1] sm:$0xff]  ;;  %v5617_v53 = vld [vmem:[%s5363_s19 + $0xf9] sm:$0xff]  ;;  %v5633_v57 = vld [vmem:[%s5363_s19 + $0x111] sm:$0xff] }
  0x26   : > { %8178 = vst [vmem:[#allocation2_spill] sm:$0xff] %v5633_v57  ;;  %v5636_v58 = vld [vmem:[%s5363_s19 + $0x109] sm:$0xff]  ;;  %v5652_v62 = vld [vmem:[%s5363_s19 + $0x121] sm:$0xff]  ;;  %v5682_v56 = vld [vmem:[%s5363_s19 + $0x159] sm:$0xff] }
  0x27   : > { %394 = vrot.lane.b32.xlu1 %v5416_v10, %s5316_s20  ;;  %392 = vrot.lane.b32.xlu0 %v5419_v11, %s5316_s20  ;;  %8179 = vst [vmem:[#allocation3_spill] sm:$0xff] %v5636_v58  ;;  %v5649_v61 = vld [vmem:[%s5363_s19 + $0x129] sm:$0xff]  ;;  %8181 = vst [vmem:[#allocation5_spill] sm:$0xff] %v5652_v62  ;;  %v5685_v59 = vld [vmem:[%s5363_s19 + $0x151] sm:$0xff] }
  0x28   : > { %8180 = vst [vmem:[#allocation4_spill] sm:$0xff] %v5649_v61  ;;  %8186 = vst [vmem:[#allocation10_spill] sm:$0xff] %v5682_v56  ;;  %v309_v52 = vld [vmem:[%s5363_s19 + $0x8] sm:$0xff] }
  0x29   : > { %8187 = vst [vmem:[#allocation11_spill] sm:$0xff] %v5685_v59 }
  0x2b   : > { %398 = vrot.lane.b32.xlu1 %v5426_v12, %s5316_s20  ;;  %396 = vrot.lane.b32.xlu0 %v5429_v13, %s5316_s20 }
  0x2f   : > { %402 = vrot.lane.b32.xlu1 %v5436_v14, %s5316_s20  ;;  %400 = vrot.lane.b32.xlu0 %v5439_v15, %s5316_s20 }
  0x33   : > { %406 = vrot.lane.b32.xlu1 %v5446_v16, %s5316_s20  ;;  %404 = vrot.lane.b32.xlu0 %v5449_v17, %s5316_s20 }
  0x37   : > { %410 = vrot.lane.b32.xlu1 %v5456_v18, %s5316_s20  ;;  %408 = vrot.lane.b32.xlu0 %v5459_v19, %s5316_s20 }
  0x3b   : > { %414 = vrot.lane.b32.xlu1 %v5466_v20, %s5316_s20  ;;  %412 = vrot.lane.b32.xlu0 %v5469_v21, %s5316_s20 }
  0x3f   : > { %418 = vrot.lane.b32.xlu1 %v5476_v22, %s5316_s20  ;;  %416 = vrot.lane.b32.xlu0 %v5479_v23, %s5316_s20 }
  0x43   : > { %422 = vrot.lane.b32.xlu1 %v5486_v24, %s5316_s20  ;;  %420 = vrot.lane.b32.xlu0 %v5489_v25, %s5316_s20 }
  0x47   : > { %426 = vrot.lane.b32.xlu1 %v5496_v26, %s5316_s20  ;;  %424 = vrot.lane.b32.xlu0 %v5499_v27, %s5316_s20 }
  0x4b   : > { %430 = vrot.lane.b32.xlu1 %v5506_v28, %s5316_s20  ;;  %428 = vrot.lane.b32.xlu0 %v5509_v29, %s5316_s20 }
  0x4f   : > { %434 = vrot.lane.b32.xlu1 %v4272_v30, %s5316_s20  ;;  %432 = vrot.lane.b32.xlu0 %v4271_v31, %s5316_s20  ;;  %v5662_v30 = vld [vmem:[%s5363_s19 + $0x141] sm:$0xff]  ;;  %v5665_v31 = vld [vmem:[%s5363_s19 + $0x139] sm:$0xff] }
  0x50   : > { %8182 = vst [vmem:[#allocation6_spill] sm:$0xff] %v5662_v30  ;;  %8183 = vst [vmem:[#allocation7_spill] sm:$0xff] %v5665_v31 }
  0x53   : > { %502 = vrot.lane.b32.xlu1 %v277_v32, %s5317_s21  ;;  %500 = vrot.lane.b32.xlu0 %v276_v33, %s5317_s21 }
  0x57   : > { %506 = vrot.lane.b32.xlu1 %v5524_v34, %s5317_s21  ;;  %504 = vrot.lane.b32.xlu0 %v5527_v35, %s5317_s21 }
  0x5b   : > { %510 = vrot.lane.b32.xlu1 %v5534_v36, %s5317_s21  ;;  %508 = vrot.lane.b32.xlu0 %v5537_v37, %s5317_s21 }
  0x5f   : > { %514 = vrot.lane.b32.xlu1 %v5544_v38, %s5317_s21  ;;  %512 = vrot.lane.b32.xlu0 %v5547_v39, %s5317_s21 }
  0x63   : > { %518 = vrot.lane.b32.xlu1 %v5554_v40, %s5317_s21  ;;  %516 = vrot.lane.b32.xlu0 %v5557_v41, %s5317_s21 }
  0x67   : > { %522 = vrot.lane.b32.xlu1 %v5564_v42, %s5317_s21  ;;  %520 = vrot.lane.b32.xlu0 %v5567_v43, %s5317_s21 }
  0x6b   : > { %526 = vrot.lane.b32.xlu1 %v5574_v44, %s5317_s21  ;;  %524 = vrot.lane.b32.xlu0 %v5577_v45, %s5317_s21 }
  0x6f   : > { %530 = vrot.lane.b32.xlu1 %v5584_v46, %s5317_s21  ;;  %528 = vrot.lane.b32.xlu0 %v5587_v47, %s5317_s21 }
  0x73   : > { %534 = vrot.lane.b32.xlu1 %v5594_v48, %s5317_s21  ;;  %532 = vrot.lane.b32.xlu0 %v5597_v49, %s5317_s21 }
  0x77   : > { %538 = vrot.lane.b32.xlu1 %v5604_v50, %s5317_s21  ;;  %536 = vrot.lane.b32.xlu0 %v5607_v51, %s5317_s21 }
  0x7b   : > { %542 = vrot.lane.b32.xlu1 %v5617_v53, %s5317_s21  ;;  %540 = vrot.lane.b32.xlu0 %v5620_v54, %s5317_s21 }
  0x7f   : > { %546 = vrot.lane.b32.xlu1 %v5633_v57, %s5317_s21  ;;  %544 = vrot.lane.b32.xlu0 %v5636_v58, %s5317_s21 }
  0x83   : > { %550 = vrot.lane.b32.xlu1 %v5649_v61, %s5317_s21  ;;  %548 = vrot.lane.b32.xlu0 %v5652_v62, %s5317_s21 }
  0x85   : > { %v5667_v32 = vpop.permute.xlu1 %376  ;;  %v5669_v33 = vpop.permute.xlu0 %372 }
  0x86   : > { %8184 = vst [vmem:[#allocation8_spill] sm:$0xff] %v5667_v32  ;;  %8185 = vst [vmem:[#allocation9_spill] sm:$0xff] %v5669_v33  ;;  %v5696_v32 = vld [vmem:[%s5363_s19 + $0x171] sm:$0xff]  ;;  %v5699_v33 = vld [vmem:[%s5363_s19 + $0x169] sm:$0xff] }
  0x87   : > { %554 = vrot.lane.b32.xlu1 %v5662_v30, %s5317_s21  ;;  %552 = vrot.lane.b32.xlu0 %v5665_v31, %s5317_s21 }
  0x89   : > { %v5687_v60 = vpop.permute.xlu1 %378  ;;  %v5689_v63 = vpop.permute.xlu0 %374 }
  0x8a   : > { %8188 = vst [vmem:[#allocation12_spill] sm:$0xff] %v5687_v60  ;;  %v308_v60 = vld [vmem:[%s5363_s19] sm:$0xff] }
  0x8b   : > { %558 = vrot.lane.b32.xlu1 %v5682_v56, %s5317_s21  ;;  %556 = vrot.lane.b32.xlu0 %v5685_v59, %s5317_s21 }
  0x8d   : > { %v5701_v31 = vpop.permute.xlu1 %382  ;;  %v5703_v30 = vpop.permute.xlu0 %380 }
  0x8e   : > { %8189 = vst [vmem:[#allocation13_spill] sm:$0xff] %v5701_v31  ;;  %8190 = vst [vmem:[#allocation14_spill] sm:$0xff] %v5703_v30 }
  0x8f   : > { %562 = vrot.lane.b32.xlu1 %v5696_v32, %s5317_s21  ;;  %560 = vrot.lane.b32.xlu0 %v5699_v33, %s5317_s21 }
  0x91   : > { %v5711_v56 = vpop.permute.xlu1 %386  ;;  %v5713_v59 = vpop.permute.xlu0 %384 }
  0x92   : > { %8191 = vst [vmem:[#allocation15_spill] sm:$0xff] %v5711_v56 }
  0x93   : > { %630 = vrot.lane.b32.xlu1 %v309_v52, %s5318_s11  ;;  %628 = vrot.lane.b32.xlu0 %v308_v60, %s5318_s11 }
  0x95   : > { %v5717_v55 = vpop.permute.xlu1 %390  ;;  %v5719_v30 = vpop.permute.xlu0 %388 }
  0x97   : > { %634 = vrot.lane.b32.xlu1 %v5379_v3, %s5318_s11  ;;  %632 = vrot.lane.b32.xlu0 %v5369_v1, %s5318_s11 }
  0x99   : > { %v5725_v31 = vpop.permute.xlu1 %394  ;;  %v5727_v56 = vpop.permute.xlu0 %392 }
  0x9b   : > { %638 = vrot.lane.b32.xlu1 %v5376_v2, %s5318_s11  ;;  %636 = vrot.lane.b32.xlu0 %v5366_v0, %s5318_s11 }
  0x9d   : > { %v5733_v60 = vpop.permute.xlu1 %398  ;;  %v5735_v52 = vpop.permute.xlu0 %396 }
  0x9f   : > { %642 = vrot.lane.b32.xlu1 %v5386_v4, %s5318_s11  ;;  %640 = vrot.lane.b32.xlu0 %v5389_v5, %s5318_s11 }
  0xa1   : > { %v5741_v1 = vpop.permute.xlu1 %402  ;;  %v5743_v3 = vpop.permute.xlu0 %400 }
  0xa3   : > { %646 = vrot.lane.b32.xlu1 %v5396_v6, %s5318_s11  ;;  %644 = vrot.lane.b32.xlu0 %v5399_v7, %s5318_s11 }
  0xa5   : > { %v5749_v0 = vpop.permute.xlu1 %406  ;;  %v5751_v2 = vpop.permute.xlu0 %404 }
  0xa7   : > { %650 = vrot.lane.b32.xlu1 %v5406_v8, %s5318_s11  ;;  %648 = vrot.lane.b32.xlu0 %v5409_v9, %s5318_s11 }
  0xa9   : > { %v5757_v4 = vpop.permute.xlu1 %410  ;;  %v5759_v5 = vpop.permute.xlu0 %408 }
  0xab   : > { %654 = vrot.lane.b32.xlu1 %v5416_v10, %s5318_s11  ;;  %652 = vrot.lane.b32.xlu0 %v5419_v11, %s5318_s11 }
  0xad   : > { %v5765_v6 = vpop.permute.xlu1 %414  ;;  %v5767_v7 = vpop.permute.xlu0 %412 }
  0xae   : > { %8192 = vst [vmem:[#allocation16_spill] sm:$0xff] %v5765_v6  ;;  %8193 = vst [vmem:[#allocation17_spill] sm:$0xff] %v5767_v7 }
  0xaf   : > { %658 = vrot.lane.b32.xlu1 %v5426_v12, %s5318_s11  ;;  %656 = vrot.lane.b32.xlu0 %v5429_v13, %s5318_s11 }
  0xb1   : > { %v5773_v8 = vpop.permute.xlu1 %418  ;;  %v5775_v9 = vpop.permute.xlu0 %416 }
  0xb2   : > { %8194 = vst [vmem:[#allocation18_spill] sm:$0xff] %v5773_v8  ;;  %8195 = vst [vmem:[#allocation19_spill] sm:$0xff] %v5775_v9 }
  0xb3   : > { %662 = vrot.lane.b32.xlu1 %v5436_v14, %s5318_s11  ;;  %660 = vrot.lane.b32.xlu0 %v5439_v15, %s5318_s11 }
  0xb5   : > { %v5781_v10 = vpop.permute.xlu1 %422  ;;  %v5783_v11 = vpop.permute.xlu0 %420 }
  0xb6   : > { %8196 = vst [vmem:[#allocation20_spill] sm:$0xff] %v5781_v10  ;;  %8197 = vst [vmem:[#allocation21_spill] sm:$0xff] %v5783_v11 }
  0xb7   : > { %666 = vrot.lane.b32.xlu1 %v5446_v16, %s5318_s11  ;;  %664 = vrot.lane.b32.xlu0 %v5449_v17, %s5318_s11 }
  0xb9   : > { %v5789_v12 = vpop.permute.xlu1 %426  ;;  %v5791_v13 = vpop.permute.xlu0 %424 }
  0xba   : > { %8198 = vst [vmem:[#allocation22_spill] sm:$0xff] %v5789_v12  ;;  %8199 = vst [vmem:[#allocation23_spill] sm:$0xff] %v5791_v13 }
  0xbb   : > { %670 = vrot.lane.b32.xlu1 %v5456_v18, %s5318_s11  ;;  %668 = vrot.lane.b32.xlu0 %v5459_v19, %s5318_s11 }
  0xbd   : > { %v5797_v14 = vpop.permute.xlu1 %430  ;;  %v5799_v15 = vpop.permute.xlu0 %428 }
  0xbe   : > { %8200 = vst [vmem:[#allocation24_spill] sm:$0xff] %v5797_v14  ;;  %8201 = vst [vmem:[#allocation25_spill] sm:$0xff] %v5799_v15 }
  0xbf   : > { %674 = vrot.lane.b32.xlu1 %v5466_v20, %s5318_s11  ;;  %672 = vrot.lane.b32.xlu0 %v5469_v21, %s5318_s11 }
  0xc1   : > { %v5805_v16 = vpop.permute.xlu1 %434  ;;  %v5807_v17 = vpop.permute.xlu0 %432 }
  0xc2   : > { %8202 = vst [vmem:[#allocation26_spill] sm:$0xff] %v5805_v16  ;;  %8203 = vst [vmem:[#allocation27_spill] sm:$0xff] %v5807_v17 }
  0xc3   : > { %678 = vrot.lane.b32.xlu1 %v5476_v22, %s5318_s11  ;;  %676 = vrot.lane.b32.xlu0 %v5479_v23, %s5318_s11 }
  0xc5   : > { %v5813_v18 = vpop.permute.xlu1 %502  ;;  %v5815_v19 = vpop.permute.xlu0 %500 }
  0xc7   : > { %682 = vrot.lane.b32.xlu1 %v5486_v24, %s5318_s11  ;;  %680 = vrot.lane.b32.xlu0 %v5489_v25, %s5318_s11 }
  0xc9   : > { %v5821_v20 = vpop.permute.xlu1 %506  ;;  %v5823_v21 = vpop.permute.xlu0 %504 }
  0xcb   : > { %686 = vrot.lane.b32.xlu1 %v5496_v26, %s5318_s11  ;;  %684 = vrot.lane.b32.xlu0 %v5499_v27, %s5318_s11 }
  0xcd   : > { %v5829_v22 = vpop.permute.xlu1 %510  ;;  %v5831_v23 = vpop.permute.xlu0 %508 }
  0xcf   : > { %690 = vrot.lane.b32.xlu1 %v5506_v28, %s5318_s11  ;;  %688 = vrot.lane.b32.xlu0 %v5509_v29, %s5318_s11 }
  0xd1   : > { %v5837_v24 = vpop.permute.xlu1 %514  ;;  %v5839_v25 = vpop.permute.xlu0 %512 }
  0xd3   : > { %1353 = vrot.lane.b32.xlu1 %v5524_v34, %s5316_s20  ;;  %1351 = vrot.lane.b32.xlu0 %v5527_v35, %s5316_s20 }
  0xd5   : > { %v5845_v26 = vpop.permute.xlu1 %518  ;;  %v5847_v27 = vpop.permute.xlu0 %516 }
  0xd7   : > { %1357 = vrot.lane.b32.xlu1 %v5534_v36, %s5316_s20  ;;  %1355 = vrot.lane.b32.xlu0 %v5537_v37, %s5316_s20 }
  0xd9   : > { %v5853_v28 = vpop.permute.xlu1 %522  ;;  %v5855_v29 = vpop.permute.xlu0 %520 }
  0xdb   : > { %1361 = vrot.lane.b32.xlu1 %v5544_v38, %s5316_s20  ;;  %1359 = vrot.lane.b32.xlu0 %v5547_v39, %s5316_s20 }
  0xdd   : > { %v5861_v17 = vpop.permute.xlu1 %526  ;;  %v5863_v16 = vpop.permute.xlu0 %524 }
  0xdf   : > { %1365 = vrot.lane.b32.xlu1 %v5554_v40, %s5316_s20  ;;  %1363 = vrot.lane.b32.xlu0 %v5557_v41, %s5316_s20 }
  0xe1   : > { %v5869_v15 = vpop.permute.xlu1 %530  ;;  %v5871_v14 = vpop.permute.xlu0 %528 }
  0xe3   : > { %1369 = vrot.lane.b32.xlu1 %v5564_v42, %s5316_s20  ;;  %1367 = vrot.lane.b32.xlu0 %v5567_v43, %s5316_s20 }
  0xe5   : > { %v5877_v13 = vpop.permute.xlu1 %534  ;;  %v5879_v12 = vpop.permute.xlu0 %532 }
  0xe7   : > { %1373 = vrot.lane.b32.xlu1 %v5574_v44, %s5316_s20  ;;  %1371 = vrot.lane.b32.xlu0 %v5577_v45, %s5316_s20 }
  0xe9   : > { %v5885_v11 = vpop.permute.xlu1 %538  ;;  %v5887_v10 = vpop.permute.xlu0 %536 }
  0xea   : > { %8204 = vst [vmem:[#allocation28_spill] sm:$0xff] %v5885_v11  ;;  %8205 = vst [vmem:[#allocation29_spill] sm:$0xff] %v5887_v10  ;;  %v8221_v11 = vld [vmem:[#allocation10_spill] sm:$0xff] }
  0xeb   : > { %1377 = vrot.lane.b32.xlu1 %v5584_v46, %s5316_s20  ;;  %1375 = vrot.lane.b32.xlu0 %v5587_v47, %s5316_s20 }
  0xed   : > { %v5893_v9 = vpop.permute.xlu1 %542  ;;  %v5895_v8 = vpop.permute.xlu0 %540 }
  0xee   : > { %8206 = vst [vmem:[#allocation30_spill] sm:$0xff] %v5893_v9  ;;  %8207 = vst [vmem:[#allocation31_spill] sm:$0xff] %v5895_v8 }
  0xef   : > { %1381 = vrot.lane.b32.xlu1 %v5594_v48, %s5316_s20  ;;  %1379 = vrot.lane.b32.xlu0 %v5597_v49, %s5316_s20 }
  0xf1   : > { %v5901_v7 = vpop.permute.xlu1 %546  ;;  %v5903_v6 = vpop.permute.xlu0 %544 }
  0xf2   : > { %8208 = vst [vmem:[#allocation32_spill] sm:$0xff] %v5901_v7  ;;  %8209 = vst [vmem:[#allocation33_spill] sm:$0xff] %v5903_v6 }
  0xf3   : > { %1385 = vrot.lane.b32.xlu1 %v5604_v50, %s5316_s20  ;;  %1383 = vrot.lane.b32.xlu0 %v5607_v51, %s5316_s20 }
  0xf5   : > { %v5909_v10 = vpop.permute.xlu1 %550  ;;  %v5911_v9 = vpop.permute.xlu0 %548 }
  0xf6   : > { %8210 = vst [vmem:[#allocation34_spill] sm:$0xff] %v5909_v10  ;;  %8211 = vst [vmem:[#allocation35_spill] sm:$0xff] %v5911_v9  ;;  %v8218_v9 = vld [vmem:[#allocation6_spill] sm:$0xff] }
  0xf7   : > { %1389 = vrot.lane.b32.xlu1 %v5617_v53, %s5316_s20  ;;  %1387 = vrot.lane.b32.xlu0 %v5620_v54, %s5316_s20 }
  0xf9   : > { %v5917_v8 = vpop.permute.xlu1 %554  ;;  %v5919_v7 = vpop.permute.xlu0 %552 }
  0xfa   : > { %8212 = vst [vmem:[#allocation36_spill] sm:$0xff] %v5917_v8  ;;  %8213 = vst [vmem:[#allocation37_spill] sm:$0xff] %v5919_v7 }
  0xfb   : > { %1393 = vrot.lane.b32.xlu1 %v5633_v57, %s5316_s20  ;;  %1391 = vrot.lane.b32.xlu0 %v5636_v58, %s5316_s20  ;;  %v8219_v58 = vld [vmem:[#allocation7_spill] sm:$0xff] }
  0xfd   : > { %v5925_v6 = vpop.permute.xlu1 %558  ;;  %v5927_v10 = vpop.permute.xlu0 %556 }
  0xfe   : > { %8214 = vst [vmem:[#allocation38_spill] sm:$0xff] %v5925_v6  ;;  %8215 = vst [vmem:[#allocation39_spill] sm:$0xff] %v5927_v10  ;;  %v8220_v10 = vld [vmem:[#allocation9_spill] sm:$0xff] }
  0xff   : > { %1397 = vrot.lane.b32.xlu1 %v5649_v61, %s5316_s20  ;;  %1395 = vrot.lane.b32.xlu0 %v5652_v62, %s5316_s20  ;;  %v725_v6 = vsel %vm724_vm0, %v5527_v35, %v8220_v10  ;;  %v726_v62 = vsel %vm724_vm0, %v5524_v34, %v5689_v63  ;;  %v8222_v35 = vld [vmem:[#allocation11_spill] sm:$0xff]  ;;  %v8223_v34 = vld [vmem:[#allocation8_spill] sm:$0xff] }
 0x100   : > { %v8224_v63 = vld [vmem:[#allocation12_spill] sm:$0xff] }
 0x101   : > { %v5933_v8 = vpop.permute.xlu1 %562  ;;  %v5935_v7 = vpop.permute.xlu0 %560 }
 0x102   : > { %8216 = vst [vmem:[#allocation40_spill] sm:$0xff] %v5933_v8  ;;  %8217 = vst [vmem:[#allocation41_spill] sm:$0xff] %v5935_v7  ;;  %v759_v8 = vsel %vm757_vm1, %v726_v62, %v5813_v18  ;;  %v758_v7 = vsel %vm757_vm1, %v725_v6, %v5815_v19  ;;  %v727_v62 = vsel %vm724_vm0, %v5537_v37, %v8223_v34  ;;  %v8226_v18 = vld [vmem:[#allocation14_spill] sm:$0xff] }
 0x103   : > { %1401 = vrot.lane.b32.xlu1 %v8218_v9, %s5316_s20  ;;  %1399 = vrot.lane.b32.xlu0 %v8219_v58, %s5316_s20  ;;  %v728_v6 = vsel %vm724_vm0, %v5534_v36, %v8224_v63  ;;  %v8225_v36 = vld [vmem:[#allocation13_spill] sm:$0xff] }
 0x105   : > { %v631_v61 = vpop.permute.xlu1 %630  ;;  %v629_v9 = vpop.permute.xlu0 %628 }
 0x106   : > { %v792_v58 = vsel %vm790_vm2, %v759_v8, %v631_v61  ;;  %v791_v57 = vsel %vm790_vm2, %v758_v7, %v629_v9  ;;  %v761_v61 = vsel %vm757_vm1, %v728_v6, %v5821_v20  ;;  %v760_v7 = vsel %vm757_vm1, %v727_v62, %v5823_v21  ;;  %v5988_v62 = vld [vmem:[%s5363_s19 + $0x189] sm:$0xff] }
 0x107   : > { %1405 = vrot.lane.b32.xlu1 %v8221_v11, %s5316_s20  ;;  %1403 = vrot.lane.b32.xlu0 %v8222_v35, %s5316_s20  ;;  %v731_v6 = vsel %vm724_vm0, %v5557_v41, %v5713_v59  ;;  %v734_v59 = vsel %vm724_vm0, %v5564_v42, %v5717_v55 }
 0x108   : > { %5021 = vmatprep.mubr.msk.f32.mxu0 %vm837_vm3, %v791_v57  ;;  %v730_v57 = vsel %vm724_vm0, %v5544_v38, %v8225_v36  ;;  %v5991_v38 = vld [vmem:[%s5363_s19 + $0x181] sm:$0xff] }
 0x109   : > { %5022 = vmatmul.mubr.msk.f32.vlgmr.msra.gmra.mxu0 %vm837_vm3, %v792_v58  ;;  %v635_v8 = vpop.permute.xlu1 %634  ;;  %v633_v9 = vpop.permute.xlu0 %632  ;;  %v729_v58 = vsel %vm724_vm0, %v5547_v39, %v8226_v18  ;;  %v763_v19 = vsel %vm757_vm1, %v730_v57, %v5829_v22  ;;  %v8227_v22 = vld [vmem:[#allocation15_spill] sm:$0xff]  ;;  %v6028_v36 = vld [vmem:[%s5363_s19 + $0x1a] sm:$0xff]  ;;  %v767_v57 = vsel %vm757_vm1, %v734_v59, %v5845_v26  ;;  %v736_v26 = vsel %vm724_vm0, %v5574_v44, %v5725_v31  ;;  %v8228_v59 = vld [vmem:[#allocation28_spill] sm:$0xff] }
 0x10a   : > { %v794_v37 = vsel %vm790_vm2, %v761_v61, %v635_v8  ;;  %v793_v10 = vsel %vm790_vm2, %v760_v7, %v633_v9  ;;  %v762_v20 = vsel %vm757_vm1, %v729_v58, %v5831_v23  ;;  %v732_v23 = vsel %vm724_vm0, %v5554_v40, %v8227_v22  ;;  %v1256_v61 = vld [vmem:[%s5363_s19 + $0xa] sm:$0xff]  ;;  %v1255_v7 = vld [vmem:[%s5363_s19 + $0x2] sm:$0xff]  ;;  %v6049_v58 = vld [vmem:[%s5363_s19 + $0x3a] sm:$0xff] }
 0x10b   : > { %1409 = vrot.lane.b32.xlu1 %v5696_v32, %s5316_s20  ;;  %1407 = vrot.lane.b32.xlu0 %v5699_v33, %s5316_s20  ;;  %v765_v8 = vsel %vm757_vm1, %v732_v23, %v5837_v24  ;;  %v764_v9 = vsel %vm757_vm1, %v731_v6, %v5839_v25  ;;  %v733_v24 = vsel %vm724_vm0, %v5567_v43, %v5719_v30  ;;  %v6025_v25 = vld [vmem:[%s5363_s19 + $0x22] sm:$0xff]  ;;  %v6097_v23 = vld [vmem:[%s5363_s19 + $0x6a] sm:$0xff] }
 0x10c   : > { %5024 = vmatprep.mubr.msk.f32.mxu0 %vm837_vm3, %v793_v10  ;;  %v766_v18 = vsel %vm757_vm1, %v733_v24, %v5847_v27  ;;  %v735_v27 = vsel %vm724_vm0, %v5577_v45, %v5727_v56  ;;  %v6100_v6 = vld [vmem:[%s5363_s19 + $0x62] sm:$0xff] }
 0x10d   : > { %5025 = vmatmul.mubr.msk.f32.gmra.mxu0 %vm837_vm3, %v794_v37  ;;  %v639_v21 = vpop.permute.xlu1 %638  ;;  %v637_v34 = vpop.permute.xlu0 %636 }
 0x10e   : > { %v796_v39 = vsel %vm790_vm2, %v763_v19, %v639_v21  ;;  %v795_v63 = vsel %vm790_vm2, %v762_v20, %v637_v34  ;;  %v6052_v19 = vld [vmem:[%s5363_s19 + $0x32] sm:$0xff]  ;;  %v769_v20 = vsel %vm757_vm1, %v736_v26, %v5853_v28  ;;  %v768_v21 = vsel %vm757_vm1, %v735_v27, %v5855_v29  ;;  %v8233_v26 = vld [vmem:[#allocation3_spill] sm:$0xff] }
 0x10f   : > { %1413 = vrot.lane.b32.xlu1 %v5988_v62, %s5316_s20  ;;  %1411 = vrot.lane.b32.xlu0 %v5991_v38, %s5316_s20  ;;  %v738_v28 = vsel %vm724_vm0, %v5584_v46, %v5733_v60  ;;  %v737_v29 = vsel %vm724_vm0, %v5587_v47, %v5735_v52  ;;  %v6073_v34 = vld [vmem:[%s5363_s19 + $0x52] sm:$0xff] }
 0x110   : > { %5027 = vmatprep.mubr.msk.f32.mxu0 %vm837_vm3, %v795_v63  ;;  %v771_v63 = vsel %vm757_vm1, %v738_v28, %v5861_v17  ;;  %v770_v22 = vsel %vm757_vm1, %v737_v29, %v5863_v16  ;;  %v740_v17 = vsel %vm724_vm0, %v5594_v48, %v5741_v1  ;;  %v739_v16 = vsel %vm724_vm0, %v5597_v49, %v5743_v3 }
 0x111   : > { %5028 = vmatmul.mubr.msk.f32.gmra.mxu0 %vm837_vm3, %v796_v39  ;;  %v643_v37 = vpop.permute.xlu1 %642  ;;  %v641_v40 = vpop.permute.xlu0 %640  ;;  %v6076_v39 = vld [vmem:[%s5363_s19 + $0x4a] sm:$0xff] }
 0x112   : > { %v798_v10 = vsel %vm790_vm2, %v765_v8, %v643_v37  ;;  %v797_v41 = vsel %vm790_vm2, %v764_v9, %v641_v40  ;;  %v6121_v8 = vld [vmem:[%s5363_s19 + $0x82] sm:$0xff]  ;;  %v6124_v9 = vld [vmem:[%s5363_s19 + $0x7a] sm:$0xff] }
 0x113   : > { %1481 = vrot.lane.b32.xlu1 %v1256_v61, %s5317_s21  ;;  %1479 = vrot.lane.b32.xlu0 %v1255_v7, %s5317_s21  ;;  %v773_v61 = vsel %vm757_vm1, %v740_v17, %v5869_v15  ;;  %v772_v7 = vsel %vm757_vm1, %v739_v16, %v5871_v14  ;;  %v742_v15 = vsel %vm724_vm0, %v5604_v50, %v5749_v0  ;;  %v8239_v17 = vld [vmem:[#allocation5_spill] sm:$0xff] }
 0x114   : > { %5030 = vmatprep.mubr.msk.f32.mxu0 %vm837_vm3, %v797_v41  ;;  %v741_v14 = vsel %vm724_vm0, %v5607_v51, %v5751_v2  ;;  %v775_v37 = vsel %vm757_vm1, %v742_v15, %v5877_v13  ;;  %v744_v13 = vsel %vm724_vm0, %v5617_v53, %v5757_v4  ;;  %v6148_v41 = vld [vmem:[%s5363_s19 + $0x92] sm:$0xff] }
 0x115   : > { %5031 = vmatmul.mubr.msk.f32.gmra.mxu0 %vm837_vm3, %v798_v10  ;;  %v647_v42 = vpop.permute.xlu1 %646  ;;  %v645_v55 = vpop.permute.xlu0 %644  ;;  %v774_v40 = vsel %vm757_vm1, %v741_v14, %v5879_v12  ;;  %v743_v12 = vsel %vm724_vm0, %v5620_v54, %v5759_v5  ;;  %v6145_v10 = vld [vmem:[%s5363_s19 + $0x9a] sm:$0xff]  ;;  %v777_v24 = vsel %vm757_vm1, %v744_v13, %v8228_v59  ;;  %v8245_v13 = vld [vmem:[#allocation7_spill] sm:$0xff] }
 0x116   : > { %v800_v43 = vsel %vm790_vm2, %v767_v57, %v647_v42  ;;  %v799_v30 = vsel %vm790_vm2, %v766_v18, %v645_v55  ;;  %v8229_v57 = vld [vmem:[#allocation29_spill] sm:$0xff]  ;;  %v8230_v42 = vld [vmem:[#allocation16_spill] sm:$0xff]  ;;  %v8231_v55 = vld [vmem:[#allocation2_spill] sm:$0xff] }
 0x117   : > { %1485 = vrot.lane.b32.xlu1 %v6025_v25, %s5317_s21  ;;  %1483 = vrot.lane.b32.xlu0 %v6028_v36, %s5317_s21  ;;  %v776_v18 = vsel %vm757_vm1, %v743_v12, %v8229_v57  ;;  %v6217_v59 = vld [vmem:[%s5363_s19 + $0xe2] sm:$0xff] }
 0x118   : > { %5033 = vmatprep.mubr.msk.f32.mxu0 %vm837_vm3, %v799_v30  ;;  %v8232_v30 = vld [vmem:[#allocation17_spill] sm:$0xff]  ;;  %v8247_v57 = vld [vmem:[#allocation34_spill] sm:$0xff] }
 0x119   : > { %5034 = vmatmul.mubr.msk.f32.gmra.mxu0 %vm837_vm3, %v800_v43  ;;  %v651_v44 = vpop.permute.xlu1 %650  ;;  %v649_v31 = vpop.permute.xlu0 %648  ;;  %v746_v43 = vsel %vm724_vm0, %v8231_v55, %v8230_v42  ;;  %v745_v27 = vsel %vm724_vm0, %v8233_v26, %v8232_v30  ;;  %v8249_v30 = vld [vmem:[#allocation22_spill] sm:$0xff] }
 0x11a   : > { %v802_v45 = vsel %vm790_vm2, %v769_v20, %v651_v44  ;;  %v801_v56 = vsel %vm790_vm2, %v768_v21, %v649_v31  ;;  %v6169_v20 = vld [vmem:[%s5363_s19 + $0xb2] sm:$0xff]  ;;  %v6172_v21 = vld [vmem:[%s5363_s19 + $0xaa] sm:$0xff]  ;;  %v8234_v44 = vld [vmem:[#allocation30_spill] sm:$0xff]  ;;  %v752_v26 = vsel %vm724_vm0, %v8221_v11, %v8249_v30 }
 0x11b   : > { %1489 = vrot.lane.b32.xlu1 %v6049_v58, %s5317_s21  ;;  %1487 = vrot.lane.b32.xlu0 %v6052_v19, %s5317_s21  ;;  %v779_v31 = vsel %vm757_vm1, %v746_v43, %v8234_v44  ;;  %v4377_v43 = vld [vmem:[%s8134_s1 + $0x78] sm:$0xff]  ;;  %v4372_v30 = vld [vmem:[%s8134_s1 + $0x50] sm:$0xff] }
 0x11c   : > { %5036 = vmatprep.mubr.msk.f32.mxu0 %vm837_vm3, %v801_v56  ;;  %5069 = vmatprep.subr.mxu1 %v4377_v43 }
 0x11d   : > { %5037 = vmatmul.mubr.msk.f32.gmra.mxu0 %vm837_vm3, %v802_v45  ;;  %v655_v46 = vpop.permute.xlu1 %654  ;;  %v653_v60 = vpop.permute.xlu0 %652  ;;  %v8235_v45 = vld [vmem:[#allocation31_spill] sm:$0xff]  ;;  %5070 = vmatpush3.msra.mxu1 %v4377_v43 }
 0x11e   : > { %v804_v47 = vsel %vm790_vm2, %v771_v63, %v655_v46  ;;  %v803_v52 = vsel %vm790_vm2, %v770_v22, %v653_v60  ;;  %v778_v56 = vsel %vm757_vm1, %v745_v27, %v8235_v45  ;;  %v8236_v46 = vld [vmem:[#allocation18_spill] sm:$0xff]  ;;  %v8237_v60 = vld [vmem:[#allocation4_spill] sm:$0xff]  ;;  %v8250_v27 = vld [vmem:[#allocation23_spill] sm:$0xff] }
 0x11f   : > { %1493 = vrot.lane.b32.xlu1 %v6073_v34, %s5317_s21  ;;  %1491 = vrot.lane.b32.xlu0 %v6076_v39, %s5317_s21  ;;  %v751_v44 = vsel %vm724_vm0, %v8222_v35, %v8250_v27  ;;  %v6247_v45 = vld [vmem:[%s5363_s19 + $0xf2] sm:$0xff]  ;;  %v6328_v27 = vld [vmem:[%s5363_s19 + $0x13a] sm:$0xff] }
 0x120   : > { %5039 = vmatprep.mubr.msk.f32.mxu0 %vm837_vm3, %v803_v52  ;;  %v8238_v52 = vld [vmem:[#allocation19_spill] sm:$0xff]  ;;  %8252 = vst [vmem:[#allocation11_spill] sm:$0xff] %v6247_v45  ;;  %8268 = vst [vmem:[#allocation28_spill] sm:$0xff] %v6328_v27 }
 0x121   : > { %5040 = vmatmul.mubr.msk.f32.gmra.mxu0 %vm837_vm3, %v804_v47  ;;  %v659_v48 = vpop.permute.xlu1 %658  ;;  %v657_v1 = vpop.permute.xlu0 %656  ;;  %v748_v47 = vsel %vm724_vm0, %v8237_v60, %v8236_v46  ;;  %v747_v16 = vsel %vm724_vm0, %v8239_v17, %v8238_v52  ;;  %v4376_v60 = vld [vmem:[%s8134_s1 + $0x70] sm:$0xff] }
 0x122   : > { %v806_v49 = vsel %vm790_vm2, %v773_v61, %v659_v48  ;;  %v805_v3 = vsel %vm790_vm2, %v772_v7, %v657_v1  ;;  %v6193_v61 = vld [vmem:[%s5363_s19 + $0xca] sm:$0xff]  ;;  %v6196_v7 = vld [vmem:[%s5363_s19 + $0xc2] sm:$0xff]  ;;  %5071 = vmatprep.subr.mxu1 %v4376_v60 }
 0x123   : > { %1497 = vrot.lane.b32.xlu1 %v6097_v23, %s5317_s21  ;;  %1495 = vrot.lane.b32.xlu0 %v6100_v6, %s5317_s21  ;;  %v8240_v48 = vld [vmem:[#allocation32_spill] sm:$0xff] }
 0x124   : > { %5042 = vmatprep.mubr.msk.f32.mxu0 %vm837_vm3, %v805_v3  ;;  %v781_v1 = vsel %vm757_vm1, %v748_v47, %v8240_v48  ;;  %v4375_v47 = vld [vmem:[%s8134_s1 + $0x68] sm:$0xff]  ;;  %v8255_v52 = vld [vmem:[#allocation24_spill] sm:$0xff]  ;;  %5072 = vmatpush3.msra.mxu1 %v4376_v60 }
 0x125   : > { %5043 = vmatmul.mubr.msk.f32.gmra.mxu0 %vm837_vm3, %v806_v49  ;;  %v663_v50 = vpop.permute.xlu1 %662  ;;  %v661_v0 = vpop.permute.xlu0 %660  ;;  %v8241_v49 = vld [vmem:[#allocation33_spill] sm:$0xff]  ;;  %v754_v17 = vsel %vm724_vm0, %v5696_v32, %v8255_v52  ;;  %5073 = vmatprep.subr.mxu1 %v4375_v47  ;;  %v6363_v60 = vld [vmem:[%s5363_s19 + $0x16a] sm:$0xff] }
 0x126   : > { %v808_v51 = vsel %vm790_vm2, %v775_v37, %v663_v50  ;;  %v807_v2 = vsel %vm790_vm2, %v774_v40, %v661_v0  ;;  %v780_v3 = vsel %vm757_vm1, %v747_v16, %v8241_v49  ;;  %v8242_v50 = vld [vmem:[#allocation20_spill] sm:$0xff]  ;;  %v8243_v0 = vld [vmem:[#allocation6_spill] sm:$0xff]  ;;  %v8256_v16 = vld [vmem:[#allocation25_spill] sm:$0xff]  ;;  %5074 = vmatpush3.msra.mxu1 %v4375_v47  ;;  %8272 = vst [vmem:[#allocation17_spill] sm:$0xff] %v6363_v60 }
 0x127   : > { %1501 = vrot.lane.b32.xlu1 %v6121_v8, %s5317_s21  ;;  %1499 = vrot.lane.b32.xlu0 %v6124_v9, %s5317_s21  ;;  %v753_v48 = vsel %vm724_vm0, %v5699_v33, %v8256_v16  ;;  %v6277_v49 = vld [vmem:[%s5363_s19 + $0x10a] sm:$0xff]  ;;  %v1287_v16 = vld [vmem:[%s5363_s19 + $0x1] sm:$0xff] }
 0x128   : > { %5045 = vmatprep.mubr.msk.f32.mxu0 %vm837_vm3, %v807_v2  ;;  %v8244_v2 = vld [vmem:[#allocation21_spill] sm:$0xff]  ;;  %8258 = vst [vmem:[#allocation12_spill] sm:$0xff] %v6277_v49 }
 0x129   : > { %5046 = vmatmul.mubr.msk.f32.gmra.mxu0 %vm837_vm3, %v808_v51  ;;  %v667_v53 = vpop.permute.xlu1 %666  ;;  %v665_v4 = vpop.permute.xlu0 %664  ;;  %v750_v51 = vsel %vm724_vm0, %v8243_v0, %v8242_v50  ;;  %v749_v12 = vsel %vm724_vm0, %v8245_v13, %v8244_v2  ;;  %v4374_v0 = vld [vmem:[%s8134_s1 + $0x60] sm:$0xff]  ;;  %v8262_v13 = vld [vmem:[#allocation27_spill] sm:$0xff] }
 0x12a   : > { %v810_v54 = vsel %vm790_vm2, %v777_v24, %v667_v53  ;;  %v809_v5 = vsel %vm790_vm2, %v776_v18, %v665_v4  ;;  %v6220_v24 = vld [vmem:[%s5363_s19 + $0xda] sm:$0xff]  ;;  %v783_v18 = vsel %vm757_vm1, %v750_v51, %v8247_v57  ;;  %v8248_v53 = vld [vmem:[#allocation35_spill] sm:$0xff]  ;;  %5075 = vmatprep.subr.mxu1 %v4374_v0 }
 0x12b   : > { %1505 = vrot.lane.b32.xlu1 %v6145_v10, %s5317_s21  ;;  %1503 = vrot.lane.b32.xlu0 %v6148_v41, %s5317_s21  ;;  %8246 = vst [vmem:[#allocation9_spill] sm:$0xff] %v6220_v24  ;;  %v782_v4 = vsel %vm757_vm1, %v749_v12, %v8248_v53  ;;  %v8261_v51 = vld [vmem:[#allocation26_spill] sm:$0xff]  ;;  %v755_v12 = vsel %vm724_vm0, %v5991_v38, %v8262_v13  ;;  %v6301_v57 = vld [vmem:[%s5363_s19 + $0x12a] sm:$0xff]  ;;  %v4373_v38 = vld [vmem:[%s8134_s1 + $0x58] sm:$0xff] }
 0x12c   : > { %5048 = vmatprep.mubr.msk.f32.mxu0 %vm837_vm3, %v809_v5  ;;  %v756_v2 = vsel %vm724_vm0, %v5988_v62, %v8261_v51  ;;  %8263 = vst [vmem:[#allocation13_spill] sm:$0xff] %v6301_v57  ;;  %v8265_v53 = vld [vmem:[#allocation40_spill] sm:$0xff]  ;;  %5076 = vmatpush3.msra.mxu1 %v4374_v0 }
 0x12d   : > { %5049 = vmatmul.mubr.msk.f32.gmra.mxu0 %vm837_vm3, %v810_v54  ;;  %v671_v28 = vpop.permute.xlu1 %670  ;;  %v669_v29 = vpop.permute.xlu0 %668  ;;  %5077 = vmatprep.subr.mxu1 %v4373_v38  ;;  %v6410_v51 = vld [vmem:[%s5363_s19 + $0x51] sm:$0xff] }
 0x12e   : > { %v812_v63 = vsel %vm790_vm2, %v779_v31, %v671_v28  ;;  %v811_v22 = vsel %vm790_vm2, %v778_v56, %v669_v29  ;;  %v6244_v31 = vld [vmem:[%s5363_s19 + $0xfa] sm:$0xff]  ;;  %v8253_v56 = vld [vmem:[#allocation36_spill] sm:$0xff]  ;;  %5078 = vmatpush3.msra.mxu1 %v4373_v38  ;;  %8273 = vst [vmem:[#allocation3_spill] sm:$0xff] %v6410_v51 }
 0x12f   : > { %1509 = vrot.lane.b32.xlu1 %v6169_v20, %s5317_s21  ;;  %1507 = vrot.lane.b32.xlu0 %v6172_v21, %s5317_s21  ;;  %8251 = vst [vmem:[#allocation10_spill] sm:$0xff] %v6244_v31  ;;  %v785_v28 = vsel %vm757_vm1, %v752_v26, %v8253_v56  ;;  %v8254_v29 = vld [vmem:[#allocation37_spill] sm:$0xff]  ;;  %v6325_v26 = vld [vmem:[%s5363_s19 + $0x142] sm:$0xff] }
 0x130   : > { %5051 = vmatprep.mubr.msk.f32.mxu0 %vm837_vm3, %v811_v22  ;;  %8267 = vst [vmem:[#allocation15_spill] sm:$0xff] %v6325_v26  ;;  %5079 = vmatprep.subr.mxu1 %v4372_v30 }
 0x131   : > { %5052 = vmatmul.mubr.msk.f32.gmra.mxu0 %vm837_vm3, %v812_v63  ;;  %v675_v15 = vpop.permute.xlu1 %674  ;;  %v673_v14 = vpop.permute.xlu0 %672  ;;  %v784_v63 = vsel %vm757_vm1, %v751_v44, %v8254_v29  ;;  %v6343_v29 = vld [vmem:[%s5363_s19 + $0x15a] sm:$0xff]  ;;  %5080 = vmatpush3.msra.mxu1 %v4372_v30  ;;  %v1299_v30 = vld [vmem:[%s5363_s19 + $0x91] sm:$0xff] }
 0x132   : > { %v814_v37 = vsel %vm790_vm2, %v781_v1, %v675_v15  ;;  %v813_v40 = vsel %vm790_vm2, %v780_v3, %v673_v14  ;;  %v6274_v1 = vld [vmem:[%s5363_s19 + $0x112] sm:$0xff]  ;;  %v8259_v3 = vld [vmem:[#allocation38_spill] sm:$0xff]  ;;  %v8260_v14 = vld [vmem:[#allocation39_spill] sm:$0xff]  ;;  %8269 = vst [vmem:[#allocation29_spill] sm:$0xff] %v6343_v29 }
 0x133   : > { %1513 = vrot.lane.b32.xlu1 %v6193_v61, %s5317_s21  ;;  %1511 = vrot.lane.b32.xlu0 %v6196_v7, %s5317_s21  ;;  %8257 = vst [vmem:[#allocation8_spill] sm:$0xff] %v6274_v1  ;;  %v787_v15 = vsel %vm757_vm1, %v754_v17, %v8259_v3  ;;  %v1288_v17 = vld [vmem:[%s5363_s19 + $0x9] sm:$0xff] }
 0x134   : > { %5054 = vmatprep.mubr.msk.f32.mxu0 %vm837_vm3, %v813_v40 }
 0x135   : > { %5055 = vmatmul.mubr.msk.f32.gmra.mxu0 %vm837_vm3, %v814_v37  ;;  %v679_v54 = vpop.permute.xlu1 %678  ;;  %v677_v5 = vpop.permute.xlu0 %676  ;;  %v786_v37 = vsel %vm757_vm1, %v753_v48, %v8260_v14  ;;  %v6385_v14 = vld [vmem:[%s5363_s19 + $0x19] sm:$0xff] }
 0x136   : > { %v816_v42 = vsel %vm790_vm2, %v783_v18, %v679_v54  ;;  %v815_v55 = vsel %vm790_vm2, %v782_v4, %v677_v5  ;;  %v6304_v18 = vld [vmem:[%s5363_s19 + $0x122] sm:$0xff]  ;;  %v789_v4 = vsel %vm757_vm1, %v756_v2, %v8265_v53  ;;  %v8266_v54 = vld [vmem:[#allocation41_spill] sm:$0xff] }
 0x137   : > { %1517 = vrot.lane.b32.xlu1 %v6217_v59, %s5317_s21  ;;  %1515 = vrot.lane.b32.xlu0 %v6220_v24, %s5317_s21  ;;  %8264 = vst [vmem:[#allocation14_spill] sm:$0xff] %v6304_v18  ;;  %v788_v5 = vsel %vm757_vm1, %v755_v12, %v8266_v54  ;;  %v6413_v2 = vld [vmem:[%s5363_s19 + $0x49] sm:$0xff] }
 0x138   : > { %5057 = vmatprep.mubr.msk.f32.mxu0 %vm837_vm3, %v815_v55  ;;  %8274 = vst [vmem:[#allocation30_spill] sm:$0xff] %v6413_v2  ;;  %v6424_v53 = vld [vmem:[%s5363_s19 + $0x69] sm:$0xff] }
 0x139   : > { %5058 = vmatmul.mubr.msk.f32.gmra.mxu0 %vm837_vm3, %v816_v42  ;;  %v683_v11 = vpop.permute.xlu1 %682  ;;  %v681_v22 = vpop.permute.xlu0 %680  ;;  %8275 = vst [vmem:[#allocation31_spill] sm:$0xff] %v6424_v53 }
 0x13a   : > { %v818_v35 = vsel %vm790_vm2, %v785_v28, %v683_v11  ;;  %v817_v46 = vsel %vm790_vm2, %v784_v63, %v681_v22  ;;  %v4371_v28 = vld [vmem:[%s8134_s1 + $0x48] sm:$0xff]  ;;  %v6346_v63 = vld [vmem:[%s5363_s19 + $0x152] sm:$0xff] }
 0x13b   : > { %1521 = vrot.lane.b32.xlu1 %v6244_v31, %s5317_s21  ;;  %1519 = vrot.lane.b32.xlu0 %v6247_v45, %s5317_s21  ;;  %8270 = vst [vmem:[#allocation16_spill] sm:$0xff] %v6346_v63  ;;  %v4484_v31 = vld [vmem:[%s5363_s19 + $0xa8] sm:$0xff] }
 0x13c   : > { %5060 = vmatprep.mubr.msk.f32.mxu0 %vm837_vm3, %v817_v46  ;;  %5081 = vmatprep.subr.mxu1 %v4371_v28  ;;  %v6360_v46 = vld [vmem:[%s5363_s19 + $0x172] sm:$0xff] }
 0x13d   : > { %5061 = vmatmul.mubr.msk.f32.gmra.mxu0 %vm837_vm3, %v818_v35  ;;  %v687_v32 = vpop.permute.xlu1 %686  ;;  %v685_v40 = vpop.permute.xlu0 %684  ;;  %v4370_v35 = vld [vmem:[%s8134_s1 + $0x40] sm:$0xff]  ;;  %5082 = vmatpush3.msra.mxu1 %v4371_v28  ;;  %8271 = vst [vmem:[#allocation2_spill] sm:$0xff] %v6360_v46 }
 0x13e   : > { %v820_v33 = vsel %vm790_vm2, %v787_v15, %v687_v32  ;;  %v819_v50 = vsel %vm790_vm2, %v786_v37, %v685_v40  ;;  %5083 = vmatprep.subr.mxu1 %v4370_v35  ;;  %v6382_v15 = vld [vmem:[%s5363_s19 + $0x21] sm:$0xff]  ;;  %v6396_v40 = vld [vmem:[%s5363_s19 + $0x39] sm:$0xff] }
 0x13f   : > { %1525 = vrot.lane.b32.xlu1 %v6274_v1, %s5317_s21  ;;  %1523 = vrot.lane.b32.xlu0 %v6277_v49, %s5317_s21  ;;  %v6560_v49 = vld [vmem:[%s5363_s19 + $0x60] sm:$0xff]  ;;  %v6574_v1 = vld [vmem:[%s5363_s19 + $0x78] sm:$0xff] }
 0x140   : > { %5063 = vmatprep.mubr.msk.f32.mxu0 %vm837_vm3, %v819_v50  ;;  %5084 = vmatpush3.msra.mxu1 %v4370_v35  ;;  %8298 = vst [vmem:[#allocation40_spill] sm:$0xff] %v6560_v49  ;;  %8300 = vst [vmem:[#allocation42_spill] sm:$0xff] %v6574_v1 }
 0x141   : > { %5064 = vmatmul.mubr.msk.f32.gmra.mxu0 %vm837_vm3, %v820_v33  ;;  %v691_v62 = vpop.permute.xlu1 %690  ;;  %v689_v42 = vpop.permute.xlu0 %688  ;;  %v6399_v33 = vld [vmem:[%s5363_s19 + $0x31] sm:$0xff] }
 0x142   : > { %v822_v55 = vsel %vm790_vm2, %v789_v4, %v691_v62  ;;  %v821_v43 = vsel %vm790_vm2, %v788_v5, %v689_v42  ;;  %v6427_v4 = vld [vmem:[%s5363_s19 + $0x61] sm:$0xff]  ;;  %v6439_v42 = vld [vmem:[%s5363_s19 + $0x79] sm:$0xff] }
 0x143   : > { %1529 = vrot.lane.b32.xlu1 %v6301_v57, %s5317_s21  ;;  %1527 = vrot.lane.b32.xlu0 %v6304_v18, %s5317_s21  ;;  %8276 = vst [vmem:[#allocation18_spill] sm:$0xff] %v6427_v4  ;;  %v1298_v62 = vld [vmem:[%s5363_s19 + $0x81] sm:$0xff]  ;;  %8277 = vst [vmem:[#allocation4_spill] sm:$0xff] %v6439_v42 }
 0x144   : > { %5066 = vmatprep.mubr.msk.f32.mxu0 %vm837_vm3, %v821_v43  ;;  %v1300_v43 = vld [vmem:[%s5363_s19 + $0x99] sm:$0xff] }
 0x145   : > { %5067 = vmatmul.mubr.msk.f32.gmra.mxu0 %vm837_vm3, %v822_v55  ;;  %v6331_v44 = vpop.permute.xlu1 %1353  ;;  %v6333_v56 = vpop.permute.xlu0 %1351 }
 0x147   : > { %1533 = vrot.lane.b32.xlu1 %v6325_v26, %s5317_s21  ;;  %1531 = vrot.lane.b32.xlu0 %v6328_v27, %s5317_s21  ;;  %v1309_v26 = vld [vmem:[%s5363_s19 + $0x109] sm:$0xff] }
 0x149   : > { %v6348_v11 = vpop.permute.xlu1 %1357  ;;  %v6350_v22 = vpop.permute.xlu0 %1355 }
 0x14b   : > { %1537 = vrot.lane.b32.xlu1 %v6343_v29, %s5317_s21  ;;  %1535 = vrot.lane.b32.xlu0 %v6346_v63, %s5317_s21  ;;  %v1307_v29 = vld [vmem:[%s5363_s19 + $0xf1] sm:$0xff] }
 0x14d   : > { %v6365_v47 = vpop.permute.xlu1 %1361  ;;  %v6367_v52 = vpop.permute.xlu0 %1359 }
 0x14f   : > { %1541 = vrot.lane.b32.xlu1 %v6360_v46, %s5317_s21  ;;  %1539 = vrot.lane.b32.xlu0 %v6363_v60, %s5317_s21  ;;  %v1303_v60 = vld [vmem:[%s5363_s19 + $0xc1] sm:$0xff] }
 0x151   : > { %v6375_v48 = vpop.permute.xlu1 %1365  ;;  %v6377_v3 = vpop.permute.xlu0 %1363 }
 0x153   : > { %1609 = vrot.lane.b32.xlu1 %v1288_v17, %s5318_s11  ;;  %1607 = vrot.lane.b32.xlu0 %v1287_v16, %s5318_s11  ;;  %v1302_v17 = vld [vmem:[%s5363_s19 + $0xb1] sm:$0xff]  ;;  %v1301_v16 = vld [vmem:[%s5363_s19 + $0xa9] sm:$0xff] }
 0x155   : > { %v6387_v37 = vpop.permute.xlu1 %1369  ;;  %v6389_v32 = vpop.permute.xlu0 %1367 }
 0x157   : > { %1613 = vrot.lane.b32.xlu1 %v6382_v15, %s5318_s11  ;;  %1611 = vrot.lane.b32.xlu0 %v6385_v14, %s5318_s11 }
 0x159   : > { %v6401_v50 = vpop.permute.xlu1 %1373  ;;  %v6403_v0 = vpop.permute.xlu0 %1371 }
 0x15b   : > { %1617 = vrot.lane.b32.xlu1 %v6396_v40, %s5318_s11  ;;  %1615 = vrot.lane.b32.xlu0 %v6399_v33, %s5318_s11 }
 0x15d   : > { %v6415_v13 = vpop.permute.xlu1 %1377  ;;  %v6417_v12 = vpop.permute.xlu0 %1375 }
 0x15f   : > { %1621 = vrot.lane.b32.xlu1 %v6410_v51, %s5318_s11  ;;  %1619 = vrot.lane.b32.xlu0 %v6413_v2, %s5318_s11  ;;  %v6586_v51 = vld [vmem:[%s5363_s19 + $0x90] sm:$0xff]  ;;  %v4486_v2 = vld [vmem:[%s5363_s19 + $0xc0] sm:$0xff] }
 0x160   : > { %8301 = vst [vmem:[#allocation43_spill] sm:$0xff] %v6586_v51 }
 0x161   : > { %v6429_v54 = vpop.permute.xlu1 %1381  ;;  %v6431_v5 = vpop.permute.xlu0 %1379 }
 0x163   : > { %1625 = vrot.lane.b32.xlu1 %v6424_v53, %s5318_s11  ;;  %1623 = vrot.lane.b32.xlu0 %v6427_v4, %s5318_s11  ;;  %v1305_v4 = vld [vmem:[%s5363_s19 + $0xd9] sm:$0xff] }
 0x165   : > { %v6441_v38 = vpop.permute.xlu1 %1385  ;;  %v6443_v55 = vpop.permute.xlu0 %1383 }
 0x166   : > { %8278 = vst [vmem:[#allocation19_spill] sm:$0xff] %v6443_v55 }
 0x167   : > { %1629 = vrot.lane.b32.xlu1 %v1298_v62, %s5318_s11  ;;  %1627 = vrot.lane.b32.xlu0 %v6439_v42, %s5318_s11  ;;  %v1304_v42 = vld [vmem:[%s5363_s19 + $0xc9] sm:$0xff] }
 0x169   : > { %v6450_v28 = vpop.permute.xlu1 %1389  ;;  %v6452_v35 = vpop.permute.xlu0 %1387 }
 0x16a   : > { %8279 = vst [vmem:[#allocation5_spill] sm:$0xff] %v6450_v28  ;;  %8280 = vst [vmem:[#allocation32_spill] sm:$0xff] %v6452_v35  ;;  %v4485_v35 = vld [vmem:[%s5363_s19 + $0xb0] sm:$0xff]  ;;  %v4487_v28 = vld [vmem:[%s5363_s19 + $0xc8] sm:$0xff] }
 0x16b   : > { %1633 = vrot.lane.b32.xlu1 %v1300_v43, %s5318_s11  ;;  %1631 = vrot.lane.b32.xlu0 %v1299_v30, %s5318_s11  ;;  %v1306_v30 = vld [vmem:[%s5363_s19 + $0xe1] sm:$0xff] }
 0x16d   : > { %v6458_v53 = vpop.permute.xlu1 %1393  ;;  %v6460_v62 = vpop.permute.xlu0 %1391 }
 0x16e   : > { %8281 = vst [vmem:[#allocation33_spill] sm:$0xff] %v6458_v53  ;;  %8282 = vst [vmem:[#allocation20_spill] sm:$0xff] %v6460_v62 }
 0x16f   : > { %1637 = vrot.lane.b32.xlu1 %v1302_v17, %s5318_s11  ;;  %1635 = vrot.lane.b32.xlu0 %v1301_v16, %s5318_s11  ;;  %v1308_v16 = vld [vmem:[%s5363_s19 + $0xf9] sm:$0xff] }
 0x171   : > { %v6466_v46 = vpop.permute.xlu1 %1397  ;;  %v6468_v43 = vpop.permute.xlu0 %1395 }
 0x172   : > { %8283 = vst [vmem:[#allocation6_spill] sm:$0xff] %v6466_v46  ;;  %8284 = vst [vmem:[#allocation21_spill] sm:$0xff] %v6468_v43  ;;  %v6532_v43 = vld [vmem:[%s5363_s19 + $0x30] sm:$0xff] }
 0x173   : > { %1641 = vrot.lane.b32.xlu1 %v1304_v42, %s5318_s11  ;;  %1639 = vrot.lane.b32.xlu0 %v1303_v60, %s5318_s11  ;;  %v1310_v60 = vld [vmem:[%s5363_s19 + $0x111] sm:$0xff]  ;;  %8294 = vst [vmem:[#allocation38_spill] sm:$0xff] %v6532_v43 }
 0x175   : > { %v6474_v63 = vpop.permute.xlu1 %1401  ;;  %v6476_v17 = vpop.permute.xlu0 %1399 }
 0x176   : > { %8285 = vst [vmem:[#allocation7_spill] sm:$0xff] %v6474_v63  ;;  %8286 = vst [vmem:[#allocation34_spill] sm:$0xff] %v6476_v17  ;;  %v1317_v63 = vld [vmem:[%s5363_s19 + $0x169] sm:$0xff] }
 0x177   : > { %1645 = vrot.lane.b32.xlu1 %v1306_v30, %s5318_s11  ;;  %1643 = vrot.lane.b32.xlu0 %v1305_v4, %s5318_s11  ;;  %v1312_v4 = vld [vmem:[%s5363_s19 + $0x129] sm:$0xff] }
 0x179   : > { %v6482_v27 = vpop.permute.xlu1 %1405  ;;  %v6484_v42 = vpop.permute.xlu0 %1403 }
 0x17a   : > { %8287 = vst [vmem:[#allocation35_spill] sm:$0xff] %v6482_v27  ;;  %8288 = vst [vmem:[#allocation22_spill] sm:$0xff] %v6484_v42  ;;  %v1311_v27 = vld [vmem:[%s5363_s19 + $0x121] sm:$0xff] }
 0x17b   : > { %1649 = vrot.lane.b32.xlu1 %v1308_v16, %s5318_s11  ;;  %1647 = vrot.lane.b32.xlu0 %v1307_v29, %s5318_s11  ;;  %v1314_v29 = vld [vmem:[%s5363_s19 + $0x141] sm:$0xff] }
 0x17d   : > { %v6490_v17 = vpop.permute.xlu1 %1409  ;;  %v6492_v30 = vpop.permute.xlu0 %1407 }
 0x17e   : > { %8289 = vst [vmem:[#allocation23_spill] sm:$0xff] %v6490_v17  ;;  %8290 = vst [vmem:[#allocation36_spill] sm:$0xff] %v6492_v30  ;;  %v1313_v17 = vld [vmem:[%s5363_s19 + $0x139] sm:$0xff] }
 0x17f   : > { %1653 = vrot.lane.b32.xlu1 %v1310_v60, %s5318_s11  ;;  %1651 = vrot.lane.b32.xlu0 %v1309_v26, %s5318_s11  ;;  %v1316_v26 = vld [vmem:[%s5363_s19 + $0x159] sm:$0xff] }
 0x181   : > { %v6498_v42 = vpop.permute.xlu1 %1413  ;;  %v6500_v16 = vpop.permute.xlu0 %1411 }
 0x182   : > { %8291 = vst [vmem:[#allocation37_spill] sm:$0xff] %v6498_v42  ;;  %8292 = vst [vmem:[#allocation24_spill] sm:$0xff] %v6500_v16  ;;  %v1315_v42 = vld [vmem:[%s5363_s19 + $0x151] sm:$0xff] }
 0x183   : > { %1657 = vrot.lane.b32.xlu1 %v1312_v4, %s5318_s11  ;;  %1655 = vrot.lane.b32.xlu0 %v1311_v27, %s5318_s11  ;;  %v1318_v27 = vld [vmem:[%s5363_s19 + $0x171] sm:$0xff] }
 0x185   : > { %v6506_v30 = vpop.permute.xlu1 %1481  ;;  %v6508_v60 = vpop.permute.xlu0 %1479 }
 0x187   : > { %1661 = vrot.lane.b32.xlu1 %v1314_v29, %s5318_s11  ;;  %1659 = vrot.lane.b32.xlu0 %v1313_v17, %s5318_s11  ;;  %v6529_v17 = vld [vmem:[%s5363_s19 + $0x38] sm:$0xff] }
 0x188   : > { %8293 = vst [vmem:[#allocation25_spill] sm:$0xff] %v6529_v17 }
 0x189   : > { %v6514_v16 = vpop.permute.xlu1 %1485  ;;  %v6516_v4 = vpop.permute.xlu0 %1483 }
 0x18b   : > { %1665 = vrot.lane.b32.xlu1 %v1316_v26, %s5318_s11  ;;  %1663 = vrot.lane.b32.xlu0 %v1315_v42, %s5318_s11  ;;  %v6543_v26 = vld [vmem:[%s5363_s19 + $0x50] sm:$0xff] }
 0x18c   : > { %8295 = vst [vmem:[#allocation39_spill] sm:$0xff] %v6543_v26 }
 0x18d   : > { %v6522_v18 = vpop.permute.xlu1 %1489  ;;  %v6524_v29 = vpop.permute.xlu0 %1487 }
 0x18f   : > { %1669 = vrot.lane.b32.xlu1 %v1318_v27, %s5318_s11  ;;  %1667 = vrot.lane.b32.xlu0 %v1317_v63, %s5318_s11  ;;  %v6546_v27 = vld [vmem:[%s5363_s19 + $0x48] sm:$0xff] }
 0x190   : > { %8296 = vst [vmem:[#allocation26_spill] sm:$0xff] %v6546_v27 }
 0x191   : > { %v6534_v57 = vpop.permute.xlu1 %1493  ;;  %v6536_v42 = vpop.permute.xlu0 %1491 }
 0x193   : > { %2325 = vrot.lane.b32.xlu1 %v6529_v17, %s5316_s20  ;;  %2323 = vrot.lane.b32.xlu0 %v6532_v43, %s5316_s20  ;;  %v6557_v17 = vld [vmem:[%s5363_s19 + $0x68] sm:$0xff] }
 0x194   : > { %8297 = vst [vmem:[#allocation27_spill] sm:$0xff] %v6557_v17 }
 0x195   : > { %v6548_v63 = vpop.permute.xlu1 %1497  ;;  %v6550_v46 = vpop.permute.xlu0 %1495 }
 0x197   : > { %2329 = vrot.lane.b32.xlu1 %v6543_v26, %s5316_s20  ;;  %2327 = vrot.lane.b32.xlu0 %v6546_v27, %s5316_s20  ;;  %v6571_v26 = vld [vmem:[%s5363_s19 + $0x80] sm:$0xff] }
 0x198   : > { %8299 = vst [vmem:[#allocation41_spill] sm:$0xff] %v6571_v26 }
 0x199   : > { %v6562_v43 = vpop.permute.xlu1 %1501  ;;  %v6564_v62 = vpop.permute.xlu0 %1499 }
 0x19b   : > { %2333 = vrot.lane.b32.xlu1 %v6557_v17, %s5316_s20  ;;  %2331 = vrot.lane.b32.xlu0 %v6560_v49, %s5316_s20  ;;  %v4483_v17 = vld [vmem:[%s5363_s19 + $0x98] sm:$0xff] }
 0x19d   : > { %v6576_v27 = vpop.permute.xlu1 %1505  ;;  %v6578_v53 = vpop.permute.xlu0 %1503 }
 0x19f   : > { %2337 = vrot.lane.b32.xlu1 %v6571_v26, %s5316_s20  ;;  %2335 = vrot.lane.b32.xlu0 %v6574_v1, %s5316_s20 }
 0x1a1   : > { %v6588_v49 = vpop.permute.xlu1 %1509  ;;  %v6590_v45 = vpop.permute.xlu0 %1507 }
 0x1a3   : > { %2341 = vrot.lane.b32.xlu1 %v4483_v17, %s5316_s20  ;;  %2339 = vrot.lane.b32.xlu0 %v6586_v51, %s5316_s20  ;;  %v4489_v51 = vld [vmem:[%s5363_s19 + $0xe0] sm:$0xff] }
 0x1a5   : > { %v6597_v26 = vpop.permute.xlu1 %1513  ;;  %v6599_v1 = vpop.permute.xlu0 %1511 }
 0x1a6   : > { %8302 = vst [vmem:[#allocation44_spill] sm:$0xff] %v6597_v26  ;;  %8303 = vst [vmem:[#allocation45_spill] sm:$0xff] %v6599_v1  ;;  %v4488_v26 = vld [vmem:[%s5363_s19 + $0xd8] sm:$0xff] }
 0x1a7   : > { %2345 = vrot.lane.b32.xlu1 %v4485_v35, %s5316_s20  ;;  %2343 = vrot.lane.b32.xlu0 %v4484_v31, %s5316_s20  ;;  %v4491_v31 = vld [vmem:[%s5363_s19 + $0xf8] sm:$0xff] }
 0x1a9   : > { %v6605_v24 = vpop.permute.xlu1 %1517  ;;  %v6607_v17 = vpop.permute.xlu0 %1515 }
 0x1aa   : > { %8304 = vst [vmem:[#allocation46_spill] sm:$0xff] %v6605_v24  ;;  %8305 = vst [vmem:[#allocation47_spill] sm:$0xff] %v6607_v17  ;;  %v4490_v24 = vld [vmem:[%s5363_s19 + $0xf0] sm:$0xff] }
 0x1ab   : > { %2349 = vrot.lane.b32.xlu1 %v4487_v28, %s5316_s20  ;;  %2347 = vrot.lane.b32.xlu0 %v4486_v2, %s5316_s20  ;;  %v4493_v2 = vld [vmem:[%s5363_s19 + $0x110] sm:$0xff] }
 0x1ad   : > { %v6613_v1 = vpop.permute.xlu1 %1521  ;;  %v6615_v35 = vpop.permute.xlu0 %1519 }
 0x1ae   : > { %8306 = vst [vmem:[#allocation48_spill] sm:$0xff] %v6613_v1  ;;  %8307 = vst [vmem:[#allocation49_spill] sm:$0xff] %v6615_v35  ;;  %v4492_v1 = vld [vmem:[%s5363_s19 + $0x108] sm:$0xff] }
 0x1af   : > { %2353 = vrot.lane.b32.xlu1 %v4489_v51, %s5316_s20  ;;  %2351 = vrot.lane.b32.xlu0 %v4488_v26, %s5316_s20  ;;  %v4495_v26 = vld [vmem:[%s5363_s19 + $0x128] sm:$0xff] }
 0x1b1   : > { %v6621_v17 = vpop.permute.xlu1 %1525  ;;  %v6623_v28 = vpop.permute.xlu0 %1523 }
 0x1b2   : > { %8308 = vst [vmem:[#allocation50_spill] sm:$0xff] %v6621_v17  ;;  %8309 = vst [vmem:[#allocation51_spill] sm:$0xff] %v6623_v28  ;;  %v4494_v17 = vld [vmem:[%s5363_s19 + $0x120] sm:$0xff] }
 0x1b3   : > { %2357 = vrot.lane.b32.xlu1 %v4491_v31, %s5316_s20  ;;  %2355 = vrot.lane.b32.xlu0 %v4490_v24, %s5316_s20  ;;  %v4497_v24 = vld [vmem:[%s5363_s19 + $0x140] sm:$0xff]  ;;  %v4496_v31 = vld [vmem:[%s5363_s19 + $0x138] sm:$0xff] }
 0x1b5   : > { %v6629_v35 = vpop.permute.xlu1 %1529  ;;  %v6631_v51 = vpop.permute.xlu0 %1527 }
 0x1b6   : > { %8310 = vst [vmem:[#allocation52_spill] sm:$0xff] %v6629_v35  ;;  %8311 = vst [vmem:[#allocation53_spill] sm:$0xff] %v6631_v51 }
 0x1b7   : > { %2361 = vrot.lane.b32.xlu1 %v4493_v2, %s5316_s20  ;;  %2359 = vrot.lane.b32.xlu0 %v4492_v1, %s5316_s20  ;;  %v4499_v1 = vld [vmem:[%s5363_s19 + $0x158] sm:$0xff]  ;;  %v4498_v2 = vld [vmem:[%s5363_s19 + $0x150] sm:$0xff] }
 0x1b9   : > { %v6637_v28 = vpop.permute.xlu1 %1533  ;;  %v6639_v55 = vpop.permute.xlu0 %1531 }
 0x1ba   : > { %8312 = vst [vmem:[#allocation54_spill] sm:$0xff] %v6639_v55 }
 0x1bb   : > { %2365 = vrot.lane.b32.xlu1 %v4495_v26, %s5316_s20  ;;  %2363 = vrot.lane.b32.xlu0 %v4494_v17, %s5316_s20  ;;  %v1704_v17 = vsel %vm724_vm0, %v6025_v25, %v6331_v44  ;;  %v6677_v44 = vld [vmem:[%s8135_s2] ss:$0 sm:$0xff] }
 0x1bd   : > { %v6645_v51 = vpop.permute.xlu1 %1537  ;;  %v6647_v35 = vpop.permute.xlu0 %1535 }
 0x1be   : > { %8313 = vst [vmem:[#allocation55_spill] sm:$0xff] %v6645_v51  ;;  %8314 = vst [vmem:[#allocation56_spill] sm:$0xff] %v6647_v35  ;;  %v4500_v35 = vld [vmem:[%s5363_s19 + $0x168] sm:$0xff] }
 0x1bf   : > { %2369 = vrot.lane.b32.xlu1 %v4497_v24, %s5316_s20  ;;  %2367 = vrot.lane.b32.xlu0 %v4496_v31, %s5316_s20  ;;  %v1703_v24 = vsel %vm724_vm0, %v6028_v36, %v6333_v56  ;;  %v4501_v31 = vld [vmem:[%s5363_s19 + $0x170] sm:$0xff]  ;;  %v4577_v56 = vld [vmem:[%s8134_s1 + $0xb8] sm:$0xff] }
 0x1c0   : > { %5133 = vmatprep.subr.mxu0 %v4577_v56 }
 0x1c1   : > { %v6653_v55 = vpop.permute.xlu1 %1541  ;;  %v6655_v26 = vpop.permute.xlu0 %1539  ;;  %5134 = vmatpush3.msra.mxu0 %v4577_v56  ;;  %v4505_v56 = vld [vmem:[%s5363_s19 + $0x1a0] sm:$0xff] }
 0x1c2   : > { %8315 = vst [vmem:[#allocation57_spill] sm:$0xff] %v6653_v55  ;;  %8316 = vst [vmem:[#allocation58_spill] sm:$0xff] %v6655_v26  ;;  %v1736_v55 = vsel %vm757_vm1, %v1704_v17, %v6506_v30  ;;  %v1706_v30 = vsel %vm724_vm0, %v6049_v58, %v6348_v11  ;;  %v4776_v11 = vld [vmem:[%s8134_s1 + $0xf0] sm:$0xff] }
 0x1c3   : > { %2373 = vrot.lane.b32.xlu1 %v4499_v1, %s5316_s20  ;;  %2371 = vrot.lane.b32.xlu0 %v4498_v2, %s5316_s20  ;;  %v1735_v1 = vsel %vm757_vm1, %v1703_v24, %v6508_v60  ;;  %v4503_v60 = vld [vmem:[%s5363_s19 + $0x188] sm:$0xff]  ;;  %v1738_v17 = vsel %vm757_vm1, %v1706_v30, %v6514_v16  ;;  %v1707_v30 = vsel %vm724_vm0, %v6076_v39, %v6367_v52 }
 0x1c5   : > { %v1610_v26 = vpop.permute.xlu1 %1609  ;;  %v1608_v2 = vpop.permute.xlu0 %1607 }
 0x1c6   : > { %v1768_v51 = vsel %vm790_vm2, %v1736_v55, %v1610_v26  ;;  %v1767_v25 = vsel %vm790_vm2, %v1735_v1, %v1608_v2  ;;  %v4777_v55 = vld [vmem:[%s8134_s1 + $0xf8] sm:$0xff]  ;;  %v4502_v26 = vld [vmem:[%s5363_s19 + $0x180] sm:$0xff] }
 0x1c7   : > { %2377 = vrot.lane.b32.xlu1 %v4501_v31, %s5316_s20  ;;  %2375 = vrot.lane.b32.xlu0 %v4500_v35, %s5316_s20  ;;  %v1705_v35 = vsel %vm724_vm0, %v6052_v19, %v6350_v22 }
 0x1c8   : > { %5085 = vmatprep.mubr.msk.f32.mxu1 %vm837_vm3, %v1767_v25  ;;  %5197 = vmatprep.subr.mxu1 %v4777_v55  ;;  %v1737_v19 = vsel %vm757_vm1, %v1705_v35, %v6516_v4  ;;  %v1708_v4 = vsel %vm724_vm0, %v6073_v34, %v6365_v47  ;;  %v4775_v34 = vld [vmem:[%s8134_s1 + $0xe8] sm:$0xff]  ;;  %v1739_v47 = vsel %vm757_vm1, %v1707_v30, %v6524_v29 }
 0x1c9   : > { %v5023_v24 = vpop.f32.mrf.mxu0  ;;  %5086 = vmatmul.mubr.msk.f32.vlgmr.msra.gmra.mxu1 %vm837_vm3, %v1768_v51  ;;  %v1614_v58 = vpop.permute.xlu1 %1613  ;;  %v4576_v51 = vld [vmem:[%s8134_s1 + $0xb0] sm:$0xff]  ;;  %v1710_v29 = vsel %vm724_vm0, %v6097_v23, %v6375_v48  ;;  %v4774_v23 = vld [vmem:[%s8134_s1 + $0xe0] sm:$0xff] }
 0x1ca   : > { %v1006_v22 = vadd.f32 %v5023_v24, %v6677_v44  ;;  %v1770_v16 = vsel %vm790_vm2, %v1738_v17, %v1614_v58  ;;  %v1612_v31 = vpop.permute.xlu0 %1611  ;;  %5198 = vmatpush3.msra.mxu1 %v4777_v55  ;;  %v4504_v55 = vld [vmem:[%s5363_s19 + $0x198] sm:$0xff]  ;;  %5135 = vmatprep.subr.mxu0 %v4576_v51 }
 0x1cb   : > { %v1769_v1 = vsel %vm790_vm2, %v1737_v19, %v1612_v31  ;;  %v1000_v2 = vpop.f32.mrf.mxu0  ;;  %2381 = vrot.lane.b32.xlu1 %v4503_v60, %s5316_s20  ;;  %2379 = vrot.lane.b32.xlu0 %v4502_v26, %s5316_s20  ;;  %v1740_v60 = vsel %vm757_vm1, %v1708_v4, %v6522_v18  ;;  %v4575_v18 = vld [vmem:[%s8134_s1 + $0xa8] sm:$0xff] }
 0x1cc   : > { %1160 = vst [vmem:[%s6701_s24 + $0x8] sm:$0xff] %v1006_v22  ;;  %v1001_v25 = vadd.f32 %v6677_v44, %v1000_v2  ;;  %5088 = vmatprep.mubr.msk.f32.mxu1 %vm837_vm3, %v1769_v1  ;;  %5199 = vmatprep.subr.mxu1 %v4776_v11  ;;  %v1742_v22 = vsel %vm757_vm1, %v1710_v29, %v6534_v57  ;;  %v4574_v57 = vld [vmem:[%s8134_s1 + $0xa0] sm:$0xff] }
 0x1cd   : > { %v5026_v26 = vpop.f32.mrf.mxu0  ;;  %5089 = vmatmul.mubr.msk.f32.gmra.mxu1 %vm837_vm3, %v1770_v16  ;;  %v1618_v35 = vpop.permute.xlu1 %1617  ;;  %5136 = vmatpush3.msra.mxu0 %v4576_v51 }
 0x1ce   : > { %1159 = vst [vmem:[%s6701_s24] sm:$0xff] %v1001_v25  ;;  %v1016_v17 = vadd.f32 %v5026_v26, %v6677_v44  ;;  %v1772_v39 = vsel %vm790_vm2, %v1740_v60, %v1618_v35  ;;  %v1616_v52 = vpop.permute.xlu0 %1615  ;;  %5200 = vmatpush3.msra.mxu1 %v4776_v11  ;;  %v1709_v11 = vsel %vm724_vm0, %v6100_v6, %v6377_v3  ;;  %v4573_v60 = vld [vmem:[%s8134_s1 + $0x98] sm:$0xff] }
 0x1cf   : > { %v1771_v24 = vsel %vm790_vm2, %v1739_v47, %v1616_v52  ;;  %v1010_v58 = vpop.f32.mrf.mxu0  ;;  %2385 = vrot.lane.b32.xlu1 %v4505_v56, %s5316_s20  ;;  %2383 = vrot.lane.b32.xlu0 %v4504_v55, %s5316_s20  ;;  %v1741_v48 = vsel %vm757_vm1, %v1709_v11, %v6536_v42  ;;  %v1712_v42 = vsel %vm724_vm0, %v6121_v8, %v6387_v37  ;;  %v4773_v8 = vld [vmem:[%s8134_s1 + $0xd8] sm:$0xff] }
 0x1d0   : > { %1162 = vst [vmem:[%s6701_s24 + $0x48] sm:$0xff] %v1016_v17  ;;  %v1011_v19 = vadd.f32 %v6677_v44, %v1010_v58  ;;  %5091 = vmatprep.mubr.msk.f32.mxu1 %vm837_vm3, %v1771_v24  ;;  %5201 = vmatprep.subr.mxu1 %v4775_v34  ;;  %v1711_v25 = vsel %vm724_vm0, %v6124_v9, %v6389_v32  ;;  %v4538_v47 = vld [vmem:[%s5363_s19 + $0x18] sm:$0xff] }
 0x1d1   : > { %v5029_v16 = vpop.f32.mrf.mxu0  ;;  %5092 = vmatmul.mubr.msk.f32.gmra.mxu1 %vm837_vm3, %v1772_v39  ;;  %v1622_v31 = vpop.permute.xlu1 %1621  ;;  %5137 = vmatprep.subr.mxu0 %v4575_v18  ;;  %v1744_v56 = vsel %vm757_vm1, %v1712_v42, %v6548_v63  ;;  %v1743_v37 = vsel %vm757_vm1, %v1711_v25, %v6550_v46  ;;  %v1714_v46 = vsel %vm724_vm0, %v6145_v10, %v6401_v50  ;;  %v4772_v10 = vld [vmem:[%s8134_s1 + $0xd0] sm:$0xff] }
 0x1d2   : > { %1161 = vst [vmem:[%s6701_s24 + $0x40] sm:$0xff] %v1011_v19  ;;  %v1026_v51 = vadd.f32 %v5029_v16, %v6677_v44  ;;  %v1774_v6 = vsel %vm790_vm2, %v1742_v22, %v1622_v31  ;;  %v1620_v3 = vpop.permute.xlu0 %1619  ;;  %5138 = vmatpush3.msra.mxu0 %v4575_v18  ;;  %5202 = vmatpush3.msra.mxu1 %v4775_v34  ;;  %v4572_v18 = vld [vmem:[%s8134_s1 + $0x90] sm:$0xff]  ;;  %v4707_v19 = vld [vmem:[%s5363_s19 + $0x22] sm:$0xff] }
 0x1d3   : > { %v1773_v1 = vsel %vm790_vm2, %v1741_v48, %v1620_v3  ;;  %v1020_v2 = vpop.f32.mrf.mxu0  ;;  %3294 = vrot.lane.b32.xlu1 %v6399_v33, %s5316_s20  ;;  %2451 = vrot.lane.b32.xlu0 %v6385_v14, %s5317_s21  ;;  %v1713_v17 = vsel %vm724_vm0, %v6148_v41, %v6403_v0  ;;  %v1715_v11 = vsel %vm724_vm0, %v6172_v21, %v6417_v12  ;;  %v4539_v3 = vld [vmem:[%s5363_s19 + $0x20] sm:$0xff] }
 0x1d4   : > { %1164 = vst [vmem:[%s6701_s24 + $0x88] sm:$0xff] %v1026_v51  ;;  %v1021_v4 = vadd.f32 %v6677_v44, %v1020_v2  ;;  %5094 = vmatprep.mubr.msk.f32.mxu1 %vm837_vm3, %v1773_v1  ;;  %5203 = vmatprep.subr.mxu1 %v4774_v23  ;;  %v1745_v50 = vsel %vm757_vm1, %v1713_v17, %v6564_v62  ;;  %v8323_v17 = vld [vmem:[#allocation10_spill] sm:$0xff] }
 0x1d5   : > { %v5032_v55 = vpop.f32.mrf.mxu0  ;;  %5095 = vmatmul.mubr.msk.f32.gmra.mxu1 %vm837_vm3, %v1774_v6  ;;  %v1626_v30 = vpop.permute.xlu1 %1625  ;;  %5139 = vmatprep.subr.mxu0 %v4574_v57  ;;  %v1716_v62 = vsel %vm724_vm0, %v6169_v20, %v6415_v13  ;;  %v4771_v20 = vld [vmem:[%s8134_s1 + $0xc8] sm:$0xff]  ;;  %v1747_v13 = vsel %vm757_vm1, %v1715_v11, %v6578_v53  ;;  %v1718_v53 = vsel %vm724_vm0, %v6193_v61, %v6429_v54  ;;  %v4770_v61 = vld [vmem:[%s8134_s1 + $0xc0] sm:$0xff] }
 0x1d6   : > { %1163 = vst [vmem:[%s6701_s24 + $0x80] sm:$0xff] %v1021_v4  ;;  %v1036_v9 = vadd.f32 %v5032_v55, %v6677_v44  ;;  %v1776_v32 = vsel %vm790_vm2, %v1744_v56, %v1626_v30  ;;  %v1624_v63 = vpop.permute.xlu0 %1623  ;;  %5140 = vmatpush3.msra.mxu0 %v4574_v57  ;;  %5204 = vmatpush3.msra.mxu1 %v4774_v23  ;;  %v4571_v23 = vld [vmem:[%s8134_s1 + $0x88] sm:$0xff]  ;;  %v8318_v30 = vld [vmem:[#allocation9_spill] sm:$0xff] }
 0x1d7   : > { %v1775_v26 = vsel %vm790_vm2, %v1743_v37, %v1624_v63  ;;  %v1030_v35 = vpop.f32.mrf.mxu0  ;;  %3422 = vrot.lane.b32.xlu1 %v6028_v36, %s5317_s21  ;;  %3296 = vrot.lane.b32.xlu0 %v6396_v40, %s5316_s20  ;;  %v1746_v36 = vsel %vm757_vm1, %v1714_v46, %v6562_v43  ;;  %v1748_v22 = vsel %vm757_vm1, %v1716_v62, %v6576_v27  ;;  %v8317_v55 = vld [vmem:[#allocation19_spill] sm:$0xff]  ;;  %v8319_v37 = vld [vmem:[#allocation44_spill] sm:$0xff] }
 0x1d8   : > { %1166 = vst [vmem:[%s6701_s24 + $0xc8] sm:$0xff] %v1036_v9  ;;  %v1031_v34 = vadd.f32 %v6677_v44, %v1030_v35  ;;  %5097 = vmatprep.mubr.msk.f32.mxu1 %vm837_vm3, %v1775_v26  ;;  %5205 = vmatprep.subr.mxu1 %v4773_v8  ;;  %v1717_v57 = vsel %vm724_vm0, %v6196_v7, %v6431_v5 }
 0x1d9   : > { %v5035_v39 = vpop.f32.mrf.mxu0  ;;  %5098 = vmatmul.mubr.msk.f32.gmra.mxu1 %vm837_vm3, %v1776_v32  ;;  %v1630_v52 = vpop.permute.xlu1 %1629  ;;  %5141 = vmatprep.subr.mxu0 %v4573_v60  ;;  %v1749_v54 = vsel %vm757_vm1, %v1717_v57, %v6590_v45  ;;  %v1720_v45 = vsel %vm724_vm0, %v6217_v59, %v6441_v38  ;;  %v8320_v59 = vld [vmem:[#allocation45_spill] sm:$0xff] }
 0x1da   : > { %1165 = vst [vmem:[%s6701_s24 + $0xc0] sm:$0xff] %v1031_v34  ;;  %v1046_v41 = vadd.f32 %v5035_v39, %v6677_v44  ;;  %v1778_v0 = vsel %vm790_vm2, %v1746_v36, %v1630_v52  ;;  %v1628_v43 = vpop.permute.xlu0 %1627  ;;  %5142 = vmatpush3.msra.mxu0 %v4573_v60  ;;  %5206 = vmatpush3.msra.mxu1 %v4773_v8  ;;  %v8321_v34 = vld [vmem:[#allocation30_spill] sm:$0xff]  ;;  %v6914_v52 = vld [vmem:[%s5363_s19 + $0x32] sm:$0xff] }
 0x1db   : > { %v1777_v24 = vsel %vm790_vm2, %v1745_v50, %v1628_v43  ;;  %v1040_v58 = vpop.f32.mrf.mxu0  ;;  %2579 = vrot.lane.b32.xlu1 %v4538_v47, %s5318_s11  ;;  %2453 = vrot.lane.b32.xlu0 %v6382_v15, %s5317_s21  ;;  %v1719_v8 = vsel %vm724_vm0, %v8318_v30, %v8317_v55  ;;  %v1752_v9 = vsel %vm757_vm1, %v1720_v45, %v8319_v37  ;;  %v8322_v47 = vld [vmem:[#allocation5_spill] sm:$0xff]  ;;  %v8325_v50 = vld [vmem:[#allocation11_spill] sm:$0xff]  ;;  %v8339_v55 = vld [vmem:[#allocation14_spill] sm:$0xff] }
 0x1dc   : > { %1168 = vst [vmem:[%s6701_s24 + $0x108] sm:$0xff] %v1046_v41  ;;  %v1041_v29 = vadd.f32 %v6677_v44, %v1040_v58  ;;  %5100 = vmatprep.mubr.msk.f32.mxu1 %vm837_vm3, %v1777_v24  ;;  %5207 = vmatprep.subr.mxu1 %v4772_v10  ;;  %v1751_v38 = vsel %vm757_vm1, %v1719_v8, %v8320_v59  ;;  %v8327_v58 = vld [vmem:[#allocation47_spill] sm:$0xff]  ;;  %v8334_v57 = vld [vmem:[#allocation49_spill] sm:$0xff]  ;;  %v8340_v8 = vld [vmem:[#allocation50_spill] sm:$0xff] }
 0x1dd   : > { %v5038_v16 = vpop.f32.mrf.mxu0  ;;  %5101 = vmatmul.mubr.msk.f32.gmra.mxu1 %vm837_vm3, %v1778_v0  ;;  %v1634_v31 = vpop.permute.xlu1 %1633  ;;  %5143 = vmatprep.subr.mxu0 %v4572_v18  ;;  %v1722_v36 = vsel %vm724_vm0, %v8323_v17, %v8322_v47  ;;  %v8326_v0 = vld [vmem:[#allocation46_spill] sm:$0xff]  ;;  %v8343_v47 = vld [vmem:[#allocation15_spill] sm:$0xff] }
 0x1de   : > { %1167 = vst [vmem:[%s6701_s24 + $0x100] sm:$0xff] %v1041_v29  ;;  %v1056_v21 = vadd.f32 %v5038_v16, %v6677_v44  ;;  %v1780_v12 = vsel %vm790_vm2, %v1748_v22, %v1634_v31  ;;  %v1632_v27 = vpop.permute.xlu0 %1631  ;;  %5144 = vmatpush3.msra.mxu0 %v4572_v18  ;;  %5208 = vmatpush3.msra.mxu1 %v4772_v10  ;;  %v8324_v10 = vld [vmem:[#allocation32_spill] sm:$0xff]  ;;  %v8328_v31 = vld [vmem:[#allocation3_spill] sm:$0xff]  ;;  %v6961_v45 = vld [vmem:[%s5363_s19 + $0x3a] sm:$0xff] }
 0x1df   : > { %v1779_v48 = vsel %vm790_vm2, %v1747_v13, %v1632_v27  ;;  %v1050_v51 = vpop.f32.mrf.mxu0  ;;  %3550 = vrot.lane.b32.xlu1 %v6385_v14, %s5318_s11  ;;  %3424 = vrot.lane.b32.xlu0 %v4707_v19, %s5317_s21  ;;  %v1750_v14 = vsel %vm757_vm1, %v1718_v53, %v6588_v49  ;;  %v4570_v49 = vld [vmem:[%s8134_s1 + $0x80] sm:$0xff]  ;;  %v1721_v41 = vsel %vm724_vm0, %v8325_v50, %v8324_v10  ;;  %v8330_v13 = vld [vmem:[#allocation8_spill] sm:$0xff] }
 0x1e0   : > { %1170 = vst [vmem:[%s6701_s24 + $0x148] sm:$0xff] %v1056_v21  ;;  %v1051_v6 = vadd.f32 %v6677_v44, %v1050_v51  ;;  %5103 = vmatprep.mubr.msk.f32.mxu1 %vm837_vm3, %v1779_v48  ;;  %5209 = vmatprep.subr.mxu1 %v4771_v20  ;;  %v1754_v43 = vsel %vm757_vm1, %v1722_v36, %v8326_v0  ;;  %v8331_v27 = vld [vmem:[#allocation20_spill] sm:$0xff] }
 0x1e1   : > { %v5041_v1 = vpop.f32.mrf.mxu0  ;;  %5104 = vmatmul.mubr.msk.f32.gmra.mxu1 %vm837_vm3, %v1780_v12  ;;  %v1638_v2 = vpop.permute.xlu1 %1637  ;;  %5145 = vmatprep.subr.mxu0 %v4571_v23  ;;  %v1753_v62 = vsel %vm757_vm1, %v1721_v41, %v8327_v58  ;;  %v8333_v51 = vld [vmem:[#allocation48_spill] sm:$0xff] }
 0x1e2   : > { %1169 = vst [vmem:[%s6701_s24 + $0x140] sm:$0xff] %v1051_v6  ;;  %v1066_v42 = vadd.f32 %v5041_v1, %v6677_v44  ;;  %v1782_v7 = vsel %vm790_vm2, %v1750_v14, %v1638_v2  ;;  %v1636_v5 = vpop.permute.xlu0 %1635  ;;  %5146 = vmatpush3.msra.mxu0 %v4571_v23  ;;  %5210 = vmatpush3.msra.mxu1 %v4771_v20  ;;  %v8329_v20 = vld [vmem:[#allocation33_spill] sm:$0xff]  ;;  %v8332_v23 = vld [vmem:[#allocation12_spill] sm:$0xff] }
 0x1e3   : > { %v1781_v4 = vsel %vm790_vm2, %v1749_v54, %v1636_v5  ;;  %v1060_v25 = vpop.f32.mrf.mxu0  ;;  %3552 = vrot.lane.b32.xlu1 %v6382_v15, %s5318_s11  ;;  %2581 = vrot.lane.b32.xlu0 %v4539_v3, %s5318_s11  ;;  %v1724_v21 = vsel %vm724_vm0, %v8330_v13, %v8329_v20  ;;  %v1723_v48 = vsel %vm724_vm0, %v8332_v23, %v8331_v27  ;;  %v8336_v5 = vld [vmem:[#allocation6_spill] sm:$0xff]  ;;  %v8345_v10 = vld [vmem:[#allocation28_spill] sm:$0xff]  ;;  %v8350_v20 = vld [vmem:[#allocation29_spill] sm:$0xff] }
 0x1e4   : > { %1172 = vst [vmem:[%s6701_s24 + $0x188] sm:$0xff] %v1066_v42  ;;  %v1061_v56 = vadd.f32 %v6677_v44, %v1060_v25  ;;  %5106 = vmatprep.mubr.msk.f32.mxu1 %vm837_vm3, %v1781_v4  ;;  %5211 = vmatprep.subr.mxu1 %v4770_v61  ;;  %v1756_v53 = vsel %vm757_vm1, %v1724_v21, %v8333_v51  ;;  %v8346_v41 = vld [vmem:[#allocation52_spill] sm:$0xff] }
 0x1e5   : > { %v5044_v15 = vpop.f32.mrf.mxu0  ;;  %5107 = vmatmul.mubr.msk.f32.gmra.mxu1 %vm837_vm3, %v1782_v7  ;;  %v1642_v32 = vpop.permute.xlu1 %1641  ;;  %5147 = vmatprep.subr.mxu0 %v4570_v49  ;;  %v1755_v14 = vsel %vm757_vm1, %v1723_v48, %v8334_v57  ;;  %v8335_v7 = vld [vmem:[#allocation38_spill] sm:$0xff]  ;;  %v8352_v27 = vld [vmem:[#allocation16_spill] sm:$0xff] }
 0x1e6   : > { %1171 = vst [vmem:[%s6701_s24 + $0x180] sm:$0xff] %v1061_v56  ;;  %v1076_v63 = vadd.f32 %v5044_v15, %v6677_v44  ;;  %v1784_v60 = vsel %vm790_vm2, %v1752_v9, %v1642_v32  ;;  %v1640_v26 = vpop.permute.xlu0 %1639  ;;  %5148 = vmatpush3.msra.mxu0 %v4570_v49  ;;  %5212 = vmatpush3.msra.mxu1 %v4770_v61  ;;  %v8337_v49 = vld [vmem:[#allocation13_spill] sm:$0xff]  ;;  %v8341_v32 = vld [vmem:[#allocation51_spill] sm:$0xff] }
 0x1e7   : > { %v1783_v35 = vsel %vm790_vm2, %v1751_v38, %v1640_v26  ;;  %v1070_v46 = vpop.f32.mrf.mxu0  ;;  %2455 = vrot.lane.b32.xlu1 %v6399_v33, %s5317_s21  ;;  %3298 = vrot.lane.b32.xlu0 %v8321_v34, %s5316_s20  ;;  %v1726_v4 = vsel %vm724_vm0, %v8337_v49, %v8336_v5  ;;  %v8338_v56 = vld [vmem:[#allocation21_spill] sm:$0xff]  ;;  %v7030_v5 = vld [vmem:[%s5363_s19 + $0x4a] sm:$0xff] }
 0x1e8   : > { %1174 = vst [vmem:[%s6701_s24 + $0x1c8] sm:$0xff] %v1076_v63  ;;  %v1071_v39 = vadd.f32 %v6677_v44, %v1070_v46  ;;  %5109 = vmatprep.mubr.msk.f32.mxu1 %vm837_vm3, %v1783_v35  ;;  %v1725_v30 = vsel %vm724_vm0, %v8339_v55, %v8338_v56  ;;  %v1758_v37 = vsel %vm757_vm1, %v1726_v4, %v8340_v8  ;;  %v8342_v46 = vld [vmem:[#allocation7_spill] sm:$0xff]  ;;  %v8357_v49 = vld [vmem:[#allocation36_spill] sm:$0xff]  ;;  %v8358_v4 = vld [vmem:[#allocation17_spill] sm:$0xff] }
 0x1e9   : > { %v5047_v18 = vpop.f32.mrf.mxu0  ;;  %5110 = vmatmul.mubr.msk.f32.gmra.mxu1 %vm837_vm3, %v1784_v60  ;;  %v1646_v24 = vpop.permute.xlu1 %1645  ;;  %v1757_v59 = vsel %vm757_vm1, %v1725_v30, %v8341_v32  ;;  %v1728_v17 = vsel %vm724_vm0, %v8343_v47, %v8342_v46  ;;  %v4337_v56 = vld [vmem:[%s5363_s19 + $0x18a] sm:$0xff]  ;;  %v8362_v46 = vld [vmem:[#allocation37_spill] sm:$0xff] }
 0x1ea   : > { %1173 = vst [vmem:[%s6701_s24 + $0x1c0] sm:$0xff] %v1071_v39  ;;  %v1086_v29 = vadd.f32 %v5047_v18, %v6677_v44  ;;  %v1786_v19 = vsel %vm790_vm2, %v1754_v43, %v1646_v24  ;;  %v1644_v11 = vpop.permute.xlu0 %1643  ;;  %v8344_v39 = vld [vmem:[#allocation34_spill] sm:$0xff]  ;;  %v8347_v18 = vld [vmem:[#allocation53_spill] sm:$0xff]  ;;  %v8359_v55 = vld [vmem:[#allocation55_spill] sm:$0xff]  ;;  %v1734_v47 = vsel %vm724_vm0, %v4337_v56, %v8362_v46 }
 0x1eb   : > { %v1785_v22 = vsel %vm790_vm2, %v1753_v62, %v1644_v11  ;;  %v1080_v16 = vpop.f32.mrf.mxu0  ;;  %3426 = vrot.lane.b32.xlu1 %v6914_v52, %s5317_s21  ;;  %3300 = vrot.lane.b32.xlu0 %v8328_v31, %s5316_s20  ;;  %v1727_v50 = vsel %vm724_vm0, %v8345_v10, %v8344_v39  ;;  %v8364_v10 = vld [vmem:[#allocation57_spill] sm:$0xff] }
 0x1ec   : > { %1176 = vst [vmem:[%s6701_s24 + $0x208] sm:$0xff] %v1086_v29  ;;  %v1081_v12 = vadd.f32 %v6677_v44, %v1080_v16  ;;  %5112 = vmatprep.mubr.msk.f32.mxu1 %vm837_vm3, %v1785_v22  ;;  %v1759_v24 = vsel %vm757_vm1, %v1727_v50, %v8347_v18  ;;  %v8348_v22 = vld [vmem:[#allocation25_spill] sm:$0xff]  ;;  %v8349_v16 = vld [vmem:[#allocation35_spill] sm:$0xff]  ;;  %v1766_v50 = vsel %vm757_vm1, %v1734_v47, %v8364_v10 }
 0x1ed   : > { %v5050_v6 = vpop.f32.mrf.mxu0  ;;  %5113 = vmatmul.mubr.msk.f32.gmra.mxu1 %vm837_vm3, %v1786_v19  ;;  %v1650_v3 = vpop.permute.xlu1 %1649  ;;  %v1730_v13 = vsel %vm724_vm0, %v8350_v20, %v8349_v16 }
 0x1ee   : > { %1175 = vst [vmem:[%s6701_s24 + $0x200] sm:$0xff] %v1081_v12  ;;  %v1096_v1 = vadd.f32 %v5050_v6, %v6677_v44  ;;  %v1788_v2 = vsel %vm790_vm2, %v1756_v53, %v1650_v3  ;;  %v1648_v61 = vpop.permute.xlu0 %1647  ;;  %v8351_v12 = vld [vmem:[#allocation22_spill] sm:$0xff] }
 0x1ef   : > { %v1787_v54 = vsel %vm790_vm2, %v1755_v14, %v1648_v61  ;;  %v1090_v42 = vpop.f32.mrf.mxu0  ;;  %2583 = vrot.lane.b32.xlu1 %v8335_v7, %s5318_s11  ;;  %2457 = vrot.lane.b32.xlu0 %v6396_v40, %s5317_s21  ;;  %v1729_v23 = vsel %vm724_vm0, %v8352_v27, %v8351_v12  ;;  %v8353_v53 = vld [vmem:[#allocation54_spill] sm:$0xff]  ;;  %v8355_v61 = vld [vmem:[#allocation23_spill] sm:$0xff]  ;;  %v7090_v27 = vld [vmem:[%s5363_s19 + $0x51] sm:$0xff] }
 0x1f0   : > { %1178 = vst [vmem:[%s6701_s24 + $0x248] sm:$0xff] %v1096_v1  ;;  %v1091_v25 = vadd.f32 %v6677_v44, %v1090_v42  ;;  %5115 = vmatprep.mubr.msk.f32.mxu1 %vm837_vm3, %v1787_v54  ;;  %v1761_v6 = vsel %vm757_vm1, %v1729_v23, %v8353_v53  ;;  %v8356_v54 = vld [vmem:[#allocation2_spill] sm:$0xff]  ;;  %v8368_v53 = vld [vmem:[#allocation4_spill] sm:$0xff] }
 0x1f1   : > { %v5053_v9 = vpop.f32.mrf.mxu0  ;;  %5116 = vmatmul.mubr.msk.f32.gmra.mxu1 %vm837_vm3, %v1788_v2  ;;  %v1654_v15 = vpop.permute.xlu1 %1653  ;;  %v1732_v42 = vsel %vm724_vm0, %v8356_v54, %v8355_v61  ;;  %v8369_v61 = vld [vmem:[#allocation40_spill] sm:$0xff] }
 0x1f2   : > { %1177 = vst [vmem:[%s6701_s24 + $0x240] sm:$0xff] %v1091_v25  ;;  %v1106_v38 = vadd.f32 %v5053_v9, %v6677_v44  ;;  %v1790_v63 = vsel %vm790_vm2, %v1758_v37, %v1654_v15  ;;  %v1652_v60 = vpop.permute.xlu0 %1651  ;;  %v1731_v25 = vsel %vm724_vm0, %v8358_v4, %v8357_v49  ;;  %v1764_v30 = vsel %vm757_vm1, %v1732_v42, %v8359_v55  ;;  %v4336_v9 = vld [vmem:[%s5363_s19 + $0x182] sm:$0xff]  ;;  %v8360_v15 = vld [vmem:[#allocation56_spill] sm:$0xff]  ;;  %v7159_v55 = vld [vmem:[%s5363_s19 + $0x79] sm:$0xff] }
 0x1f3   : > { %v1789_v26 = vsel %vm790_vm2, %v1757_v59, %v1652_v60  ;;  %v1100_v35 = vpop.f32.mrf.mxu0  ;;  %3554 = vrot.lane.b32.xlu1 %v6399_v33, %s5318_s11  ;;  %3428 = vrot.lane.b32.xlu0 %v6961_v45, %s5317_s21  ;;  %v1760_v33 = vsel %vm757_vm1, %v1728_v17, %v8346_v41  ;;  %v1763_v32 = vsel %vm757_vm1, %v1731_v25, %v8360_v15  ;;  %v7138_v54 = vld [vmem:[%s5363_s19 + $0x6a] sm:$0xff]  ;;  %v7176_v15 = vld [vmem:[%s5363_s19 + $0x99] sm:$0xff] }
 0x1f4   : > { %1180 = vst [vmem:[%s6701_s24 + $0x288] sm:$0xff] %v1106_v38  ;;  %v1101_v36 = vadd.f32 %v6677_v44, %v1100_v35  ;;  %5118 = vmatprep.mubr.msk.f32.mxu1 %vm837_vm3, %v1789_v26  ;;  %v8361_v35 = vld [vmem:[#allocation31_spill] sm:$0xff] }
 0x1f5   : > { %v5056_v0 = vpop.f32.mrf.mxu0  ;;  %5119 = vmatmul.mubr.msk.f32.gmra.mxu1 %vm837_vm3, %v1790_v63  ;;  %v1658_v43 = vpop.permute.xlu1 %1657  ;;  %v8370_v25 = vld [vmem:[#allocation27_spill] sm:$0xff] }
 0x1f6   : > { %1179 = vst [vmem:[%s6701_s24 + $0x280] sm:$0xff] %v1101_v36  ;;  %v1116_v58 = vadd.f32 %v5056_v0, %v6677_v44  ;;  %v1792_v62 = vsel %vm790_vm2, %v1760_v33, %v1658_v43  ;;  %v1656_v29 = vpop.permute.xlu0 %1655  ;;  %v8363_v36 = vld [vmem:[#allocation24_spill] sm:$0xff]  ;;  %v8365_v0 = vld [vmem:[#allocation58_spill] sm:$0xff] }
 0x1f7   : > { %v1791_v19 = vsel %vm790_vm2, %v1759_v24, %v1656_v29  ;;  %v1110_v11 = vpop.f32.mrf.mxu0  ;;  %3556 = vrot.lane.b32.xlu1 %v6396_v40, %s5318_s11  ;;  %2585 = vrot.lane.b32.xlu0 %v8348_v22, %s5318_s11  ;;  %v1762_v40 = vsel %vm757_vm1, %v1730_v13, %v6637_v28  ;;  %v8354_v28 = vld [vmem:[#allocation18_spill] sm:$0xff]  ;;  %v1733_v39 = vsel %vm724_vm0, %v4336_v9, %v8363_v36  ;;  %v7074_v22 = vld [vmem:[%s5363_s19 + $0x52] sm:$0xff] }
 0x1f8   : > { %1182 = vst [vmem:[%s6701_s24 + $0x2c8] sm:$0xff] %v1116_v58  ;;  %v1111_v21 = vadd.f32 %v6677_v44, %v1110_v11  ;;  %5121 = vmatprep.mubr.msk.f32.mxu1 %vm837_vm3, %v1791_v19  ;;  %v1765_v43 = vsel %vm757_vm1, %v1733_v39, %v8365_v0  ;;  %v8366_v19 = vld [vmem:[#allocation26_spill] sm:$0xff]  ;;  %v7214_v39 = vld [vmem:[%s5363_s19 + $0xa9] sm:$0xff] }
 0x1f9   : > { %v5059_v48 = vpop.f32.mrf.mxu0  ;;  %5122 = vmatmul.mubr.msk.f32.gmra.mxu1 %vm837_vm3, %v1792_v62  ;;  %v1662_v51 = vpop.permute.xlu1 %1661 }
 0x1fa   : > { %1181 = vst [vmem:[%s6701_s24 + $0x2c0] sm:$0xff] %v1111_v21  ;;  %v1126_v3 = vadd.f32 %v5059_v48, %v6677_v44  ;;  %v1794_v57 = vsel %vm790_vm2, %v1762_v40, %v1662_v51  ;;  %v1660_v14 = vpop.permute.xlu0 %1659  ;;  %v7102_v48 = vld [vmem:[%s5363_s19 + $0x61] sm:$0xff] }
 0x1fb   : > { %v1793_v1 = vsel %vm790_vm2, %v1761_v6, %v1660_v14  ;;  %v1120_v2 = vpop.f32.mrf.mxu0  ;;  %2459 = vrot.lane.b32.xlu1 %v8321_v34, %s5317_s21  ;;  %3302 = vrot.lane.b32.xlu0 %v8354_v28, %s5316_s20  ;;  %v7113_v6 = vld [vmem:[%s5363_s19 + $0x81] sm:$0xff] }
 0x1fc   : > { %1184 = vst [vmem:[%s6701_s24 + $0x308] sm:$0xff] %v1126_v3  ;;  %v1121_v7 = vadd.f32 %v6677_v44, %v1120_v2  ;;  %5124 = vmatprep.mubr.msk.f32.mxu1 %vm837_vm3, %v1793_v1  ;;  %v7116_v3 = vld [vmem:[%s5363_s19 + $0x62] sm:$0xff] }
 0x1fd   : > { %v5062_v8 = vpop.f32.mrf.mxu0  ;;  %5125 = vmatmul.mubr.msk.f32.gmra.mxu1 %vm837_vm3, %v1794_v57  ;;  %v1666_v37 = vpop.permute.xlu1 %1665  ;;  %v7129_v2 = vld [vmem:[%s5363_s19 + $0x69] sm:$0xff] }
 0x1fe   : > { %1183 = vst [vmem:[%s6701_s24 + $0x300] sm:$0xff] %v1121_v7  ;;  %v1136_v59 = vadd.f32 %v5062_v8, %v6677_v44  ;;  %v1796_v38 = vsel %vm790_vm2, %v1764_v30, %v1666_v37  ;;  %v1664_v63 = vpop.permute.xlu0 %1663  ;;  %v7162_v30 = vld [vmem:[%s5363_s19 + $0x91] sm:$0xff]  ;;  %v7171_v37 = vld [vmem:[%s5363_s19 + $0x7a] sm:$0xff] }
 0x1ff   : > { %v1795_v60 = vsel %vm790_vm2, %v1763_v32, %v1664_v63  ;;  %v1130_v26 = vpop.f32.mrf.mxu0  ;;  %3430 = vrot.lane.b32.xlu1 %v7030_v5, %s5317_s21  ;;  %3304 = vrot.lane.b32.xlu0 %v8361_v35, %s5316_s20  ;;  %v8371_v63 = vld [vmem:[#allocation42_spill] sm:$0xff] }
 0x200   : > { %1186 = vst [vmem:[%s6701_s24 + $0x348] sm:$0xff] %v1136_v59  ;;  %v1131_v17 = vadd.f32 %v6677_v44, %v1130_v26  ;;  %5127 = vmatprep.mubr.msk.f32.mxu1 %vm837_vm3, %v1795_v60  ;;  %v7193_v60 = vld [vmem:[%s5363_s19 + $0x82] sm:$0xff] }
 0x201   : > { %v5065_v41 = vpop.f32.mrf.mxu0  ;;  %5128 = vmatmul.mubr.msk.f32.gmra.mxu1 %vm837_vm3, %v1796_v38  ;;  %v1670_v33 = vpop.permute.xlu1 %1669 }
 0x202   : > { %1185 = vst [vmem:[%s6701_s24 + $0x340] sm:$0xff] %v1131_v17  ;;  %v1146_v18 = vadd.f32 %v5065_v41, %v6677_v44  ;;  %v1798_v24 = vsel %vm790_vm2, %v1766_v50, %v1670_v33  ;;  %v1668_v58 = vpop.permute.xlu0 %1667  ;;  %v8372_v17 = vld [vmem:[#allocation41_spill] sm:$0xff] }
 0x203   : > { %v1797_v62 = vsel %vm790_vm2, %v1765_v43, %v1668_v58  ;;  %v1140_v29 = vpop.f32.mrf.mxu0  ;;  %2587 = vrot.lane.b32.xlu1 %v8366_v19, %s5318_s11  ;;  %2461 = vrot.lane.b32.xlu0 %v8328_v31, %s5317_s21  ;;  %v7223_v50 = vld [vmem:[%s5363_s19 + $0x92] sm:$0xff]  ;;  %v7245_v58 = vld [vmem:[%s5363_s19 + $0x9a] sm:$0xff] }
 0x204   : > { %1188 = vst [vmem:[%s6701_s24 + $0x388] sm:$0xff] %v1146_v18  ;;  %v1141_v11 = vadd.f32 %v6677_v44, %v1140_v29  ;;  %5130 = vmatprep.mubr.msk.f32.mxu1 %vm837_vm3, %v1797_v62  ;;  %v7228_v33 = vld [vmem:[%s5363_s19 + $0xb1] sm:$0xff] }
 0x205   : > { %v5068_v16 = vpop.f32.mrf.mxu0  ;;  %5131 = vmatmul.mubr.msk.f32.gmra.mxu1 %vm837_vm3, %v1798_v24  ;;  %v7077_v20 = vpop.permute.xlu1 %2325  ;;  %v8373_v24 = vld [vmem:[#allocation43_spill] sm:$0xff]  ;;  %v4549_v19 = vld [vmem:[%s5363_s19 + $0x98] sm:$0xff] }
 0x206   : > { %1187 = vst [vmem:[%s6701_s24 + $0x380] sm:$0xff] %v1141_v11  ;;  %v1156_v13 = vadd.f32 %v5068_v16, %v6677_v44  ;;  %v7081_v21 = vpop.permute.xlu0 %2323 }
 0x207   : > { %v1150_v31 = vpop.f32.mrf.mxu0  ;;  %3558 = vrot.lane.b32.xlu1 %v8321_v34, %s5318_s11  ;;  %3432 = vrot.lane.b32.xlu0 %v7074_v22, %s5317_s21  ;;  %v8367_v34 = vld [vmem:[#allocation39_spill] sm:$0xff] }
 0x208   : > { %1190 = vst [vmem:[%s6701_s24 + $0x3c8] sm:$0xff] %v1156_v13  ;;  %v1151_v12 = vadd.f32 %v6677_v44, %v1150_v31  ;;  %v4442_v13 = vld [vmem:[%s5363_s19 + $0x31] sm:$0xff] }
 0x209   : > { %v7092_v23 = vpop.permute.xlu1 %2329 }
 0x20a   : > { %1189 = vst [vmem:[%s6701_s24 + $0x3c0] sm:$0xff] %v1151_v12  ;;  %v7095_v40 = vpop.permute.xlu0 %2327  ;;  %v7261_v12 = vld [vmem:[%s5363_s19 + $0xc1] sm:$0xff] }
 0x20b   : > { %3560 = vrot.lane.b32.xlu1 %v7090_v27, %s5318_s11  ;;  %2589 = vrot.lane.b32.xlu0 %v8367_v34, %s5318_s11 }
 0x20d   : > { %v7104_v51 = vpop.permute.xlu1 %2333 }
 0x20e   : > { %v7106_v44 = vpop.permute.xlu0 %2331 }
 0x20f   : > { %2463 = vrot.lane.b32.xlu1 %v7102_v48, %s5317_s21  ;;  %3306 = vrot.lane.b32.xlu0 %v8368_v53, %s5316_s20  ;;  %v2675_v53 = vsel %vm724_vm0, %v4442_v13, %v7081_v21 }
 0x211   : > { %v7118_v57 = vpop.permute.xlu1 %2337 }
 0x212   : > { %v7120_v14 = vpop.permute.xlu0 %2335 }
 0x213   : > { %3434 = vrot.lane.b32.xlu1 %v7116_v3, %s5317_s21  ;;  %3308 = vrot.lane.b32.xlu0 %v7113_v6, %s5316_s20 }
 0x215   : > { %v7126_v1 = vpop.permute.xlu1 %2341 }
 0x216   : > { %v7131_v28 = vpop.permute.xlu0 %2339 }
 0x217   : > { %2591 = vrot.lane.b32.xlu1 %v8369_v61, %s5318_s11  ;;  %2465 = vrot.lane.b32.xlu0 %v7129_v2, %s5317_s21  ;;  %v7270_v61 = vld [vmem:[%s5363_s19 + $0xaa] sm:$0xff] }
 0x219   : > { %v7140_v42 = vpop.permute.xlu1 %2345 }
 0x21a   : > { %v7142_v7 = vpop.permute.xlu0 %2343 }
 0x21b   : > { %3562 = vrot.lane.b32.xlu1 %v7102_v48, %s5318_s11  ;;  %3436 = vrot.lane.b32.xlu0 %v7138_v54, %s5317_s21 }
 0x21d   : > { %v7148_v49 = vpop.permute.xlu1 %2349 }
 0x21e   : > { %v7150_v4 = vpop.permute.xlu0 %2347 }
 0x21f   : > { %3564 = vrot.lane.b32.xlu1 %v7129_v2, %s5318_s11  ;;  %2593 = vrot.lane.b32.xlu0 %v8370_v25, %s5318_s11 }
 0x221   : > { %v7156_v56 = vpop.permute.xlu1 %2353 }
 0x222   : > { %v7164_v8 = vpop.permute.xlu0 %2351 }
 0x223   : > { %2467 = vrot.lane.b32.xlu1 %v7159_v55, %s5317_s21  ;;  %3310 = vrot.lane.b32.xlu0 %v7162_v30, %s5316_s20 }
 0x225   : > { %v7173_v9 = vpop.permute.xlu1 %2357 }
 0x226   : > { %v7178_v32 = vpop.permute.xlu0 %2355 }
 0x227   : > { %3438 = vrot.lane.b32.xlu1 %v7171_v37, %s5317_s21  ;;  %3312 = vrot.lane.b32.xlu0 %v7176_v15, %s5316_s20 }
 0x229   : > { %v7184_v59 = vpop.permute.xlu1 %2361 }
 0x22a   : > { %v7186_v38 = vpop.permute.xlu0 %2359 }
 0x22b   : > { %2595 = vrot.lane.b32.xlu1 %v8371_v63, %s5318_s11  ;;  %2469 = vrot.lane.b32.xlu0 %v7113_v6, %s5317_s21 }
 0x22d   : > { %v7195_v26 = vpop.permute.xlu1 %2365 }
 0x22e   : > { %v7197_v35 = vpop.permute.xlu0 %2363 }
 0x22f   : > { %3566 = vrot.lane.b32.xlu1 %v7159_v55, %s5318_s11  ;;  %3440 = vrot.lane.b32.xlu0 %v7193_v60, %s5317_s21 }
 0x231   : > { %v7203_v46 = vpop.permute.xlu1 %2369 }
 0x232   : > { %v7205_v47 = vpop.permute.xlu0 %2367 }
 0x233   : > { %3568 = vrot.lane.b32.xlu1 %v7113_v6, %s5318_s11  ;;  %2597 = vrot.lane.b32.xlu0 %v8372_v17, %s5318_s11  ;;  %v7274_v17 = vld [vmem:[%s5363_s19 + $0xc9] sm:$0xff] }
 0x235   : > { %v7211_v36 = vpop.permute.xlu1 %2373 }
 0x236   : > { %v7216_v10 = vpop.permute.xlu0 %2371 }
 0x237   : > { %2471 = vrot.lane.b32.xlu1 %v7162_v30, %s5317_s21  ;;  %3314 = vrot.lane.b32.xlu0 %v7214_v39, %s5316_s20 }
 0x239   : > { %v7225_v41 = vpop.permute.xlu1 %2377 }
 0x23a   : > { %v7230_v0 = vpop.permute.xlu0 %2375 }
 0x23b   : > { %3442 = vrot.lane.b32.xlu1 %v7223_v50, %s5317_s21  ;;  %3316 = vrot.lane.b32.xlu0 %v7228_v33, %s5316_s20 }
 0x23d   : > { %v7236_v43 = vpop.permute.xlu1 %2381 }
 0x23e   : > { %v7238_v18 = vpop.permute.xlu0 %2379 }
 0x23f   : > { %2599 = vrot.lane.b32.xlu1 %v8373_v24, %s5318_s11  ;;  %2473 = vrot.lane.b32.xlu0 %v7176_v15, %s5317_s21 }
 0x241   : > { %v7247_v62 = vpop.permute.xlu1 %2385 }
 0x242   : > { %8374 = vst [vmem:[#allocation19_spill] sm:$0xff] %v7247_v62  ;;  %v7249_v29 = vpop.permute.xlu0 %2383 }
 0x243   : > { %3570 = vrot.lane.b32.xlu1 %v7162_v30, %s5318_s11  ;;  %3444 = vrot.lane.b32.xlu0 %v7245_v58, %s5317_s21 }
 0x245   : > { %v3295_v11 = vpop.permute.xlu1 %3294 }
 0x246   : > { %v2452_v16 = vpop.permute.xlu0 %2451  ;;  %v3646_v21 = vsel %vm724_vm0, %v6914_v52, %v3295_v11  ;;  %v5289_v52 = vld [vmem:[%s5363_s19 + $0x39] sm:$0xff] }
 0x247   : > { %3572 = vrot.lane.b32.xlu1 %v7176_v15, %s5318_s11  ;;  %2601 = vrot.lane.b32.xlu0 %v4549_v19, %s5318_s11  ;;  %v2707_v25 = vsel %vm757_vm1, %v2675_v53, %v2452_v16  ;;  %v4550_v16 = vld [vmem:[%s5363_s19 + $0xa8] sm:$0xff]  ;;  %v2676_v11 = vsel %vm724_vm0, %v5289_v52, %v7077_v20  ;;  %v7315_v52 = vld [vmem:[%s5363_s19 + $0xd9] sm:$0xff] }
 0x249   : > { %v3423_v31 = vpop.permute.xlu1 %3422 }
 0x24a   : > { %v3297_v34 = vpop.permute.xlu0 %3296  ;;  %v3678_v13 = vsel %vm757_vm1, %v3646_v21, %v3423_v31  ;;  %v7298_v21 = vld [vmem:[%s5363_s19 + $0xb2] sm:$0xff] }
 0x24b   : > { %2475 = vrot.lane.b32.xlu1 %v7214_v39, %s5317_s21  ;;  %3318 = vrot.lane.b32.xlu0 %v7261_v12, %s5316_s20 }
 0x24d   : > { %v2580_v63 = vpop.permute.xlu1 %2579 }
 0x24e   : > { %v2739_v24 = vsel %vm790_vm2, %v2707_v25, %v2580_v63  ;;  %v2454_v19 = vpop.permute.xlu0 %2453  ;;  %v3647_v63 = vsel %vm724_vm0, %v6961_v45, %v3297_v34 }
 0x24f   : > { %3446 = vrot.lane.b32.xlu1 %v7270_v61, %s5317_s21  ;;  %3320 = vrot.lane.b32.xlu0 %v7274_v17, %s5316_s20 }
 0x250   : > { %5149 = vmatprep.mubr.msk.f32.mxu0 %vm837_vm3, %v2739_v24 }
 0x251   : > { %v3551_v53 = vpop.permute.xlu1 %3550 }
 0x252   : > { %v3710_v62 = vsel %vm790_vm2, %v3678_v13, %v3551_v53  ;;  %v3425_v25 = vpop.permute.xlu0 %3424  ;;  %v4551_v13 = vld [vmem:[%s5363_s19 + $0xb0] sm:$0xff] }
 0x253   : > { %2603 = vrot.lane.b32.xlu1 %v4550_v16, %s5318_s11  ;;  %5213 = vmatprep.mubr.msk.f32.mxu1 %vm837_vm3, %v3710_v62  ;;  %v3679_v31 = vsel %vm757_vm1, %v3647_v63, %v3425_v25  ;;  %v2708_v16 = vsel %vm757_vm1, %v2676_v11, %v2454_v19  ;;  %v4444_v53 = vld [vmem:[%s5363_s19 + $0x49] sm:$0xff] }
 0x254   : > { %2477 = vrot.lane.b32.xlu0 %v7228_v33, %s5317_s21  ;;  %v2677_v11 = vsel %vm724_vm0, %v4444_v53, %v7095_v40 }
 0x255   : > { %v3553_v24 = vpop.permute.xlu1 %3552 }
 0x256   : > { %v3711_v62 = vsel %vm790_vm2, %v3679_v31, %v3553_v24  ;;  %v2582_v45 = vpop.permute.xlu0 %2581  ;;  %v7324_v31 = vld [vmem:[%s5363_s19 + $0xc2] sm:$0xff] }
 0x257   : > { %v2740_v34 = vsel %vm790_vm2, %v2708_v16, %v2582_v45  ;;  %3574 = vrot.lane.b32.xlu1 %v7214_v39, %s5318_s11  ;;  %5214 = vmatmul.mubr.msk.f32.vlgmr.msra.gmra.mxu1 %vm837_vm3, %v3711_v62 }
 0x258   : > { %3448 = vrot.lane.b32.xlu0 %v7298_v21, %s5317_s21  ;;  %5150 = vmatmul.mubr.msk.f32.vlgmr.msra.gmra.mxu0 %vm837_vm3, %v2740_v34  ;;  %v7329_v34 = vld [vmem:[%s5363_s19 + $0xe1] sm:$0xff] }
 0x259   : > { %v2456_v20 = vpop.permute.xlu1 %2455 }
 0x25a   : > { %v3299_v19 = vpop.permute.xlu0 %3298  ;;  %v2709_v24 = vsel %vm757_vm1, %v2677_v11, %v2456_v20 }
 0x25b   : > { %3576 = vrot.lane.b32.xlu1 %v7228_v33, %s5318_s11  ;;  %v3648_v40 = vsel %vm724_vm0, %v7030_v5, %v3299_v19  ;;  %v2678_v5 = vsel %vm724_vm0, %v7090_v27, %v7092_v23  ;;  %v4553_v23 = vld [vmem:[%s5363_s19 + $0xc8] sm:$0xff] }
 0x25c   : > { %2605 = vrot.lane.b32.xlu0 %v4551_v13, %s5318_s11  ;;  %v4552_v13 = vld [vmem:[%s5363_s19 + $0xc0] sm:$0xff] }
 0x25d   : > { %v3427_v25 = vpop.permute.xlu1 %3426 }
 0x25e   : > { %v3301_v63 = vpop.permute.xlu0 %3300  ;;  %v3680_v20 = vsel %vm757_vm1, %v3648_v40, %v3427_v25 }
 0x25f   : > { %2479 = vrot.lane.b32.xlu1 %v7261_v12, %s5317_s21 }
 0x260   : > { %3322 = vrot.lane.b32.xlu0 %v7315_v52, %s5316_s20 }
 0x261   : > { %v2584_v16 = vpop.permute.xlu1 %2583 }
 0x262   : > { %v2741_v62 = vsel %vm790_vm2, %v2709_v24, %v2584_v16  ;;  %v2458_v45 = vpop.permute.xlu0 %2457  ;;  %v3649_v16 = vsel %vm724_vm0, %v7074_v22, %v3301_v63 }
 0x263   : > { %3450 = vrot.lane.b32.xlu1 %v7324_v31, %s5317_s21  ;;  %5152 = vmatprep.mubr.msk.f32.mxu0 %vm837_vm3, %v2741_v62  ;;  %v7352_v62 = vld [vmem:[%s5363_s19 + $0xca] sm:$0xff]  ;;  %v2710_v40 = vsel %vm757_vm1, %v2678_v5, %v2458_v45 }
 0x264   : > { %3324 = vrot.lane.b32.xlu0 %v7329_v34, %s5316_s20 }
 0x265   : > { %v3555_v53 = vpop.permute.xlu1 %3554 }
 0x266   : > { %v3712_v11 = vsel %vm790_vm2, %v3680_v20, %v3555_v53  ;;  %v3429_v24 = vpop.permute.xlu0 %3428 }
 0x267   : > { %2607 = vrot.lane.b32.xlu1 %v4552_v13, %s5318_s11  ;;  %5216 = vmatprep.mubr.msk.f32.mxu1 %vm837_vm3, %v3712_v11  ;;  %v3681_v19 = vsel %vm757_vm1, %v3649_v16, %v3429_v24  ;;  %v7368_v11 = vld [vmem:[%s5363_s19 + $0xf1] sm:$0xff]  ;;  %v2679_v24 = vsel %vm724_vm0, %v7102_v48, %v7106_v44  ;;  %v7378_v16 = vld [vmem:[%s5363_s19 + $0xda] sm:$0xff] }
 0x268   : > { %2481 = vrot.lane.b32.xlu0 %v7274_v17, %s5317_s21  ;;  %v4554_v44 = vld [vmem:[%s5363_s19 + $0xd8] sm:$0xff] }
 0x269   : > { %v3557_v25 = vpop.permute.xlu1 %3556 }
 0x26a   : > { %v3713_v13 = vsel %vm790_vm2, %v3681_v19, %v3557_v25  ;;  %v2586_v20 = vpop.permute.xlu0 %2585 }
 0x26b   : > { %v2742_v22 = vsel %vm790_vm2, %v2710_v40, %v2586_v20  ;;  %3578 = vrot.lane.b32.xlu1 %v7261_v12, %s5318_s11  ;;  %5217 = vmatmul.mubr.msk.f32.gmra.mxu1 %vm837_vm3, %v3713_v13  ;;  %v7383_v13 = vld [vmem:[%s5363_s19 + $0xf9] sm:$0xff] }
 0x26c   : > { %3452 = vrot.lane.b32.xlu0 %v7352_v62, %s5317_s21  ;;  %5153 = vmatmul.mubr.msk.f32.gmra.mxu0 %vm837_vm3, %v2742_v22 }
 0x26d   : > { %v2460_v27 = vpop.permute.xlu1 %2459 }
 0x26e   : > { %v3303_v63 = vpop.permute.xlu0 %3302  ;;  %v2711_v5 = vsel %vm757_vm1, %v2679_v24, %v2460_v27 }
 0x26f   : > { %3580 = vrot.lane.b32.xlu1 %v7274_v17, %s5318_s11  ;;  %v3650_v48 = vsel %vm724_vm0, %v7116_v3, %v3303_v63  ;;  %v2680_v3 = vsel %vm724_vm0, %v7129_v2, %v7104_v51  ;;  %v4555_v2 = vld [vmem:[%s5363_s19 + $0xe0] sm:$0xff] }
 0x270   : > { %2609 = vrot.lane.b32.xlu0 %v4553_v23, %s5318_s11 }
 0x271   : > { %v3431_v45 = vpop.permute.xlu1 %3430 }
 0x272   : > { %v3305_v53 = vpop.permute.xlu0 %3304  ;;  %v3682_v20 = vsel %vm757_vm1, %v3650_v48, %v3431_v45 }
 0x273   : > { %2483 = vrot.lane.b32.xlu1 %v7315_v52, %s5317_s21  ;;  %v3651_v24 = vsel %vm724_vm0, %v7138_v54, %v3305_v53 }
 0x274   : > { %3326 = vrot.lane.b32.xlu0 %v7368_v11, %s5316_s20 }
 0x275   : > { %v2588_v19 = vpop.permute.xlu1 %2587 }
 0x276   : > { %v2743_v25 = vsel %vm790_vm2, %v2711_v5, %v2588_v19  ;;  %v2462_v40 = vpop.permute.xlu0 %2461  ;;  %v7406_v5 = vld [vmem:[%s5363_s19 + $0xe2] sm:$0xff] }
 0x277   : > { %3454 = vrot.lane.b32.xlu1 %v7378_v16, %s5317_s21  ;;  %5155 = vmatprep.mubr.msk.f32.mxu0 %vm837_vm3, %v2743_v25  ;;  %v2712_v19 = vsel %vm757_vm1, %v2680_v3, %v2462_v40 }
 0x278   : > { %3328 = vrot.lane.b32.xlu0 %v7383_v13, %s5316_s20 }
 0x279   : > { %v3559_v22 = vpop.permute.xlu1 %3558 }
 0x27a   : > { %v3714_v27 = vsel %vm790_vm2, %v3682_v20, %v3559_v22  ;;  %v3433_v23 = vpop.permute.xlu0 %3432  ;;  %v7422_v20 = vld [vmem:[%s5363_s19 + $0x109] sm:$0xff]  ;;  %v2681_v22 = vsel %vm724_vm0, %v7159_v55, %v7120_v14 }
 0x27b   : > { %2611 = vrot.lane.b32.xlu1 %v4554_v44, %s5318_s11  ;;  %5219 = vmatprep.mubr.msk.f32.mxu1 %vm837_vm3, %v3714_v27  ;;  %v3683_v63 = vsel %vm757_vm1, %v3651_v24, %v3433_v23  ;;  %v7432_v27 = vld [vmem:[%s5363_s19 + $0xf2] sm:$0xff] }
 0x27c   : > { %2485 = vrot.lane.b32.xlu0 %v7329_v34, %s5317_s21 }
 0x27d   : > { %v3561_v45 = vpop.permute.xlu1 %3560 }
 0x27e   : > { %v3715_v25 = vsel %vm790_vm2, %v3683_v63, %v3561_v45  ;;  %v2590_v48 = vpop.permute.xlu0 %2589  ;;  %v7438_v63 = vld [vmem:[%s8135_s2] ss:$0 sm:$0xff] }
 0x27f   : > { %v2744_v54 = vsel %vm790_vm2, %v2712_v19, %v2590_v48  ;;  %3582 = vrot.lane.b32.xlu1 %v7315_v52, %s5318_s11  ;;  %5220 = vmatmul.mubr.msk.f32.gmra.mxu1 %vm837_vm3, %v3715_v25  ;;  %v7443_v19 = vld [vmem:[%s5363_s19 + $0x111] sm:$0xff] }
 0x280   : > { %3456 = vrot.lane.b32.xlu0 %v7406_v5, %s5317_s21  ;;  %5156 = vmatmul.mubr.msk.f32.gmra.mxu0 %vm837_vm3, %v2744_v54 }
 0x281   : > { %v2464_v51 = vpop.permute.xlu1 %2463 }
 0x282   : > { %v3307_v53 = vpop.permute.xlu0 %3306  ;;  %v2713_v23 = vsel %vm757_vm1, %v2681_v22, %v2464_v51  ;;  %v4556_v51 = vld [vmem:[%s5363_s19 + $0xf0] sm:$0xff] }
 0x283   : > { %3584 = vrot.lane.b32.xlu1 %v7329_v34, %s5318_s11  ;;  %v3652_v48 = vsel %vm724_vm0, %v7171_v37, %v3307_v53 }
 0x284   : > { %2613 = vrot.lane.b32.xlu0 %v4555_v2, %s5318_s11 }
 0x285   : > { %v3435_v40 = vpop.permute.xlu1 %3434 }
 0x286   : > { %v3309_v44 = vpop.permute.xlu0 %3308  ;;  %v3684_v2 = vsel %vm757_vm1, %v3652_v48, %v3435_v40 }
 0x287   : > { %2487 = vrot.lane.b32.xlu1 %v7368_v11, %s5317_s21 }
 0x288   : > { %3330 = vrot.lane.b32.xlu0 %v7422_v20, %s5316_s20 }
 0x289   : > { %v5087_v24 = vpop.f32.mrf.mxu1  ;;  %v2592_v3 = vpop.permute.xlu1 %2591 }
 0x28a   : > { %v1976_v45 = vadd.f32 %v7438_v63, %v5087_v24  ;;  %v2745_v14 = vsel %vm790_vm2, %v2713_v23, %v2592_v3  ;;  %v2466_v55 = vpop.permute.xlu0 %2465 }
 0x28b   : > { %v1970_v25 = vpop.f32.mrf.mxu1  ;;  %3458 = vrot.lane.b32.xlu1 %v7432_v27, %s5317_s21  ;;  %5158 = vmatprep.mubr.msk.f32.mxu0 %vm837_vm3, %v2745_v14  ;;  %v2682_v14 = vsel %vm724_vm0, %v7113_v6, %v7118_v57 }
 0x28c   : > { %4411 = vst [vmem:[%s6701_s24 + $0x18] sm:$0xff] %v1976_v45  ;;  %v1971_v54 = vadd.f32 %v7438_v63, %v1970_v25  ;;  %3332 = vrot.lane.b32.xlu0 %v7443_v19, %s5316_s20  ;;  %v3653_v45 = vsel %vm724_vm0, %v7193_v60, %v3309_v44  ;;  %v2714_v60 = vsel %vm757_vm1, %v2682_v14, %v2466_v55 }
 0x28d   : > { %v5090_v22 = vpop.f32.mrf.mxu1  ;;  %v3563_v23 = vpop.permute.xlu1 %3562 }
 0x28e   : > { %4410 = vst [vmem:[%s6701_s24 + $0x10] sm:$0xff] %v1971_v54  ;;  %v1986_v24 = vadd.f32 %v7438_v63, %v5090_v22  ;;  %v3716_v3 = vsel %vm790_vm2, %v3684_v2, %v3563_v23  ;;  %v3437_v37 = vpop.permute.xlu0 %3436 }
 0x28f   : > { %v1980_v53 = vpop.f32.mrf.mxu1  ;;  %2615 = vrot.lane.b32.xlu1 %v4556_v51, %s5318_s11  ;;  %5222 = vmatprep.mubr.msk.f32.mxu1 %vm837_vm3, %v3716_v3  ;;  %v3685_v25 = vsel %vm757_vm1, %v3653_v45, %v3437_v37  ;;  %v7472_v51 = vld [vmem:[%s5363_s19 + $0xfa] sm:$0xff] }
 0x290   : > { %4413 = vst [vmem:[%s6701_s24 + $0x58] sm:$0xff] %v1986_v24  ;;  %v1981_v40 = vadd.f32 %v7438_v63, %v1980_v53  ;;  %2489 = vrot.lane.b32.xlu0 %v7383_v13, %s5317_s21  ;;  %v4557_v3 = vld [vmem:[%s5363_s19 + $0xf8] sm:$0xff] }
 0x291   : > { %v5093_v48 = vpop.f32.mrf.mxu1  ;;  %v3565_v54 = vpop.permute.xlu1 %3564 }
 0x292   : > { %4412 = vst [vmem:[%s6701_s24 + $0x50] sm:$0xff] %v1981_v40  ;;  %v1996_v44 = vadd.f32 %v7438_v63, %v5093_v48  ;;  %v3717_v2 = vsel %vm790_vm2, %v3685_v25, %v3565_v54  ;;  %v2594_v22 = vpop.permute.xlu0 %2593 }
 0x293   : > { %v2746_v23 = vsel %vm790_vm2, %v2714_v60, %v2594_v22  ;;  %v1990_v6 = vpop.f32.mrf.mxu1  ;;  %3586 = vrot.lane.b32.xlu1 %v7368_v11, %s5318_s11  ;;  %5223 = vmatmul.mubr.msk.f32.gmra.mxu1 %vm837_vm3, %v3717_v2  ;;  %v7498_v60 = vld [vmem:[%s5363_s19 + $0x121] sm:$0xff]  ;;  %v2683_v2 = vsel %vm724_vm0, %v7162_v30, %v7131_v28 }
 0x294   : > { %4415 = vst [vmem:[%s6701_s24 + $0x98] sm:$0xff] %v1996_v44  ;;  %v1991_v57 = vadd.f32 %v7438_v63, %v1990_v6  ;;  %3460 = vrot.lane.b32.xlu0 %v7472_v51, %s5317_s21  ;;  %5159 = vmatmul.mubr.msk.f32.gmra.mxu0 %vm837_vm3, %v2746_v23  ;;  %v7510_v23 = vld [vmem:[%s5363_s19 + $0x10a] sm:$0xff] }
 0x295   : > { %v5096_v55 = vpop.f32.mrf.mxu1  ;;  %v2468_v24 = vpop.permute.xlu1 %2467 }
 0x296   : > { %4414 = vst [vmem:[%s6701_s24 + $0x90] sm:$0xff] %v1991_v57  ;;  %v2006_v37 = vadd.f32 %v7438_v63, %v5096_v55  ;;  %v3311_v53 = vpop.permute.xlu0 %3310  ;;  %v2715_v6 = vsel %vm757_vm1, %v2683_v2, %v2468_v24 }
 0x297   : > { %v2000_v45 = vpop.f32.mrf.mxu1  ;;  %3588 = vrot.lane.b32.xlu1 %v7383_v13, %s5318_s11  ;;  %v3654_v24 = vsel %vm724_vm0, %v7223_v50, %v3311_v53 }
 0x298   : > { %4417 = vst [vmem:[%s6701_s24 + $0xd8] sm:$0xff] %v2006_v37  ;;  %v2001_v40 = vadd.f32 %v7438_v63, %v2000_v45  ;;  %2617 = vrot.lane.b32.xlu0 %v4557_v3, %s5318_s11  ;;  %v7517_v37 = vld [vmem:[%s5363_s19 + $0x129] sm:$0xff] }
 0x299   : > { %v5099_v14 = vpop.f32.mrf.mxu1  ;;  %v3439_v25 = vpop.permute.xlu1 %3438 }
 0x29a   : > { %4416 = vst [vmem:[%s6701_s24 + $0xd0] sm:$0xff] %v2001_v40  ;;  %v2016_v48 = vadd.f32 %v7438_v63, %v5099_v14  ;;  %v3313_v54 = vpop.permute.xlu0 %3312  ;;  %v4558_v14 = vld [vmem:[%s5363_s19 + $0x108] sm:$0xff] }
 0x29b   : > { %v2010_v44 = vpop.f32.mrf.mxu1  ;;  %2491 = vrot.lane.b32.xlu1 %v7422_v20, %s5317_s21 }
 0x29c   : > { %4419 = vst [vmem:[%s6701_s24 + $0x118] sm:$0xff] %v2016_v48  ;;  %v2011_v22 = vadd.f32 %v7438_v63, %v2010_v44  ;;  %3334 = vrot.lane.b32.xlu0 %v7498_v60, %s5316_s20  ;;  %v3686_v48 = vsel %vm757_vm1, %v3654_v24, %v3439_v25  ;;  %v7546_v24 = vld [vmem:[%s5363_s19 + $0x112] sm:$0xff] }
 0x29d   : > { %v5102_v57 = vpop.f32.mrf.mxu1  ;;  %v2596_v55 = vpop.permute.xlu1 %2595 }
 0x29e   : > { %4418 = vst [vmem:[%s6701_s24 + $0x110] sm:$0xff] %v2011_v22  ;;  %v2026_v3 = vadd.f32 %v7438_v63, %v5102_v57  ;;  %v2747_v28 = vsel %vm790_vm2, %v2715_v6, %v2596_v55  ;;  %v2470_v30 = vpop.permute.xlu0 %2469  ;;  %v3655_v57 = vsel %vm724_vm0, %v7245_v58, %v3313_v54  ;;  %v2684_v55 = vsel %vm724_vm0, %v7176_v15, %v7126_v1 }
 0x29f   : > { %v2020_v45 = vpop.f32.mrf.mxu1  ;;  %3462 = vrot.lane.b32.xlu1 %v7510_v23, %s5317_s21  ;;  %5161 = vmatprep.mubr.msk.f32.mxu0 %vm837_vm3, %v2747_v28  ;;  %v2716_v58 = vsel %vm757_vm1, %v2684_v55, %v2470_v30 }
 0x2a0   : > { %4421 = vst [vmem:[%s6701_s24 + $0x158] sm:$0xff] %v2026_v3  ;;  %v2021_v40 = vadd.f32 %v7438_v63, %v2020_v45  ;;  %3336 = vrot.lane.b32.xlu0 %v7517_v37, %s5316_s20 }
 0x2a1   : > { %v5105_v44 = vpop.f32.mrf.mxu1  ;;  %v3567_v2 = vpop.permute.xlu1 %3566 }
 0x2a2   : > { %4420 = vst [vmem:[%s6701_s24 + $0x150] sm:$0xff] %v2021_v40  ;;  %v2036_v22 = vadd.f32 %v7438_v63, %v5105_v44  ;;  %v3718_v6 = vsel %vm790_vm2, %v3686_v48, %v3567_v2  ;;  %v3441_v50 = vpop.permute.xlu0 %3440  ;;  %v4559_v2 = vld [vmem:[%s5363_s19 + $0x110] sm:$0xff] }
 0x2a3   : > { %v2030_v53 = vpop.f32.mrf.mxu1  ;;  %2619 = vrot.lane.b32.xlu1 %v4558_v14, %s5318_s11  ;;  %5225 = vmatprep.mubr.msk.f32.mxu1 %vm837_vm3, %v3718_v6  ;;  %v3687_v3 = vsel %vm757_vm1, %v3655_v57, %v3441_v50 }
 0x2a4   : > { %4423 = vst [vmem:[%s6701_s24 + $0x198] sm:$0xff] %v2036_v22  ;;  %v2031_v25 = vadd.f32 %v7438_v63, %v2030_v53  ;;  %2493 = vrot.lane.b32.xlu0 %v7443_v19, %s5317_s21 }
 0x2a5   : > { %v5108_v28 = vpop.f32.mrf.mxu1  ;;  %v3569_v45 = vpop.permute.xlu1 %3568 }
 0x2a6   : > { %4422 = vst [vmem:[%s6701_s24 + $0x190] sm:$0xff] %v2031_v25  ;;  %v2046_v54 = vadd.f32 %v7438_v63, %v5108_v28  ;;  %v3719_v40 = vsel %vm790_vm2, %v3687_v3, %v3569_v45  ;;  %v2598_v14 = vpop.permute.xlu0 %2597  ;;  %v7572_v28 = vld [vmem:[%s5363_s19 + $0x139] sm:$0xff] }
 0x2a7   : > { %v2748_v48 = vsel %vm790_vm2, %v2716_v58, %v2598_v14  ;;  %v2040_v1 = vpop.f32.mrf.mxu1  ;;  %3590 = vrot.lane.b32.xlu1 %v7422_v20, %s5318_s11  ;;  %5226 = vmatmul.mubr.msk.f32.gmra.mxu1 %vm837_vm3, %v3719_v40  ;;  %v2685_v58 = vsel %vm724_vm0, %v7214_v39, %v7142_v7  ;;  %v7584_v40 = vld [vmem:[%s5363_s19 + $0x122] sm:$0xff] }
 0x2a8   : > { %4425 = vst [vmem:[%s6701_s24 + $0x1d8] sm:$0xff] %v2046_v54  ;;  %v2041_v15 = vadd.f32 %v7438_v63, %v2040_v1  ;;  %3464 = vrot.lane.b32.xlu0 %v7546_v24, %s5317_s21  ;;  %5162 = vmatmul.mubr.msk.f32.gmra.mxu0 %vm837_vm3, %v2748_v48 }
 0x2a9   : > { %v5111_v30 = vpop.f32.mrf.mxu1  ;;  %v2472_v44 = vpop.permute.xlu1 %2471 }
 0x2aa   : > { %4424 = vst [vmem:[%s6701_s24 + $0x1d0] sm:$0xff] %v2041_v15  ;;  %v2056_v22 = vadd.f32 %v7438_v63, %v5111_v30  ;;  %v3315_v6 = vpop.permute.xlu0 %3314  ;;  %v2717_v14 = vsel %vm757_vm1, %v2685_v58, %v2472_v44  ;;  %v7591_v30 = vld [vmem:[%s5363_s19 + $0x141] sm:$0xff] }
 0x2ab   : > { %v2050_v50 = vpop.f32.mrf.mxu1  ;;  %3592 = vrot.lane.b32.xlu1 %v7443_v19, %s5318_s11  ;;  %v3656_v44 = vsel %vm724_vm0, %v7270_v61, %v3315_v6 }
 0x2ac   : > { %4427 = vst [vmem:[%s6701_s24 + $0x218] sm:$0xff] %v2056_v22  ;;  %v2051_v53 = vadd.f32 %v7438_v63, %v2050_v50  ;;  %2621 = vrot.lane.b32.xlu0 %v4559_v2, %s5318_s11  ;;  %v4560_v50 = vld [vmem:[%s5363_s19 + $0x120] sm:$0xff] }
 0x2ad   : > { %v5114_v57 = vpop.f32.mrf.mxu1  ;;  %v3443_v25 = vpop.permute.xlu1 %3442 }
 0x2ae   : > { %4426 = vst [vmem:[%s6701_s24 + $0x210] sm:$0xff] %v2051_v53  ;;  %v2066_v55 = vadd.f32 %v7438_v63, %v5114_v57  ;;  %v3317_v3 = vpop.permute.xlu0 %3316  ;;  %v3688_v53 = vsel %vm757_vm1, %v3656_v44, %v3443_v25 }
 0x2af   : > { %v2060_v45 = vpop.f32.mrf.mxu1  ;;  %2495 = vrot.lane.b32.xlu1 %v7498_v60, %s5317_s21 }
 0x2b0   : > { %4429 = vst [vmem:[%s6701_s24 + $0x258] sm:$0xff] %v2066_v55  ;;  %v2061_v54 = vadd.f32 %v7438_v63, %v2060_v45  ;;  %3338 = vrot.lane.b32.xlu0 %v7572_v28, %s5316_s20 }
 0x2b1   : > { %v5117_v48 = vpop.f32.mrf.mxu1  ;;  %v2600_v1 = vpop.permute.xlu1 %2599 }
 0x2b2   : > { %4428 = vst [vmem:[%s6701_s24 + $0x250] sm:$0xff] %v2061_v54  ;;  %v2076_v15 = vadd.f32 %v7438_v63, %v5117_v48  ;;  %v2749_v7 = vsel %vm790_vm2, %v2717_v14, %v2600_v1  ;;  %v2474_v39 = vpop.permute.xlu0 %2473  ;;  %v3657_v54 = vsel %vm724_vm0, %v7298_v21, %v3317_v3  ;;  %v2686_v14 = vsel %vm724_vm0, %v7228_v33, %v7140_v42 }
 0x2b3   : > { %v2070_v2 = vpop.f32.mrf.mxu1  ;;  %3466 = vrot.lane.b32.xlu1 %v7584_v40, %s5317_s21  ;;  %5164 = vmatprep.mubr.msk.f32.mxu0 %vm837_vm3, %v2749_v7  ;;  %v7620_v7 = vld [vmem:[%s5363_s19 + $0x12a] sm:$0xff]  ;;  %v2718_v21 = vsel %vm757_vm1, %v2686_v14, %v2474_v39 }
 0x2b4   : > { %4431 = vst [vmem:[%s6701_s24 + $0x298] sm:$0xff] %v2076_v15  ;;  %v2071_v22 = vadd.f32 %v7438_v63, %v2070_v2  ;;  %3340 = vrot.lane.b32.xlu0 %v7591_v30, %s5316_s20  ;;  %v7646_v14 = vld [vmem:[%s5363_s19 + $0x151] sm:$0xff] }
 0x2b5   : > { %v5120_v57 = vpop.f32.mrf.mxu1  ;;  %v3571_v55 = vpop.permute.xlu1 %3570 }
 0x2b6   : > { %4430 = vst [vmem:[%s6701_s24 + $0x290] sm:$0xff] %v2071_v22  ;;  %v2086_v45 = vadd.f32 %v7438_v63, %v5120_v57  ;;  %v3720_v58 = vsel %vm790_vm2, %v3688_v53, %v3571_v55  ;;  %v3445_v61 = vpop.permute.xlu0 %3444  ;;  %v4561_v53 = vld [vmem:[%s5363_s19 + $0x128] sm:$0xff] }
 0x2b7   : > { %v2080_v6 = vpop.f32.mrf.mxu1  ;;  %2623 = vrot.lane.b32.xlu1 %v4560_v50, %s5318_s11  ;;  %5228 = vmatprep.mubr.msk.f32.mxu1 %vm837_vm3, %v3720_v58  ;;  %v3689_v48 = vsel %vm757_vm1, %v3657_v54, %v3445_v61 }
 0x2b8   : > { %4433 = vst [vmem:[%s6701_s24 + $0x2d8] sm:$0xff] %v2086_v45  ;;  %v2081_v25 = vadd.f32 %v7438_v63, %v2080_v6  ;;  %2497 = vrot.lane.b32.xlu0 %v7517_v37, %s5317_s21 }
 0x2b9   : > { %v5123_v1 = vpop.f32.mrf.mxu1  ;;  %v3573_v15 = vpop.permute.xlu1 %3572 }
 0x2ba   : > { %4432 = vst [vmem:[%s6701_s24 + $0x2d0] sm:$0xff] %v2081_v25  ;;  %v2096_v3 = vadd.f32 %v7438_v63, %v5123_v1  ;;  %v3721_v2 = vsel %vm790_vm2, %v3689_v48, %v3573_v15  ;;  %v2602_v44 = vpop.permute.xlu0 %2601  ;;  %v2687_v1 = vsel %vm724_vm0, %v7261_v12, %v7150_v4 }
 0x2bb   : > { %v2750_v22 = vsel %vm790_vm2, %v2718_v21, %v2602_v44  ;;  %v2090_v42 = vpop.f32.mrf.mxu1  ;;  %3594 = vrot.lane.b32.xlu1 %v7498_v60, %s5318_s11  ;;  %5229 = vmatmul.mubr.msk.f32.gmra.mxu1 %vm837_vm3, %v3721_v2  ;;  %v7658_v21 = vld [vmem:[%s5363_s19 + $0x13a] sm:$0xff] }
 0x2bc   : > { %4435 = vst [vmem:[%s6701_s24 + $0x318] sm:$0xff] %v2096_v3  ;;  %v2091_v33 = vadd.f32 %v7438_v63, %v2090_v42  ;;  %3468 = vrot.lane.b32.xlu0 %v7620_v7, %s5317_s21  ;;  %5165 = vmatmul.mubr.msk.f32.gmra.mxu0 %vm837_vm3, %v2750_v22  ;;  %v7665_v42 = vld [vmem:[%s5363_s19 + $0x159] sm:$0xff] }
 0x2bd   : > { %v5126_v39 = vpop.f32.mrf.mxu1  ;;  %v2476_v50 = vpop.permute.xlu1 %2475 }
 0x2be   : > { %4434 = vst [vmem:[%s6701_s24 + $0x310] sm:$0xff] %v2091_v33  ;;  %v2106_v57 = vadd.f32 %v7438_v63, %v5126_v39  ;;  %v3319_v55 = vpop.permute.xlu0 %3318  ;;  %v2719_v3 = vsel %vm757_vm1, %v2687_v1, %v2476_v50 }
 0x2bf   : > { %v2100_v45 = vpop.f32.mrf.mxu1  ;;  %3596 = vrot.lane.b32.xlu1 %v7517_v37, %s5318_s11  ;;  %v3658_v39 = vsel %vm724_vm0, %v7324_v31, %v3319_v55  ;;  %v2688_v55 = vsel %vm724_vm0, %v7274_v17, %v7148_v49  ;;  %v4763_v49 = vld [vmem:[%s5363_s19 + $0x141] sm:$0xff] }
 0x2c0   : > { %4437 = vst [vmem:[%s6701_s24 + $0x358] sm:$0xff] %v2106_v57  ;;  %v2101_v58 = vadd.f32 %v7438_v63, %v2100_v45  ;;  %2625 = vrot.lane.b32.xlu0 %v4561_v53, %s5318_s11  ;;  %v4562_v53 = vld [vmem:[%s5363_s19 + $0x138] sm:$0xff] }
 0x2c1   : > { %v5129_v61 = vpop.f32.mrf.mxu1  ;;  %v3447_v6 = vpop.permute.xlu1 %3446 }
 0x2c2   : > { %4436 = vst [vmem:[%s6701_s24 + $0x350] sm:$0xff] %v2101_v58  ;;  %v2116_v54 = vadd.f32 %v7438_v63, %v5129_v61  ;;  %v3321_v25 = vpop.permute.xlu0 %3320  ;;  %v3690_v57 = vsel %vm757_vm1, %v3658_v39, %v3447_v6  ;;  %v7717_v39 = vld [vmem:[%s5363_s19 + $0x152] sm:$0xff] }
 0x2c3   : > { %v2110_v48 = vpop.f32.mrf.mxu1  ;;  %2499 = vrot.lane.b32.xlu1 %v7572_v28, %s5317_s21  ;;  %v3659_v31 = vsel %vm724_vm0, %v7352_v62, %v3321_v25 }
 0x2c4   : > { %4439 = vst [vmem:[%s6701_s24 + $0x398] sm:$0xff] %v2116_v54  ;;  %v2111_v15 = vadd.f32 %v7438_v63, %v2110_v48  ;;  %3342 = vrot.lane.b32.xlu0 %v7646_v14, %s5316_s20  ;;  %v7691_v48 = vld [vmem:[%s5363_s19 + $0x142] sm:$0xff] }
 0x2c5   : > { %v5132_v2 = vpop.f32.mrf.mxu1  ;;  %v2604_v44 = vpop.permute.xlu1 %2603 }
 0x2c6   : > { %4438 = vst [vmem:[%s6701_s24 + $0x390] sm:$0xff] %v2111_v15  ;;  %v2126_v22 = vadd.f32 %v7438_v63, %v5132_v2  ;;  %v2751_v4 = vsel %vm790_vm2, %v2719_v3, %v2604_v44  ;;  %v2478_v12 = vpop.permute.xlu0 %2477  ;;  %v4563_v3 = vld [vmem:[%s5363_s19 + $0x140] sm:$0xff]  ;;  %v4532_v44 = vld [vmem:[%s5363_s19 + $0x151] sm:$0xff] }
 0x2c7   : > { %v2120_v33 = vpop.f32.mrf.mxu1  ;;  %3470 = vrot.lane.b32.xlu1 %v7658_v21, %s5317_s21  ;;  %5167 = vmatprep.mubr.msk.f32.mxu0 %vm837_vm3, %v2751_v4  ;;  %v2720_v1 = vsel %vm757_vm1, %v2688_v55, %v2478_v12  ;;  %v7708_v12 = vld [vmem:[%s5363_s19 + $0x169] sm:$0xff]  ;;  %v4533_v55 = vld [vmem:[%s5363_s19 + $0x159] sm:$0xff] }
 0x2c8   : > { %4441 = vst [vmem:[%s6701_s24 + $0x3d8] sm:$0xff] %v2126_v22  ;;  %v2121_v50 = vadd.f32 %v7438_v63, %v2120_v33  ;;  %3344 = vrot.lane.b32.xlu0 %v7665_v42, %s5316_s20  ;;  %v2689_v33 = vsel %vm724_vm0, %v7315_v52, %v7164_v8  ;;  %v4564_v52 = vld [vmem:[%s5363_s19 + $0x150] sm:$0xff] }
 0x2c9   : > { %v3575_v45 = vpop.permute.xlu1 %3574 }
 0x2ca   : > { %4440 = vst [vmem:[%s6701_s24 + $0x3d0] sm:$0xff] %v2121_v50  ;;  %v3722_v58 = vsel %vm790_vm2, %v3690_v57, %v3575_v45  ;;  %v3449_v61 = vpop.permute.xlu0 %3448  ;;  %v7721_v57 = vld [vmem:[%s5363_s19 + $0x171] sm:$0xff] }
 0x2cb   : > { %2627 = vrot.lane.b32.xlu1 %v4562_v53, %s5318_s11  ;;  %5231 = vmatprep.mubr.msk.f32.mxu1 %vm837_vm3, %v3722_v58  ;;  %v3691_v6 = vsel %vm757_vm1, %v3659_v31, %v3449_v61 }
 0x2cc   : > { %2501 = vrot.lane.b32.xlu0 %v7591_v30, %s5317_s21 }
 0x2cd   : > { %v3577_v54 = vpop.permute.xlu1 %3576 }
 0x2ce   : > { %v3723_v15 = vsel %vm790_vm2, %v3691_v6, %v3577_v54  ;;  %v2606_v62 = vpop.permute.xlu0 %2605 }
 0x2cf   : > { %v2752_v25 = vsel %vm790_vm2, %v2720_v1, %v2606_v62  ;;  %3598 = vrot.lane.b32.xlu1 %v7572_v28, %s5318_s11  ;;  %5232 = vmatmul.mubr.msk.f32.gmra.mxu1 %vm837_vm3, %v3723_v15 }
 0x2d0   : > { %3472 = vrot.lane.b32.xlu0 %v7691_v48, %s5317_s21  ;;  %5168 = vmatmul.mubr.msk.f32.gmra.mxu0 %vm837_vm3, %v2752_v25  ;;  %v7745_v25 = vld [vmem:[%s5363_s19 + $0x15a] sm:$0xff] }
 0x2d1   : > { %v2480_v17 = vpop.permute.xlu1 %2479 }
 0x2d2   : > { %v3323_v2 = vpop.permute.xlu0 %3322  ;;  %v2721_v50 = vsel %vm757_vm1, %v2689_v33, %v2480_v17 }
 0x2d3   : > { %3600 = vrot.lane.b32.xlu1 %v4763_v49, %s5318_s11  ;;  %v3660_v8 = vsel %vm724_vm0, %v7378_v16, %v3323_v2  ;;  %v2690_v16 = vsel %vm724_vm0, %v7329_v34, %v7156_v56  ;;  %v4565_v34 = vld [vmem:[%s5363_s19 + $0x158] sm:$0xff] }
 0x2d4   : > { %2629 = vrot.lane.b32.xlu0 %v4563_v3, %s5318_s11 }
 0x2d5   : > { %v3451_v22 = vpop.permute.xlu1 %3450 }
 0x2d6   : > { %v3325_v4 = vpop.permute.xlu0 %3324  ;;  %v3692_v61 = vsel %vm757_vm1, %v3660_v8, %v3451_v22  ;;  %v4534_v22 = vld [vmem:[%s5363_s19 + $0x169] sm:$0xff] }
 0x2d7   : > { %2503 = vrot.lane.b32.xlu1 %v4532_v44, %s5317_s21  ;;  %v3661_v1 = vsel %vm724_vm0, %v7406_v5, %v3325_v4  ;;  %v7773_v8 = vld [vmem:[%s5363_s19 + $0x189] sm:$0xff] }
 0x2d8   : > { %3346 = vrot.lane.b32.xlu0 %v7708_v12, %s5316_s20 }
 0x2d9   : > { %v2608_v53 = vpop.permute.xlu1 %2607 }
 0x2da   : > { %v2753_v45 = vsel %vm790_vm2, %v2721_v50, %v2608_v53  ;;  %v2482_v58 = vpop.permute.xlu0 %2481  ;;  %v2691_v50 = vsel %vm724_vm0, %v7368_v11, %v7178_v32  ;;  %v7769_v53 = vld [vmem:[%s5363_s19 + $0x16a] sm:$0xff] }
 0x2db   : > { %3474 = vrot.lane.b32.xlu1 %v7717_v39, %s5317_s21  ;;  %5170 = vmatprep.mubr.msk.f32.mxu0 %vm837_vm3, %v2753_v45  ;;  %v2722_v49 = vsel %vm757_vm1, %v2690_v16, %v2482_v58  ;;  %v4566_v11 = vld [vmem:[%s5363_s19 + $0x168] sm:$0xff] }
 0x2dc   : > { %3348 = vrot.lane.b32.xlu0 %v7721_v57, %s5316_s20 }
 0x2dd   : > { %v3579_v31 = vpop.permute.xlu1 %3578 }
 0x2de   : > { %v3724_v6 = vsel %vm790_vm2, %v3692_v61, %v3579_v31  ;;  %v3453_v54 = vpop.permute.xlu0 %3452 }
 0x2df   : > { %2631 = vrot.lane.b32.xlu1 %v4564_v52, %s5318_s11  ;;  %5234 = vmatprep.mubr.msk.f32.mxu1 %vm837_vm3, %v3724_v6  ;;  %v3693_v15 = vsel %vm757_vm1, %v3661_v1, %v3453_v54 }
 0x2e0   : > { %2505 = vrot.lane.b32.xlu0 %v4533_v55, %s5317_s21 }
 0x2e1   : > { %v3581_v62 = vpop.permute.xlu1 %3580 }
 0x2e2   : > { %v3725_v17 = vsel %vm790_vm2, %v3693_v15, %v3581_v62  ;;  %v2610_v3 = vpop.permute.xlu0 %2609  ;;  %v7797_v62 = vld [vmem:[%s5363_s19 + $0x172] sm:$0xff] }
 0x2e3   : > { %v2754_v5 = vsel %vm790_vm2, %v2722_v49, %v2610_v3  ;;  %3602 = vrot.lane.b32.xlu1 %v4532_v44, %s5318_s11  ;;  %5235 = vmatmul.mubr.msk.f32.gmra.mxu1 %vm837_vm3, %v3725_v17  ;;  %v7760_v44 = vld [vmem:[%s5363_s19 + $0x181] sm:$0xff] }
 0x2e4   : > { %3476 = vrot.lane.b32.xlu0 %v7745_v25, %s5317_s21  ;;  %5171 = vmatmul.mubr.msk.f32.gmra.mxu0 %vm837_vm3, %v2754_v5 }
 0x2e5   : > { %v2484_v56 = vpop.permute.xlu1 %2483 }
 0x2e6   : > { %v3327_v2 = vpop.permute.xlu0 %3326  ;;  %v2723_v45 = vsel %vm757_vm1, %v2691_v50, %v2484_v56  ;;  %v4705_v50 = vld [vmem:[%s5363_s19 + $0x1a1] sm:$0xff] }
 0x2e7   : > { %3604 = vrot.lane.b32.xlu1 %v4533_v55, %s5318_s11  ;;  %v3662_v32 = vsel %vm724_vm0, %v7432_v27, %v3327_v2  ;;  %v2692_v27 = vsel %vm724_vm0, %v7383_v13, %v7173_v9  ;;  %v4567_v13 = vld [vmem:[%s5363_s19 + $0x170] sm:$0xff] }
 0x2e8   : > { %2633 = vrot.lane.b32.xlu0 %v4565_v34, %s5318_s11  ;;  %v4704_v34 = vld [vmem:[%s5363_s19 + $0x199] sm:$0xff] }
 0x2e9   : > { %v3455_v4 = vpop.permute.xlu1 %3454 }
 0x2ea   : > { %v3329_v33 = vpop.permute.xlu0 %3328  ;;  %v3694_v31 = vsel %vm757_vm1, %v3662_v32, %v3455_v4  ;;  %v7819_v4 = vld [vmem:[%s5363_s19 + $0x182] sm:$0xff] }
 0x2eb   : > { %2507 = vrot.lane.b32.xlu1 %v4534_v22, %s5317_s21  ;;  %v3663_v1 = vsel %vm724_vm0, %v7472_v51, %v3329_v33 }
 0x2ec   : > { %3350 = vrot.lane.b32.xlu0 %v7760_v44, %s5316_s20 }
 0x2ed   : > { %v2612_v58 = vpop.permute.xlu1 %2611 }
 0x2ee   : > { %v2755_v52 = vsel %vm790_vm2, %v2723_v45, %v2612_v58  ;;  %v2486_v61 = vpop.permute.xlu0 %2485 }
 0x2ef   : > { %3478 = vrot.lane.b32.xlu1 %v7769_v53, %s5317_s21  ;;  %5173 = vmatprep.mubr.msk.f32.mxu0 %vm837_vm3, %v2755_v52  ;;  %v2724_v49 = vsel %vm757_vm1, %v2692_v27, %v2486_v61 }
 0x2f0   : > { %3352 = vrot.lane.b32.xlu0 %v7773_v8, %s5316_s20 }
 0x2f1   : > { %v3583_v55 = vpop.permute.xlu1 %3582 }
 0x2f2   : > { %v3726_v6 = vsel %vm790_vm2, %v3694_v31, %v3583_v55  ;;  %v3457_v54 = vpop.permute.xlu0 %3456 }
 0x2f3   : > { %2635 = vrot.lane.b32.xlu1 %v4566_v11, %s5318_s11  ;;  %5237 = vmatprep.mubr.msk.f32.mxu1 %vm837_vm3, %v3726_v6  ;;  %v3695_v16 = vsel %vm757_vm1, %v3663_v1, %v3457_v54  ;;  %v7844_v54 = vld [vmem:[%s5363_s19 + $0x18a] sm:$0xff] }
 0x2f4   : > { %2509 = vrot.lane.b32.xlu0 %v7721_v57, %s5317_s21 }
 0x2f5   : > { %v3585_v15 = vpop.permute.xlu1 %3584 }
 0x2f6   : > { %v3727_v17 = vsel %vm790_vm2, %v3695_v16, %v3585_v15  ;;  %v2614_v3 = vpop.permute.xlu0 %2613 }
 0x2f7   : > { %v2756_v51 = vsel %vm790_vm2, %v2724_v49, %v2614_v3  ;;  %3606 = vrot.lane.b32.xlu1 %v4534_v22, %s5318_s11  ;;  %5238 = vmatmul.mubr.msk.f32.gmra.mxu1 %vm837_vm3, %v3727_v17  ;;  %v2693_v22 = vsel %vm724_vm0, %v7422_v20, %v7186_v38  ;;  %v4568_v20 = vld [vmem:[%s5363_s19 + $0x180] sm:$0xff] }
 0x2f8   : > { %3480 = vrot.lane.b32.xlu0 %v7797_v62, %s5317_s21  ;;  %5174 = vmatmul.mubr.msk.f32.gmra.mxu0 %vm837_vm3, %v2756_v51 }
 0x2f9   : > { %v2488_v9 = vpop.permute.xlu1 %2487 }
 0x2fa   : > { %v3331_v5 = vpop.permute.xlu0 %3330  ;;  %v2725_v33 = vsel %vm757_vm1, %v2693_v22, %v2488_v9 }
 0x2fb   : > { %3608 = vrot.lane.b32.xlu1 %v7721_v57, %s5318_s11  ;;  %v3664_v38 = vsel %vm724_vm0, %v7510_v23, %v3331_v5  ;;  %v2694_v23 = vsel %vm724_vm0, %v7443_v19, %v7184_v59  ;;  %v4569_v19 = vld [vmem:[%s5363_s19 + $0x188] sm:$0xff] }
 0x2fc   : > { %2637 = vrot.lane.b32.xlu0 %v4567_v13, %s5318_s11 }
 0x2fd   : > { %v3459_v56 = vpop.permute.xlu1 %3458 }
 0x2fe   : > { %v3333_v2 = vpop.permute.xlu0 %3332  ;;  %v3696_v52 = vsel %vm757_vm1, %v3664_v38, %v3459_v56  ;;  %v2696_v38 = vsel %vm724_vm0, %v7517_v37, %v7195_v26  ;;  %v2697_v37 = vsel %vm724_vm0, %v7572_v28, %v7205_v47 }
 0x2ff   : > { %2511 = vrot.lane.b32.xlu1 %v7760_v44, %s5317_s21  ;;  %v3665_v31 = vsel %vm724_vm0, %v7546_v24, %v3333_v2 }
 0x300   : > { %3354 = vrot.lane.b32.xlu0 %v4704_v34, %s5316_s20 }
 0x301   : > { %v2616_v57 = vpop.permute.xlu1 %2615 }
 0x302   : > { %v2757_v45 = vsel %vm790_vm2, %v2725_v33, %v2616_v57  ;;  %v2490_v58 = vpop.permute.xlu0 %2489 }
 0x303   : > { %3482 = vrot.lane.b32.xlu1 %v7819_v4, %s5317_s21  ;;  %5176 = vmatprep.mubr.msk.f32.mxu0 %vm837_vm3, %v2757_v45  ;;  %v2726_v1 = vsel %vm757_vm1, %v2694_v23, %v2490_v58 }
 0x304   : > { %3356 = vrot.lane.b32.xlu0 %v4705_v50, %s5316_s20 }
 0x305   : > { %v3587_v61 = vpop.permute.xlu1 %3586 }
 0x306   : > { %v3728_v32 = vsel %vm790_vm2, %v3696_v52, %v3587_v61  ;;  %v3461_v11 = vpop.permute.xlu0 %3460 }
 0x307   : > { %2639 = vrot.lane.b32.xlu1 %v4568_v20, %s5318_s11  ;;  %5240 = vmatprep.mubr.msk.f32.mxu1 %vm837_vm3, %v3728_v32  ;;  %v3697_v55 = vsel %vm757_vm1, %v3665_v31, %v3461_v11 }
 0x308   : > { %2513 = vrot.lane.b32.xlu0 %v7773_v8, %s5317_s21 }
 0x309   : > { %v3589_v6 = vpop.permute.xlu1 %3588 }
 0x30a   : > { %v3729_v27 = vsel %vm790_vm2, %v3697_v55, %v3589_v6  ;;  %v2618_v16 = vpop.permute.xlu0 %2617 }
 0x30b   : > { %v2758_v15 = vsel %vm790_vm2, %v2726_v1, %v2618_v16  ;;  %3610 = vrot.lane.b32.xlu1 %v7760_v44, %s5318_s11  ;;  %5241 = vmatmul.mubr.msk.f32.gmra.mxu1 %vm837_vm3, %v3729_v27  ;;  %v2695_v44 = vsel %vm724_vm0, %v7498_v60, %v7197_v35 }
 0x30c   : > { %3484 = vrot.lane.b32.xlu0 %v7844_v54, %s5317_s21  ;;  %5177 = vmatmul.mubr.msk.f32.gmra.mxu0 %vm837_vm3, %v2758_v15 }
 0x30d   : > { %v2492_v59 = vpop.permute.xlu1 %2491 }
 0x30e   : > { %v3335_v24 = vpop.permute.xlu0 %3334  ;;  %v2727_v3 = vsel %vm757_vm1, %v2695_v44, %v2492_v59 }
 0x30f   : > { %3612 = vrot.lane.b32.xlu1 %v7773_v8, %s5318_s11  ;;  %v3666_v8 = vsel %vm724_vm0, %v7584_v40, %v3335_v24 }
 0x310   : > { %2641 = vrot.lane.b32.xlu0 %v4569_v19, %s5318_s11 }
 0x311   : > { %v3463_v49 = vpop.permute.xlu1 %3462 }
 0x312   : > { %v3337_v17 = vpop.permute.xlu0 %3336  ;;  %v3698_v2 = vsel %vm757_vm1, %v3666_v8, %v3463_v49 }
 0x313   : > { %v3667_v58 = vsel %vm724_vm0, %v7620_v7, %v3337_v17 }
 0x315   : > { %v2620_v51 = vpop.permute.xlu1 %2619 }
 0x316   : > { %v2759_v9 = vsel %vm790_vm2, %v2727_v3, %v2620_v51  ;;  %v2494_v13 = vpop.permute.xlu0 %2493 }
 0x317   : > { %5179 = vmatprep.mubr.msk.f32.mxu0 %vm837_vm3, %v2759_v9  ;;  %v5215_v5 = vpop.f32.mrf.mxu1  ;;  %v2728_v61 = vsel %vm757_vm1, %v2696_v38, %v2494_v13 }
 0x318   : > { %v5151_v56 = vpop.f32.mrf.mxu0  ;;  %v3919_v34 = vadd.f32 %v7438_v63, %v5215_v5  ;;  %v2698_v5 = vsel %vm724_vm0, %v7591_v30, %v7203_v46  ;;  %v2699_v30 = vsel %vm724_vm0, %v7646_v14, %v7216_v10 }
 0x319   : > { %v2948_v35 = vadd.f32 %v7438_v63, %v5151_v56  ;;  %v3591_v60 = vpop.permute.xlu1 %3590  ;;  %v3913_v22 = vpop.f32.mrf.mxu1 }
 0x31a   : > { %4811 = vst [vmem:[%s6701_s24 + $0x38] sm:$0xff] %v3919_v34  ;;  %v3730_v33 = vsel %vm790_vm2, %v3698_v2, %v3591_v60  ;;  %v3914_v57 = vadd.f32 %v7438_v63, %v3913_v22  ;;  %v3465_v50 = vpop.permute.xlu0 %3464  ;;  %v2942_v45 = vpop.f32.mrf.mxu0 }
 0x31b   : > { %4611 = vst [vmem:[%s6701_s24 + $0x28] sm:$0xff] %v2948_v35  ;;  %v2943_v40 = vadd.f32 %v7438_v63, %v2942_v45  ;;  %5243 = vmatprep.mubr.msk.f32.mxu1 %vm837_vm3, %v3730_v33  ;;  %v3699_v20 = vsel %vm757_vm1, %v3667_v58, %v3465_v50 }
 0x31c   : > { %4810 = vst [vmem:[%s6701_s24 + $0x30] sm:$0xff] %v3914_v57 }
 0x31d   : > { %4610 = vst [vmem:[%s6701_s24 + $0x20] sm:$0xff] %v2943_v40  ;;  %v3593_v52 = vpop.permute.xlu1 %3592 }
 0x31e   : > { %v3731_v32 = vsel %vm790_vm2, %v3699_v20, %v3593_v52  ;;  %v2622_v11 = vpop.permute.xlu0 %2621 }
 0x31f   : > { %v2760_v31 = vsel %vm790_vm2, %v2728_v61, %v2622_v11  ;;  %5244 = vmatmul.mubr.msk.f32.gmra.mxu1 %vm837_vm3, %v3731_v32 }
 0x320   : > { %5180 = vmatmul.mubr.msk.f32.gmra.mxu0 %vm837_vm3, %v2760_v31 }
 0x321   : > { %v2496_v7 = vpop.permute.xlu1 %2495 }
 0x322   : > { %v3339_v23 = vpop.permute.xlu0 %3338  ;;  %v2729_v6 = vsel %vm757_vm1, %v2697_v37, %v2496_v7 }
 0x323   : > { %v3668_v59 = vsel %vm724_vm0, %v7658_v21, %v3339_v23 }
 0x325   : > { %v3467_v55 = vpop.permute.xlu1 %3466 }
 0x326   : > { %v3341_v26 = vpop.permute.xlu0 %3340  ;;  %v3700_v49 = vsel %vm757_vm1, %v3668_v59, %v3467_v55 }
 0x327   : > { %v3669_v13 = vsel %vm724_vm0, %v7691_v48, %v3341_v26  ;;  %v2700_v26 = vsel %vm724_vm0, %v7665_v42, %v7211_v36  ;;  %v2701_v42 = vsel %vm724_vm0, %v7708_v12, %v7230_v0 }
 0x329   : > { %v2624_v1 = vpop.permute.xlu1 %2623 }
 0x32a   : > { %v2761_v27 = vsel %vm790_vm2, %v2729_v6, %v2624_v1  ;;  %v2498_v16 = vpop.permute.xlu0 %2497 }
 0x32b   : > { %5182 = vmatprep.mubr.msk.f32.mxu0 %vm837_vm3, %v2761_v27  ;;  %v5218_v15 = vpop.f32.mrf.mxu1  ;;  %v2730_v34 = vsel %vm757_vm1, %v2698_v5, %v2498_v16 }
 0x32c   : > { %v5154_v19 = vpop.f32.mrf.mxu0  ;;  %v3929_v24 = vadd.f32 %v7438_v63, %v5218_v15 }
 0x32d   : > { %v2958_v47 = vadd.f32 %v7438_v63, %v5154_v19  ;;  %v3595_v28 = vpop.permute.xlu1 %3594  ;;  %v3923_v17 = vpop.f32.mrf.mxu1 }
 0x32e   : > { %4813 = vst [vmem:[%s6701_s24 + $0x78] sm:$0xff] %v3929_v24  ;;  %v3732_v44 = vsel %vm790_vm2, %v3700_v49, %v3595_v28  ;;  %v3924_v3 = vadd.f32 %v7438_v63, %v3923_v17  ;;  %v3469_v51 = vpop.permute.xlu0 %3468  ;;  %v2952_v9 = vpop.f32.mrf.mxu0 }
 0x32f   : > { %4613 = vst [vmem:[%s6701_s24 + $0x68] sm:$0xff] %v2958_v47  ;;  %v2953_v21 = vadd.f32 %v7438_v63, %v2952_v9  ;;  %5246 = vmatprep.mubr.msk.f32.mxu1 %vm837_vm3, %v3732_v44  ;;  %v3701_v8 = vsel %vm757_vm1, %v3669_v13, %v3469_v51  ;;  %v4469_v13 = vld [vmem:[%s5363_s19 + $0x171] sm:$0xff] }
 0x330   : > { %4812 = vst [vmem:[%s6701_s24 + $0x70] sm:$0xff] %v3924_v3 }
 0x331   : > { %4612 = vst [vmem:[%s6701_s24 + $0x60] sm:$0xff] %v2953_v21  ;;  %v3597_v56 = vpop.permute.xlu1 %3596 }
 0x332   : > { %v3733_v2 = vsel %vm790_vm2, %v3701_v8, %v3597_v56  ;;  %v2626_v35 = vpop.permute.xlu0 %2625  ;;  %v7966_v8 = vld [vmem:[%s8135_s2] ss:$0 sm:$0xff] }
 0x333   : > { %v2762_v60 = vsel %vm790_vm2, %v2730_v34, %v2626_v35  ;;  %5247 = vmatmul.mubr.msk.f32.gmra.mxu1 %vm837_vm3, %v3733_v2  ;;  %v2702_v35 = vsel %vm724_vm0, %v4469_v13, %v7225_v41 }
 0x334   : > { %5183 = vmatmul.mubr.msk.f32.gmra.mxu0 %vm837_vm3, %v2762_v60 }
 0x335   : > { %v2500_v48 = vpop.permute.xlu1 %2499 }
 0x336   : > { %v3343_v22 = vpop.permute.xlu0 %3342  ;;  %v2731_v57 = vsel %vm757_vm1, %v2699_v30, %v2500_v48 }
 0x337   : > { %v3670_v38 = vsel %vm724_vm0, %v7717_v39, %v3343_v22 }
 0x339   : > { %v3471_v33 = vpop.permute.xlu1 %3470 }
 0x33a   : > { %v3345_v46 = vpop.permute.xlu0 %3344  ;;  %v3702_v61 = vsel %vm757_vm1, %v3670_v38, %v3471_v33 }
 0x33b   : > { %v3671_v55 = vsel %vm724_vm0, %v7745_v25, %v3345_v46 }
 0x33d   : > { %v2628_v50 = vpop.permute.xlu1 %2627 }
 0x33e   : > { %v2763_v45 = vsel %vm790_vm2, %v2731_v57, %v2628_v50  ;;  %v2502_v40 = vpop.permute.xlu0 %2501  ;;  %v4470_v50 = vld [vmem:[%s5363_s19 + $0x181] sm:$0xff] }
 0x33f   : > { %5185 = vmatprep.mubr.msk.f32.mxu0 %vm837_vm3, %v2763_v45  ;;  %v5221_v58 = vpop.f32.mrf.mxu1  ;;  %v2732_v1 = vsel %vm757_vm1, %v2700_v26, %v2502_v40  ;;  %v2703_v40 = vsel %vm724_vm0, %v4470_v50, %v7238_v18 }
 0x340   : > { %v5157_v20 = vpop.f32.mrf.mxu0  ;;  %v3939_v52 = vadd.f32 %v7438_v63, %v5221_v58 }
 0x341   : > { %v2968_v10 = vadd.f32 %v7438_v63, %v5157_v20  ;;  %v3599_v14 = vpop.permute.xlu1 %3598  ;;  %v3933_v32 = vpop.f32.mrf.mxu1 }
 0x342   : > { %4815 = vst [vmem:[%s6701_s24 + $0xb8] sm:$0xff] %v3939_v52  ;;  %v3734_v11 = vsel %vm790_vm2, %v3702_v61, %v3599_v14  ;;  %v3934_v31 = vadd.f32 %v7438_v63, %v3933_v32  ;;  %v3473_v7 = vpop.permute.xlu0 %3472  ;;  %v2962_v23 = vpop.f32.mrf.mxu0 }
 0x343   : > { %4615 = vst [vmem:[%s6701_s24 + $0xa8] sm:$0xff] %v2968_v10  ;;  %v2963_v39 = vadd.f32 %v7438_v63, %v2962_v23  ;;  %5249 = vmatprep.mubr.msk.f32.mxu1 %vm837_vm3, %v3734_v11  ;;  %v3703_v37 = vsel %vm757_vm1, %v3671_v55, %v3473_v7  ;;  %v4471_v23 = vld [vmem:[%s5363_s19 + $0x189] sm:$0xff] }
 0x344   : > { %4814 = vst [vmem:[%s6701_s24 + $0xb0] sm:$0xff] %v3934_v31 }
 0x345   : > { %4614 = vst [vmem:[%s6701_s24 + $0xa0] sm:$0xff] %v2963_v39  ;;  %v3601_v6 = vpop.permute.xlu1 %3600 }
 0x346   : > { %v3735_v27 = vsel %vm790_vm2, %v3703_v37, %v3601_v6  ;;  %v2630_v16 = vpop.permute.xlu0 %2629 }
 0x347   : > { %v2764_v15 = vsel %vm790_vm2, %v2732_v1, %v2630_v16  ;;  %5250 = vmatmul.mubr.msk.f32.gmra.mxu1 %vm837_vm3, %v3735_v27  ;;  %v2704_v1 = vsel %vm724_vm0, %v4471_v23, %v7236_v43  ;;  %v4472_v43 = vld [vmem:[%s5363_s19 + $0x199] sm:$0xff] }
 0x348   : > { %5186 = vmatmul.mubr.msk.f32.gmra.mxu0 %vm837_vm3, %v2764_v15 }
 0x349   : > { %v2504_v25 = vpop.permute.xlu1 %2503 }
 0x34a   : > { %v3347_v59 = vpop.permute.xlu0 %3346  ;;  %v2733_v24 = vsel %vm757_vm1, %v2701_v42, %v2504_v25 }
 0x34b   : > { %v3672_v44 = vsel %vm724_vm0, %v7769_v53, %v3347_v59 }
 0x34d   : > { %v3475_v19 = vpop.permute.xlu1 %3474 }
 0x34e   : > { %v3349_v36 = vpop.permute.xlu0 %3348  ;;  %v3704_v9 = vsel %vm757_vm1, %v3672_v44, %v3475_v19 }
 0x351   : > { %v2632_v49 = vpop.permute.xlu1 %2631 }
 0x352   : > { %v2765_v47 = vsel %vm790_vm2, %v2733_v24, %v2632_v49  ;;  %v2506_v28 = vpop.permute.xlu0 %2505  ;;  %v2705_v49 = vsel %vm724_vm0, %v4472_v43, %v7249_v29 }
 0x353   : > { %5188 = vmatprep.mubr.msk.f32.mxu0 %vm837_vm3, %v2765_v47  ;;  %v5224_v17 = vpop.f32.mrf.mxu1  ;;  %v2734_v22 = vsel %vm757_vm1, %v2702_v35, %v2506_v28  ;;  %v4672_v28 = vld [vmem:[%s5363_s19 + $0x19a] sm:$0xff] }
 0x354   : > { %v5160_v3 = vpop.f32.mrf.mxu0  ;;  %v3949_v51 = vadd.f32 %v7438_v63, %v5224_v17 }
 0x355   : > { %v2978_v0 = vadd.f32 %v7438_v63, %v5160_v3  ;;  %v3603_v12 = vpop.permute.xlu1 %3602  ;;  %v3943_v21 = vpop.f32.mrf.mxu1  ;;  %v3673_v63 = vsel %vm724_vm0, %v7797_v62, %v3349_v36 }
 0x356   : > { %4817 = vst [vmem:[%s6701_s24 + $0xf8] sm:$0xff] %v3949_v51  ;;  %v3736_v5 = vsel %vm790_vm2, %v3704_v9, %v3603_v12  ;;  %v3944_v53 = vadd.f32 %v7966_v8, %v3943_v21  ;;  %v3477_v56 = vpop.permute.xlu0 %3476  ;;  %v2972_v34 = vpop.f32.mrf.mxu0  ;;  %v4673_v21 = vld [vmem:[%s5363_s19 + $0x1a2] sm:$0xff] }
 0x357   : > { %4617 = vst [vmem:[%s6701_s24 + $0xe8] sm:$0xff] %v2978_v0  ;;  %v2973_v2 = vadd.f32 %v7966_v8, %v2972_v34  ;;  %5252 = vmatprep.mubr.msk.f32.mxu1 %vm837_vm3, %v3736_v5  ;;  %v3705_v60 = vsel %vm757_vm1, %v3673_v63, %v3477_v56  ;;  %v4473_v56 = vld [vmem:[%s5363_s19 + $0x1a1] sm:$0xff] }
 0x358   : > { %4816 = vst [vmem:[%s6701_s24 + $0xf0] sm:$0xff] %v3944_v53 }
 0x359   : > { %4616 = vst [vmem:[%s6701_s24 + $0xe0] sm:$0xff] %v2973_v2  ;;  %v3605_v48 = vpop.permute.xlu1 %3604 }
 0x35a   : > { %v3737_v33 = vsel %vm790_vm2, %v3705_v60, %v3605_v48  ;;  %v2634_v46 = vpop.permute.xlu0 %2633 }
 0x35b   : > { %v2766_v30 = vsel %vm790_vm2, %v2734_v22, %v2634_v46  ;;  %5253 = vmatmul.mubr.msk.f32.gmra.mxu1 %vm837_vm3, %v3737_v33  ;;  %v8375_v22 = vld [vmem:[#allocation19_spill] sm:$0xff] }
 0x35c   : > { %5189 = vmatmul.mubr.msk.f32.gmra.mxu0 %vm837_vm3, %v2766_v30  ;;  %v2706_v33 = vsel %vm724_vm0, %v4473_v56, %v8375_v22 }
 0x35d   : > { %v2508_v62 = vpop.permute.xlu1 %2507 }
 0x35e   : > { %v3351_v57 = vpop.permute.xlu0 %3350  ;;  %v2735_v58 = vsel %vm757_vm1, %v2703_v40, %v2508_v62 }
 0x35f   : > { %v3674_v10 = vsel %vm724_vm0, %v7819_v4, %v3351_v57 }
 0x361   : > { %v3479_v45 = vpop.permute.xlu1 %3478 }
 0x362   : > { %v3353_v41 = vpop.permute.xlu0 %3352  ;;  %v3706_v11 = vsel %vm757_vm1, %v3674_v10, %v3479_v45 }
 0x363   : > { %v3675_v6 = vsel %vm724_vm0, %v7844_v54, %v3353_v41 }
 0x365   : > { %v2636_v38 = vpop.permute.xlu1 %2635 }
 0x366   : > { %v2767_v20 = vsel %vm790_vm2, %v2735_v58, %v2636_v38  ;;  %v2510_v52 = vpop.permute.xlu0 %2509 }
 0x367   : > { %5191 = vmatprep.mubr.msk.f32.mxu0 %vm837_vm3, %v2767_v20  ;;  %v5227_v61 = vpop.f32.mrf.mxu1  ;;  %v2736_v15 = vsel %vm757_vm1, %v2704_v1, %v2510_v52 }
 0x368   : > { %v5163_v14 = vpop.f32.mrf.mxu0  ;;  %v3959_v32 = vadd.f32 %v7966_v8, %v5227_v61 }
 0x369   : > { %v2988_v18 = vadd.f32 %v7966_v8, %v5163_v14  ;;  %v3607_v31 = vpop.permute.xlu1 %3606  ;;  %v3953_v7 = vpop.f32.mrf.mxu1 }
 0x36a   : > { %4819 = vst [vmem:[%s6701_s24 + $0x138] sm:$0xff] %v3959_v32  ;;  %v3738_v39 = vsel %vm790_vm2, %v3706_v11, %v3607_v31  ;;  %v3954_v55 = vadd.f32 %v7966_v8, %v3953_v7  ;;  %v3481_v26 = vpop.permute.xlu0 %3480  ;;  %v2982_v37 = vpop.f32.mrf.mxu0 }
 0x36b   : > { %4619 = vst [vmem:[%s6701_s24 + $0x128] sm:$0xff] %v2988_v18  ;;  %v2983_v4 = vadd.f32 %v7966_v8, %v2982_v37  ;;  %5255 = vmatprep.mubr.msk.f32.mxu1 %vm837_vm3, %v3738_v39  ;;  %v3707_v27 = vsel %vm757_vm1, %v3675_v6, %v3481_v26 }
 0x36c   : > { %4818 = vst [vmem:[%s6701_s24 + $0x130] sm:$0xff] %v3954_v55 }
 0x36d   : > { %4618 = vst [vmem:[%s6701_s24 + $0x120] sm:$0xff] %v2983_v4  ;;  %v3609_v16 = vpop.permute.xlu1 %3608 }
 0x36e   : > { %v3739_v25 = vsel %vm790_vm2, %v3707_v27, %v3609_v16  ;;  %v2638_v59 = vpop.permute.xlu0 %2637 }
 0x36f   : > { %v2768_v19 = vsel %vm790_vm2, %v2736_v15, %v2638_v59  ;;  %5256 = vmatmul.mubr.msk.f32.gmra.mxu1 %vm837_vm3, %v3739_v25 }
 0x370   : > { %5192 = vmatmul.mubr.msk.f32.gmra.mxu0 %vm837_vm3, %v2768_v19 }
 0x371   : > { %v2512_v54 = vpop.permute.xlu1 %2511 }
 0x372   : > { %v3355_v36 = vpop.permute.xlu0 %3354  ;;  %v2737_v47 = vsel %vm757_vm1, %v2705_v49, %v2512_v54 }
 0x373   : > { %v3676_v9 = vsel %vm724_vm0, %v4672_v28, %v3355_v36 }
 0x375   : > { %v3483_v42 = vpop.permute.xlu1 %3482 }
 0x376   : > { %v3357_v24 = vpop.permute.xlu0 %3356  ;;  %v3708_v29 = vsel %vm757_vm1, %v3676_v9, %v3483_v42 }
 0x377   : > { %v3677_v48 = vsel %vm724_vm0, %v4673_v21, %v3357_v24 }
 0x379   : > { %v2640_v17 = vpop.permute.xlu1 %2639 }
 0x37a   : > { %v2769_v44 = vsel %vm790_vm2, %v2737_v47, %v2640_v17  ;;  %v2514_v3 = vpop.permute.xlu0 %2513 }
 0x37b   : > { %5194 = vmatprep.mubr.msk.f32.mxu0 %vm837_vm3, %v2769_v44  ;;  %v5230_v51 = vpop.f32.mrf.mxu1  ;;  %v2738_v62 = vsel %vm757_vm1, %v2706_v33, %v2514_v3 }
 0x37c   : > { %v5166_v0 = vpop.f32.mrf.mxu0  ;;  %v3969_v12 = vadd.f32 %v7966_v8, %v5230_v51 }
 0x37d   : > { %v2998_v13 = vadd.f32 %v7966_v8, %v5166_v0  ;;  %v3611_v5 = vpop.permute.xlu1 %3610  ;;  %v3963_v53 = vpop.f32.mrf.mxu1 }
 0x37e   : > { %4821 = vst [vmem:[%s6701_s24 + $0x178] sm:$0xff] %v3969_v12  ;;  %v3740_v34 = vsel %vm790_vm2, %v3708_v29, %v3611_v5  ;;  %v3964_v2 = vadd.f32 %v7966_v8, %v3963_v53  ;;  %v3485_v63 = vpop.permute.xlu0 %3484  ;;  %v2992_v35 = vpop.f32.mrf.mxu0 }
 0x37f   : > { %4621 = vst [vmem:[%s6701_s24 + $0x168] sm:$0xff] %v2998_v13  ;;  %v2993_v60 = vadd.f32 %v7966_v8, %v2992_v35  ;;  %5258 = vmatprep.mubr.msk.f32.mxu1 %vm837_vm3, %v3740_v34  ;;  %v3709_v46 = vsel %vm757_vm1, %v3677_v48, %v3485_v63 }
 0x380   : > { %4820 = vst [vmem:[%s6701_s24 + $0x170] sm:$0xff] %v3964_v2 }
 0x381   : > { %4620 = vst [vmem:[%s6701_s24 + $0x160] sm:$0xff] %v2993_v60  ;;  %v3613_v30 = vpop.permute.xlu1 %3612 }
 0x382   : > { %v3741_v57 = vsel %vm790_vm2, %v3709_v46, %v3613_v30  ;;  %v2642_v50 = vpop.permute.xlu0 %2641 }
 0x383   : > { %v2770_v45 = vsel %vm790_vm2, %v2738_v62, %v2642_v50  ;;  %5259 = vmatmul.mubr.msk.f32.gmra.mxu1 %vm837_vm3, %v3741_v57 }
 0x384   : > { %5195 = vmatmul.mubr.msk.f32.gmra.mxu0 %vm837_vm3, %v2770_v45 }
 0x38f   : > { %v5233_v41 = vpop.f32.mrf.mxu1 }
 0x390   : > { %v5169_v40 = vpop.f32.mrf.mxu0  ;;  %v3979_v58 = vadd.f32 %v7966_v8, %v5233_v41 }
 0x391   : > { %v3008_v38 = vadd.f32 %v7966_v8, %v5169_v40  ;;  %v3973_v20 = vpop.f32.mrf.mxu1 }
 0x392   : > { %4823 = vst [vmem:[%s6701_s24 + $0x1b8] sm:$0xff] %v3979_v58  ;;  %v3002_v52 = vpop.f32.mrf.mxu0  ;;  %v3974_v61 = vadd.f32 %v7966_v8, %v3973_v20 }
 0x393   : > { %4623 = vst [vmem:[%s6701_s24 + $0x1a8] sm:$0xff] %v3008_v38  ;;  %v3003_v10 = vadd.f32 %v7966_v8, %v3002_v52 }
 0x394   : > { %4822 = vst [vmem:[%s6701_s24 + $0x1b0] sm:$0xff] %v3974_v61 }
 0x395   : > { %4622 = vst [vmem:[%s6701_s24 + $0x1a0] sm:$0xff] %v3003_v10 }
 0x3a3   : > { %v5236_v14 = vpop.f32.mrf.mxu1 }
 0x3a4   : > { %v5172_v32 = vpop.f32.mrf.mxu0  ;;  %v3989_v11 = vadd.f32 %v7966_v8, %v5236_v14 }
 0x3a5   : > { %v3018_v18 = vadd.f32 %v7966_v8, %v5172_v32  ;;  %v3983_v31 = vpop.f32.mrf.mxu1 }
 0x3a6   : > { %4825 = vst [vmem:[%s6701_s24 + $0x1f8] sm:$0xff] %v3989_v11  ;;  %v3012_v7 = vpop.f32.mrf.mxu0  ;;  %v3984_v23 = vadd.f32 %v7966_v8, %v3983_v31 }
 0x3a7   : > { %4625 = vst [vmem:[%s6701_s24 + $0x1e8] sm:$0xff] %v3018_v18  ;;  %v3013_v39 = vadd.f32 %v7966_v8, %v3012_v7 }
 0x3a8   : > { %4824 = vst [vmem:[%s6701_s24 + $0x1f0] sm:$0xff] %v3984_v23 }
 0x3a9   : > { %4624 = vst [vmem:[%s6701_s24 + $0x1e0] sm:$0xff] %v3013_v39 }
 0x3b7   : > { %v5239_v55 = vpop.f32.mrf.mxu1 }
 0x3b8   : > { %v5175_v26 = vpop.f32.mrf.mxu0  ;;  %v3999_v37 = vadd.f32 %v7966_v8, %v5239_v55 }
 0x3b9   : > { %v3028_v4 = vadd.f32 %v7966_v8, %v5175_v26  ;;  %v3993_v6 = vpop.f32.mrf.mxu1 }
 0x3ba   : > { %4827 = vst [vmem:[%s6701_s24 + $0x238] sm:$0xff] %v3999_v37  ;;  %v3022_v1 = vpop.f32.mrf.mxu0  ;;  %v3994_v27 = vadd.f32 %v7966_v8, %v3993_v6 }
 0x3bb   : > { %4627 = vst [vmem:[%s6701_s24 + $0x228] sm:$0xff] %v3028_v4  ;;  %v3023_v16 = vadd.f32 %v7966_v8, %v3022_v1 }
 0x3bc   : > { %4826 = vst [vmem:[%s6701_s24 + $0x230] sm:$0xff] %v3994_v27 }
 0x3bd   : > { %4626 = vst [vmem:[%s6701_s24 + $0x220] sm:$0xff] %v3023_v16 }
 0x3cb   : > { %v5242_v15 = vpop.f32.mrf.mxu1 }
 0x3cc   : > { %v5178_v25 = vpop.f32.mrf.mxu0  ;;  %v4009_v59 = vadd.f32 %v7966_v8, %v5242_v15 }
 0x3cd   : > { %v3038_v19 = vadd.f32 %v7966_v8, %v5178_v25  ;;  %v4003_v54 = vpop.f32.mrf.mxu1 }
 0x3ce   : > { %4829 = vst [vmem:[%s6701_s24 + $0x278] sm:$0xff] %v4009_v59  ;;  %v3032_v36 = vpop.f32.mrf.mxu0  ;;  %v4004_v43 = vadd.f32 %v7966_v8, %v4003_v54 }
 0x3cf   : > { %4629 = vst [vmem:[%s6701_s24 + $0x268] sm:$0xff] %v3038_v19  ;;  %v3033_v42 = vadd.f32 %v7966_v8, %v3032_v36 }
 0x3d0   : > { %4828 = vst [vmem:[%s6701_s24 + $0x270] sm:$0xff] %v4004_v43 }
 0x3d1   : > { %4628 = vst [vmem:[%s6701_s24 + $0x260] sm:$0xff] %v3033_v42 }
 0x3df   : > { %v5245_v24 = vpop.f32.mrf.mxu1 }
 0x3e0   : > { %v5181_v49 = vpop.f32.mrf.mxu0  ;;  %v4019_v47 = vadd.f32 %v7966_v8, %v5245_v24 }
 0x3e1   : > { %v3048_v28 = vadd.f32 %v7966_v8, %v5181_v49  ;;  %v4013_v17 = vpop.f32.mrf.mxu1 }
 0x3e2   : > { %4831 = vst [vmem:[%s6701_s24 + $0x2b8] sm:$0xff] %v4019_v47  ;;  %v3042_v44 = vpop.f32.mrf.mxu0  ;;  %v4014_v3 = vadd.f32 %v7966_v8, %v4013_v17 }
 0x3e3   : > { %4631 = vst [vmem:[%s6701_s24 + $0x2a8] sm:$0xff] %v3048_v28  ;;  %v3043_v51 = vadd.f32 %v7966_v8, %v3042_v44 }
 0x3e4   : > { %4830 = vst [vmem:[%s6701_s24 + $0x2b0] sm:$0xff] %v4014_v3 }
 0x3e5   : > { %4630 = vst [vmem:[%s6701_s24 + $0x2a0] sm:$0xff] %v3043_v51 }
 0x3f3   : > { %v5248_v9 = vpop.f32.mrf.mxu1 }
 0x3f4   : > { %v5184_v0 = vpop.f32.mrf.mxu0  ;;  %v4029_v12 = vadd.f32 %v7966_v8, %v5248_v9 }
 0x3f5   : > { %v3058_v29 = vadd.f32 %v7966_v8, %v5184_v0  ;;  %v4023_v21 = vpop.f32.mrf.mxu1 }
 0x3f6   : > { %4833 = vst [vmem:[%s6701_s24 + $0x2f8] sm:$0xff] %v4029_v12  ;;  %v3052_v13 = vpop.f32.mrf.mxu0  ;;  %v4024_v5 = vadd.f32 %v7966_v8, %v4023_v21 }
 0x3f7   : > { %4633 = vst [vmem:[%s6701_s24 + $0x2e8] sm:$0xff] %v3058_v29  ;;  %v3053_v53 = vadd.f32 %v7966_v8, %v3052_v13 }
 0x3f8   : > { %4832 = vst [vmem:[%s6701_s24 + $0x2f0] sm:$0xff] %v4024_v5 }
 0x3f9   : > { %4632 = vst [vmem:[%s6701_s24 + $0x2e0] sm:$0xff] %v3053_v53 }
 0x407   : > { %v5251_v56 = vpop.f32.mrf.mxu1 }
 0x408   : > { %v5187_v34 = vpop.f32.mrf.mxu0  ;;  %v4039_v2 = vadd.f32 %v7966_v8, %v5251_v56 }
 0x409   : > { %v3068_v63 = vadd.f32 %v7966_v8, %v5187_v34  ;;  %v4033_v35 = vpop.f32.mrf.mxu1 }
 0x40a   : > { %4835 = vst [vmem:[%s6701_s24 + $0x338] sm:$0xff] %v4039_v2  ;;  %v3062_v60 = vpop.f32.mrf.mxu0  ;;  %v4034_v48 = vadd.f32 %v7966_v8, %v4033_v35 }
 0x40b   : > { %4635 = vst [vmem:[%s6701_s24 + $0x328] sm:$0xff] %v3068_v63  ;;  %v3063_v22 = vadd.f32 %v7966_v8, %v3062_v60 }
 0x40c   : > { %4834 = vst [vmem:[%s6701_s24 + $0x330] sm:$0xff] %v4034_v48 }
 0x40d   : > { %4634 = vst [vmem:[%s6701_s24 + $0x320] sm:$0xff] %v3063_v22 }
 0x41b   : > { %v5254_v33 = vpop.f32.mrf.mxu1 }
 0x41c   : > { %v5190_v46 = vpop.f32.mrf.mxu0  ;;  %v4049_v30 = vadd.f32 %v7966_v8, %v5254_v33 }
 0x41d   : > { %v3078_v62 = vadd.f32 %v7966_v8, %v5190_v46  ;;  %v4043_v57 = vpop.f32.mrf.mxu1 }
 0x41e   : > { %4837 = vst [vmem:[%s6701_s24 + $0x378] sm:$0xff] %v4049_v30  ;;  %v3072_v50 = vpop.f32.mrf.mxu0  ;;  %v4044_v45 = vadd.f32 %v7966_v8, %v4043_v57 }
 0x41f   : > { %4637 = vst [vmem:[%s6701_s24 + $0x368] sm:$0xff] %v3078_v62  ;;  %v3073_v41 = vadd.f32 %v7966_v8, %v3072_v50 }
 0x420   : > { %4836 = vst [vmem:[%s6701_s24 + $0x370] sm:$0xff] %v4044_v45 }
 0x421   : > { %4636 = vst [vmem:[%s6701_s24 + $0x360] sm:$0xff] %v3073_v41 }
 0x42f   : > { %v5257_v40 = vpop.f32.mrf.mxu1 }
 0x430   : > { %v5193_v58 = vpop.f32.mrf.mxu0  ;;  %v4059_v38 = vadd.f32 %v7966_v8, %v5257_v40 }
 0x431   : > { %v3088_v20 = vadd.f32 %v7966_v8, %v5193_v58  ;;  %v4053_v52 = vpop.f32.mrf.mxu1 }
 0x432   : > { %4839 = vst [vmem:[%s6701_s24 + $0x3b8] sm:$0xff] %v4059_v38  ;;  %v3082_v61 = vpop.f32.mrf.mxu0  ;;  %v4054_v10 = vadd.f32 %v7966_v8, %v4053_v52 }
 0x433   : > { %4639 = vst [vmem:[%s6701_s24 + $0x3a8] sm:$0xff] %v3088_v20  ;;  %v3083_v14 = vadd.f32 %v7966_v8, %v3082_v61 }
 0x434   : > { %4838 = vst [vmem:[%s6701_s24 + $0x3b0] sm:$0xff] %v4054_v10 }
 0x435   : > { %4638 = vst [vmem:[%s6701_s24 + $0x3a0] sm:$0xff] %v3083_v14 }
 0x443   : > { %v5260_v32 = vpop.f32.mrf.mxu1 }
 0x444   : > { %v5196_v11 = vpop.f32.mrf.mxu0  ;;  %v4069_v18 = vadd.f32 %v7966_v8, %v5260_v32 }
 0x445   : > { %v3098_v31 = vadd.f32 %v7966_v8, %v5196_v11  ;;  %v4063_v7 = vpop.f32.mrf.mxu1 }
 0x446   : > { %4841 = vst [vmem:[%s6701_s24 + $0x3f8] sm:$0xff] %v4069_v18  ;;  %v3092_v23 = vpop.f32.mrf.mxu0  ;;  %v4064_v39 = vadd.f32 %v7966_v8, %v4063_v7 }
 0x447   : > { %4641 = vst [vmem:[%s6701_s24 + $0x3e8] sm:$0xff] %v3098_v31  ;;  %v3093_v55 = vadd.f32 %v7966_v8, %v3092_v23 }
 0x448   : > { %4840 = vst [vmem:[%s6701_s24 + $0x3f0] sm:$0xff] %v4064_v39 }
 0x449   : > { %4640 = vst [vmem:[%s6701_s24 + $0x3e0] sm:$0xff] %v3093_v55 }
 0x44a PF: > { %s13_s14 = sadd.s32 1, %s5314_s14   ;;  %s8376_s12 = smov %s5310_s13 }
 0x44b   : > { %p10_p5 = scmp.ge.s32.totalorder %s13_s14, 4   ;;  %s8377_s13 = smov %s8379_s15 }
 0x44d   :  { %12 = sbr.rel (!%p10_p5) target bundleno = 2 (0x2), region = 70 }

</bundles_post_ra>
